<compile_context>
chip_gen: v7x
topology: tpu7x:2x2x1
jax: 0.10.0
libtpu: 0.0.40
codegen_flags: <defaults>
</compile_context>

<pallas_src>
import functools

import jax
import jax.numpy as jnp
import numpy as np
from jax import lax
from jax.experimental import pallas as pl
from jax.experimental.pallas import tpu as pltpu


# ----------------------------------------------------------------------------
# helpers
# ----------------------------------------------------------------------------
def _round_up(x, m):
    return ((x + m - 1) // m) * m


def _sublane(dtype):
    """Sublane tile height for a dtype: 8 rows f32, 16 bf16, 32 int8/fp8."""
    return 8 * max(1, 4 // jnp.dtype(dtype).itemsize)


def _padded_block_bytes(shape, dtype):
    """Layout-aware VMEM footprint of one block: the last dim is physically
    padded to 128 lanes and the second-minor to the dtype sublane tile."""
    itemsize = jnp.dtype(dtype).itemsize
    s = [int(d) for d in shape]
    if len(s) >= 1:
        s[-1] = _round_up(s[-1], 128)
    if len(s) >= 2:
        s[-2] = _round_up(s[-2], _sublane(dtype))
    total = 1
    for d in s:
        total *= d
    return total * itemsize


def _pick_group(M, N, max_gn=256):
    """Patches per block-diagonal MXU tile.  G must divide M; prefer G*N a
    multiple of 128 (lane-dense slices / stores, full MXU rows) with the
    smallest such GN; cap GN to bound the block-diagonal zero-fill waste."""
    divs = [g for g in range(1, M + 1) if M % g == 0]
    cands = [g for g in divs if g == 1 or g * N <= max_gn]
    aligned = [g for g in cands if (g * N) % 128 == 0]
    if aligned:
        return min(aligned, key=lambda g: g * N)
    return max(cands)


def _pick_gpt(MG, *, B, S, G, N, GN, c_pad, c_out, n_feats,
              compute_dtype, support_dtype, out_dtype,
              budget_bytes, min_grid_steps):
    """Groups of G patches per grid step.  Largest divisor of MG whose
    (double-buffered, padding-aware) blocks fit the VMEM budget while the grid
    keeps at least ~min_grid_steps steps (megacore sharding / pipeline depth)."""
    def est(gpt):
        xb = _padded_block_bytes((gpt, c_pad, GN), compute_dtype)
        ab = S * _padded_block_bytes((gpt * G, N, N), support_dtype)
        ob = _padded_block_bytes((gpt, c_out, GN), out_dtype)
        wb = _padded_block_bytes((c_out, n_feats * c_pad), compute_dtype)
        bb = _padded_block_bytes((c_out, 1), jnp.float32)
        scratch = _padded_block_bytes((GN, GN), compute_dtype)
        return 2 * (xb + ab + ob + wb + bb) + scratch   # double-buffered blocks

    divs = [d for d in range(1, MG + 1) if MG % d == 0]
    fitting = [d for d in divs if est(d) <= budget_bytes] or [1]
    target = min(min_grid_steps, B * MG)
    deep = [d for d in fitting if B * (MG // d) >= target]
    return max(deep) if deep else min(fitting)


# ----------------------------------------------------------------------------
# kernel
# ----------------------------------------------------------------------------
def _gcn_kernel(*refs, S, order, G, GN, N, gpt, compute_dtype, mm_precision,
                unroll_groups):
    x_ref = refs[0]                    # (gpt, c_pad, GN)        compute dtype
    a_refs = refs[1:1 + S]             # each (gpt*G, N, N)      native support dtype
    w_ref = refs[1 + S]                # (c_out, n_feats*c_pad)  compute dtype
    b_ref = refs[2 + S]                # (c_out, 1)              f32
    o_ref = refs[3 + S]                # (gpt, c_out, GN)        out dtype
    adiag = refs[4 + S]                # (GN, GN) scratch        compute dtype

    # Hoisted once per grid step.
    w = w_ref[...]
    bvec = b_ref[...]

    # Only the diagonal (N, N) blocks of adiag are ever written below, so zero
    # the scratch once per step (it is uninitialized on each core's first step).
    adiag[...] = jnp.zeros(adiag.shape, adiag.dtype)

    def do_group(gi):
        xg = x_ref[gi]                                    # (c_pad, GN)
        feats = [xg]
        for s in range(S):
            # Block-diagonal support tile for this group of G patches:
            #   adiag[g*N + n, g*N + v] = A[patch gi*G + g, n, v]
            for g in range(G):
                a_g = a_refs[s][gi * G + g]               # (N, N)
                adiag[g * N:(g + 1) * N, g * N:(g + 1) * N] = (
                    a_g.astype(compute_dtype))
            a_blk = adiag[...]
            xk = xg
            for _ in range(order):
                # One MXU matmul propagates all G patches (block-diagonal A
                # keeps patches independent), f32 accumulation.
                xf = jnp.dot(xk, a_blk, preferred_element_type=jnp.float32,
                             precision=mm_precision)
                xk = xf.astype(compute_dtype)
                feats.append(xk)
        # 1x1 conv over all (order*S + 1) features of this group in one matmul,
        # bias + relu, and one lane-dense store.
        fm = jnp.concatenate(feats, axis=0)               # (n_feats*c_pad, GN)
        h = jnp.dot(w, fm, preferred_element_type=jnp.float32,
                    precision=mm_precision) + bvec
        o_ref[gi] = jnp.maximum(h, 0.0).astype(o_ref.dtype)

    if unroll_groups:
        for gi in range(gpt):
            do_group(gi)
    else:
        # Bounded loop for large group counts: keeps code size and vreg live
        # ranges under control instead of a giant trace-time unroll.
        @pl.loop(0, gpt)
        def _(gi):
            do_group(gi)


# ----------------------------------------------------------------------------
# wrapper
# ----------------------------------------------------------------------------
def gcn_pallas(x, supports, weight, bias, *, order=2,
               compute_dtype=jnp.bfloat16, out_dtype=jnp.float32,
               precision=None, transpose_output=False,
               min_grid_steps=8, group_unroll_threshold=8):
    """gcn forward.

    x:        (B, c_in, N, M)
    supports: list of S arrays, each (B, M, N, N)  (kept in native layout/dtype)
    weight:   (c_out, (order*S + 1) * c_in)        (Conv2d 1x1 weight, squeezed)
    bias:     (c_out,)

    Returns:
      transpose_output=True : (B, c_out, N, M) in out_dtype (PyTorch layout).
      transpose_output=False: kernel-native (B, M//G, c_out, G*N), where patch
        m = mg*G + g lives in block mg at lanes [g*N, (g+1)*N).  Default, since
        the PyTorch-layout transpose is a full extra HBM pass over the output.
    """
    B, c_in, N, M = x.shape
    S = len(supports)
    c_out, c_total = weight.shape
    n_feats = order * S + 1
    assert c_total == n_feats * c_in, (c_total, n_feats, c_in)
    for a in supports:
        assert a.shape == (B, M, N, N), a.shape

    mm_precision = lax.Precision.DEFAULT if precision is None else precision
    c_pad = _round_up(c_in, _sublane(compute_dtype))

    G = _pick_group(M, N)
    GN = G * N
    MG = M // G

    # Generation-aware VMEM budget (64 MiB/TC on v7x, 128 MiB on v5e/v6e).
    try:
        vmem_cap = int(pltpu.get_tpu_info().vmem_capacity_bytes)
    except Exception:  # conservative fallback if the query is unavailable
        vmem_cap = 64 * 1024 * 1024
    vmem_limit = max(32 * 1024 * 1024,
                     min(vmem_cap - 16 * 1024 * 1024, 100 * 1024 * 1024))
    budget = (vmem_limit * 3) // 4

    support_dtype = supports[0].dtype
    gpt = _pick_gpt(MG, B=B, S=S, G=G, N=N, GN=GN, c_pad=c_pad, c_out=c_out,
                    n_feats=n_feats, compute_dtype=compute_dtype,
                    support_dtype=support_dtype, out_dtype=out_dtype,
                    budget_bytes=budget, min_grid_steps=min_grid_steps)

    # --- cheap host-side layout glue (x / weight are tiny vs the supports) ---
    # x: (B, c_in, N, M) -> (B, MG, c_pad, G*N) with lane index g*N + n and the
    # channels zero-padded to a full sublane tile (the padded weight columns
    # are zero as well, so padded rows contribute exactly zero).
    x_k = jnp.transpose(x, (0, 3, 1, 2)).reshape(B, MG, G, c_in, N)
    x_k = jnp.transpose(x_k, (0, 1, 3, 2, 4)).reshape(B, MG, c_in, GN)
    x_k = jnp.pad(x_k, ((0, 0), (0, 0), (0, c_pad - c_in), (0, 0)))
    x_k = x_k.astype(compute_dtype)
    # supports: passed in native layout and dtype -> no extra HBM pass over the
    # dominant stream; the cast happens on the VPU inside the kernel.
    w_pad = jnp.pad(weight.reshape(c_out, n_feats, c_in),
                    ((0, 0), (0, 0), (0, c_pad - c_in)))
    w_pad = w_pad.reshape(c_out, n_feats * c_pad).astype(compute_dtype)
    b_k = bias.reshape(c_out, 1).astype(jnp.float32)

    grid = (B, MG // gpt)
    kernel = functools.partial(
        _gcn_kernel, S=S, order=order, G=G, GN=GN, N=N, gpt=gpt,
        compute_dtype=compute_dtype, mm_precision=mm_precision,
        unroll_groups=(gpt <= group_unroll_threshold))

    out = pl.pallas_call(
        kernel,
        out_shape=jax.ShapeDtypeStruct((B, MG, c_out, GN), out_dtype),
        grid_spec=pltpu.PrefetchScalarGridSpec(
            num_scalar_prefetch=0,
            grid=grid,
            in_specs=(
                [pl.BlockSpec((None, gpt, c_pad, GN),
                              lambda b, t: (b, t, 0, 0))]
                + [pl.BlockSpec((None, gpt * G, N, N),
                                lambda b, t: (b, t, 0, 0))
                   for _ in range(S)]
                + [pl.BlockSpec((c_out, n_feats * c_pad), lambda b, t: (0, 0)),
                   pl.BlockSpec((c_out, 1), lambda b, t: (0, 0))]),
            out_specs=pl.BlockSpec((None, gpt, c_out, GN),
                                   lambda b, t: (b, t, 0, 0)),
            scratch_shapes=[pltpu.VMEM((GN, GN), compute_dtype)],
        ),
        compiler_params=pltpu.CompilerParams(
            dimension_semantics=("parallel", "parallel"),
            vmem_limit_bytes=int(vmem_limit)),
    )(x_k, *supports, w_pad, b_k)

    if transpose_output:
        out = out.reshape(B, MG, c_out, G, N)
        out = jnp.transpose(out, (0, 2, 4, 1, 3)).reshape(B, c_out, N, M)
    return out


# ----------------------------------------------------------------------------
# pure-JAX reference (mirrors the PyTorch forward) and self-test
# ----------------------------------------------------------------------------
def gcn_reference(x, supports, weight, bias, *, order=2):
    prec = lax.Precision.HIGHEST
    out = [x]
    for A in supports:
        x1 = jnp.einsum('bfnm,bmnv->bfvm', x, A, precision=prec)
        out.append(x1)
        for _ in range(2, order + 1):
            x2 = jnp.einsum('bfnm,bmnv->bfvm', x1, A, precision=prec)
            out.append(x2)
            x1 = x2
    h = jnp.concatenate(out, axis=1)                       # (B, c_total, N, M)
    h = (jnp.einsum('oc,bcnm->bonm', weight, h, precision=prec)
         + bias[None, :, None, None])
    return jnp.maximum(h, 0.0)


if __name__ == "__main__":
    S, ORDER = 3, 2

    def make_inputs(seed, B, c_in, N, M, c_out):
        key = jax.random.PRNGKey(seed)
        kx, kw, kb, *ka = jax.random.split(key, 3 + S)
        c_total = (ORDER * S + 1) * c_in
        x = jax.random.normal(kx, (B, c_in, N, M), dtype=jnp.float32)
        sup = [jax.random.normal(k, (B, M, N, N), dtype=jnp.float32) * 0.3
               for k in ka]
        w = jax.random.normal(kw, (c_out, c_total), dtype=jnp.float32) * 0.1
        b = jax.random.normal(kb, (c_out,), dtype=jnp.float32) * 0.1
        return x, sup, w, b

    # 1) float32 compute, HIGHEST precision (verification only): strict check.
    x, sup, w, b = make_inputs(0, B=2, c_in=4, N=16, M=8, c_out=8)
    y = gcn_pallas(x, sup, w, b, order=ORDER, compute_dtype=jnp.float32,
                   precision=lax.Precision.HIGHEST, transpose_output=True)
    y = jax.block_until_ready(y)
    y_ref = gcn_reference(x, sup, w, b, order=ORDER)
    np.testing.assert_allclose(np.asarray(y), np.asarray(y_ref),
                               rtol=1e-3, atol=1e-3)

    # 2) bf16 fast path, several patch groups per grid step (unrolled path).
    x, sup, w, b = make_inputs(1, B=2, c_in=4, N=16, M=64, c_out=8)
    x16 = x.astype(jnp.bfloat16)
    sup16 = [a.astype(jnp.bfloat16) for a in sup]
    w16 = w.astype(jnp.bfloat16)
    y = gcn_pallas(x16, sup16, w16, b, order=ORDER,
                   compute_dtype=jnp.bfloat16, transpose_output=True)
    y = jax.block_until_ready(y)
    y_ref = gcn_reference(x16.astype(jnp.float32),
                          [a.astype(jnp.float32) for a in sup16],
                          w16.astype(jnp.float32), b, order=ORDER)
    np.testing.assert_allclose(np.asarray(y), np.asarray(y_ref),
                               rtol=6e-2, atol=6e-2)

    # 3) bf16, many patches: exercises the bounded (pl.loop) group loop and the
    #    >=8-grid-steps cap on the block size.
    x, sup, w, b = make_inputs(2, B=2, c_in=4, N=16, M=512, c_out=8)
    x16 = x.astype(jnp.bfloat16)
    sup16 = [a.astype(jnp.bfloat16) for a in sup]
    w16 = w.astype(jnp.bfloat16)
    y = gcn_pallas(x16, sup16, w16, b, order=ORDER,
                   compute_dtype=jnp.bfloat16, transpose_output=True)
    y = jax.block_until_ready(y)
    y_ref = gcn_reference(x16.astype(jnp.float32),
                          [a.astype(jnp.float32) for a in sup16],
                          w16.astype(jnp.float32), b, order=ORDER)
    np.testing.assert_allclose(np.asarray(y), np.asarray(y_ref),
                               rtol=6e-2, atol=6e-2)

    print("KERNEL_OK")
</pallas_src>

<mosaic_0001>
module attributes {stable_mosaic.version = 11 : i64} {
  func.func @_gcn_kernel(%arg0: i32, %arg1: i32, %arg2: memref<1x1x8x128xf32, #tpu.memory_space<vmem>>, %arg3: memref<1x8x16x16xf32, #tpu.memory_space<vmem>>, %arg4: memref<1x8x16x16xf32, #tpu.memory_space<vmem>>, %arg5: memref<1x8x16x16xf32, #tpu.memory_space<vmem>>, %arg6: memref<8x56xf32, #tpu.memory_space<vmem>>, %arg7: memref<8x1xf32, #tpu.memory_space<vmem>>, %arg8: memref<1x1x8x128xf32, #tpu.memory_space<vmem>>, %arg9: memref<128x128xf32, #tpu.memory_space<vmem>>) attributes {dimension_semantics = [#tpu.dimension_semantics<parallel>, #tpu.dimension_semantics<parallel>], iteration_bounds = array<i64: 2, 1>, scalar_prefetch = 0 : i64, scratch_operands = 1 : i64, tpu.core_type = #tpu.core_type<tc>, window_params = [{transform_indices = @transform_0, window_bounds = array<i64: 1, 1, 8, 128>}, {transform_indices = @transform_1, window_bounds = array<i64: 1, 8, 16, 16>}, {transform_indices = @transform_2, window_bounds = array<i64: 1, 8, 16, 16>}, {transform_indices = @transform_3, window_bounds = array<i64: 1, 8, 16, 16>}, {pipeline_mode = #tpu.pipeline_mode<synchronous>, transform_indices = @transform_4, window_bounds = array<i64: 8, 56>}, {pipeline_mode = #tpu.pipeline_mode<synchronous>, transform_indices = @transform_5, window_bounds = array<i64: 8, 1>}, {transform_indices = @transform_6, window_bounds = array<i64: 1, 1, 8, 128>}]} {
    %c0 = arith.constant 0 : index
    %c0_0 = arith.constant 0 : index
    %0 = vector.load %arg6[%c0, %c0_0] : memref<8x56xf32, #tpu.memory_space<vmem>>, vector<8x56xf32>
    %c0_1 = arith.constant 0 : index
    %c0_2 = arith.constant 0 : index
    %1 = vector.load %arg7[%c0_1, %c0_2] : memref<8x1xf32, #tpu.memory_space<vmem>>, vector<8x1xf32>
    %cst = arith.constant 0.000000e+00 : f32
    %2 = vector.broadcast %cst : f32 to vector<128x128xf32>
    %c0_3 = arith.constant 0 : index
    %c0_4 = arith.constant 0 : index
    %3 = vector.load %arg9[%c0_3, %c0_4] : memref<128x128xf32, #tpu.memory_space<vmem>>, vector<128x128xf32>
    tpu.vector_store %arg9[%c0_3, %c0_4], %2 {strides = array<i32>} : memref<128x128xf32, #tpu.memory_space<vmem>>, vector<128x128xf32>,
    %c0_5 = arith.constant 0 : index
    %c0_6 = arith.constant 0 : index
    %c0_7 = arith.constant 0 : index
    %c0_8 = arith.constant 0 : index
    %4 = vector.load %arg2[%c0_5, %c0_6, %c0_7, %c0_8] : memref<1x1x8x128xf32, #tpu.memory_space<vmem>>, vector<1x1x8x128xf32>
    %5 = vector.shape_cast %4 : vector<1x1x8x128xf32> to vector<8x128xf32>
    %c0_9 = arith.constant 0 : index
    %c0_10 = arith.constant 0 : index
    %c0_11 = arith.constant 0 : index
    %c0_12 = arith.constant 0 : index
    %6 = vector.load %arg3[%c0_9, %c0_10, %c0_11, %c0_12] : memref<1x8x16x16xf32, #tpu.memory_space<vmem>>, vector<1x1x16x16xf32>
    %7 = vector.shape_cast %6 : vector<1x1x16x16xf32> to vector<16x16xf32>
    %c0_13 = arith.constant 0 : index
    %c0_14 = arith.constant 0 : index
    %8 = vector.load %arg9[%c0_13, %c0_14] : memref<128x128xf32, #tpu.memory_space<vmem>>, vector<16x16xf32>
    tpu.vector_store %arg9[%c0_13, %c0_14], %7 {strides = array<i32>} : memref<128x128xf32, #tpu.memory_space<vmem>>, vector<16x16xf32>,
    %c0_15 = arith.constant 0 : index
    %c1 = arith.constant 1 : index
    %c0_16 = arith.constant 0 : index
    %c0_17 = arith.constant 0 : index
    %9 = vector.load %arg3[%c0_15, %c1, %c0_16, %c0_17] : memref<1x8x16x16xf32, #tpu.memory_space<vmem>>, vector<1x1x16x16xf32>
    %10 = vector.shape_cast %9 : vector<1x1x16x16xf32> to vector<16x16xf32>
    %c16 = arith.constant 16 : index
    %c16_18 = arith.constant 16 : index
    %11 = vector.load %arg9[%c16, %c16_18] : memref<128x128xf32, #tpu.memory_space<vmem>>, vector<16x16xf32>
    tpu.vector_store %arg9[%c16, %c16_18], %10 {strides = array<i32>} : memref<128x128xf32, #tpu.memory_space<vmem>>, vector<16x16xf32>,
    %c0_19 = arith.constant 0 : index
    %c2 = arith.constant 2 : index
    %c0_20 = arith.constant 0 : index
    %c0_21 = arith.constant 0 : index
    %12 = vector.load %arg3[%c0_19, %c2, %c0_20, %c0_21] : memref<1x8x16x16xf32, #tpu.memory_space<vmem>>, vector<1x1x16x16xf32>
    %13 = vector.shape_cast %12 : vector<1x1x16x16xf32> to vector<16x16xf32>
    %c32 = arith.constant 32 : index
    %c32_22 = arith.constant 32 : index
    %14 = vector.load %arg9[%c32, %c32_22] : memref<128x128xf32, #tpu.memory_space<vmem>>, vector<16x16xf32>
    tpu.vector_store %arg9[%c32, %c32_22], %13 {strides = array<i32>} : memref<128x128xf32, #tpu.memory_space<vmem>>, vector<16x16xf32>,
    %c0_23 = arith.constant 0 : index
    %c3 = arith.constant 3 : index
    %c0_24 = arith.constant 0 : index
    %c0_25 = arith.constant 0 : index
    %15 = vector.load %arg3[%c0_23, %c3, %c0_24, %c0_25] : memref<1x8x16x16xf32, #tpu.memory_space<vmem>>, vector<1x1x16x16xf32>
    %16 = vector.shape_cast %15 : vector<1x1x16x16xf32> to vector<16x16xf32>
    %c48 = arith.constant 48 : index
    %c48_26 = arith.constant 48 : index
    %17 = vector.load %arg9[%c48, %c48_26] : memref<128x128xf32, #tpu.memory_space<vmem>>, vector<16x16xf32>
    tpu.vector_store %arg9[%c48, %c48_26], %16 {strides = array<i32>} : memref<128x128xf32, #tpu.memory_space<vmem>>, vector<16x16xf32>,
    %c0_27 = arith.constant 0 : index
    %c4 = arith.constant 4 : index
    %c0_28 = arith.constant 0 : index
    %c0_29 = arith.constant 0 : index
    %18 = vector.load %arg3[%c0_27, %c4, %c0_28, %c0_29] : memref<1x8x16x16xf32, #tpu.memory_space<vmem>>, vector<1x1x16x16xf32>
    %19 = vector.shape_cast %18 : vector<1x1x16x16xf32> to vector<16x16xf32>
    %c64 = arith.constant 64 : index
    %c64_30 = arith.constant 64 : index
    %20 = vector.load %arg9[%c64, %c64_30] : memref<128x128xf32, #tpu.memory_space<vmem>>, vector<16x16xf32>
    tpu.vector_store %arg9[%c64, %c64_30], %19 {strides = array<i32>} : memref<128x128xf32, #tpu.memory_space<vmem>>, vector<16x16xf32>,
    %c0_31 = arith.constant 0 : index
    %c5 = arith.constant 5 : index
    %c0_32 = arith.constant 0 : index
    %c0_33 = arith.constant 0 : index
    %21 = vector.load %arg3[%c0_31, %c5, %c0_32, %c0_33] : memref<1x8x16x16xf32, #tpu.memory_space<vmem>>, vector<1x1x16x16xf32>
    %22 = vector.shape_cast %21 : vector<1x1x16x16xf32> to vector<16x16xf32>
    %c80 = arith.constant 80 : index
    %c80_34 = arith.constant 80 : index
    %23 = vector.load %arg9[%c80, %c80_34] : memref<128x128xf32, #tpu.memory_space<vmem>>, vector<16x16xf32>
    tpu.vector_store %arg9[%c80, %c80_34], %22 {strides = array<i32>} : memref<128x128xf32, #tpu.memory_space<vmem>>, vector<16x16xf32>,
    %c0_35 = arith.constant 0 : index
    %c6 = arith.constant 6 : index
    %c0_36 = arith.constant 0 : index
    %c0_37 = arith.constant 0 : index
    %24 = vector.load %arg3[%c0_35, %c6, %c0_36, %c0_37] : memref<1x8x16x16xf32, #tpu.memory_space<vmem>>, vector<1x1x16x16xf32>
    %25 = vector.shape_cast %24 : vector<1x1x16x16xf32> to vector<16x16xf32>
    %c96 = arith.constant 96 : index
    %c96_38 = arith.constant 96 : index
    %26 = vector.load %arg9[%c96, %c96_38] : memref<128x128xf32, #tpu.memory_space<vmem>>, vector<16x16xf32>
    tpu.vector_store %arg9[%c96, %c96_38], %25 {strides = array<i32>} : memref<128x128xf32, #tpu.memory_space<vmem>>, vector<16x16xf32>,
    %c0_39 = arith.constant 0 : index
    %c7 = arith.constant 7 : index
    %c0_40 = arith.constant 0 : index
    %c0_41 = arith.constant 0 : index
    %27 = vector.load %arg3[%c0_39, %c7, %c0_40, %c0_41] : memref<1x8x16x16xf32, #tpu.memory_space<vmem>>, vector<1x1x16x16xf32>
    %28 = vector.shape_cast %27 : vector<1x1x16x16xf32> to vector<16x16xf32>
    %c112 = arith.constant 112 : index
    %c112_42 = arith.constant 112 : index
    %29 = vector.load %arg9[%c112, %c112_42] : memref<128x128xf32, #tpu.memory_space<vmem>>, vector<16x16xf32>
    tpu.vector_store %arg9[%c112, %c112_42], %28 {strides = array<i32>} : memref<128x128xf32, #tpu.memory_space<vmem>>, vector<16x16xf32>,
    %c0_43 = arith.constant 0 : index
    %c0_44 = arith.constant 0 : index
    %30 = vector.load %arg9[%c0_43, %c0_44] : memref<128x128xf32, #tpu.memory_space<vmem>>, vector<128x128xf32>
    %cst_45 = arith.constant dense<0.000000e+00> : vector<8x128xf32>
    %31 = tpu.matmul %5, %30, %cst_45 {dimension_numbers = #tpu.dot_dimension_numbers<[1], [0], [0], [1], [0, 0, 1, 1], [], []>, precision = #tpu.contract_precision<fp32>} : vector<8x128xf32>, vector<128x128xf32>, vector<8x128xf32> -> vector<8x128xf32>
    %cst_46 = arith.constant dense<0.000000e+00> : vector<8x128xf32>
    %32 = tpu.matmul %31, %30, %cst_46 {dimension_numbers = #tpu.dot_dimension_numbers<[1], [0], [0], [1], [0, 0, 1, 1], [], []>, precision = #tpu.contract_precision<fp32>} : vector<8x128xf32>, vector<128x128xf32>, vector<8x128xf32> -> vector<8x128xf32>
    %c0_47 = arith.constant 0 : index
    %c0_48 = arith.constant 0 : index
    %c0_49 = arith.constant 0 : index
    %c0_50 = arith.constant 0 : index
    %33 = vector.load %arg4[%c0_47, %c0_48, %c0_49, %c0_50] : memref<1x8x16x16xf32, #tpu.memory_space<vmem>>, vector<1x1x16x16xf32>
    %34 = vector.shape_cast %33 : vector<1x1x16x16xf32> to vector<16x16xf32>
    %c0_51 = arith.constant 0 : index
    %c0_52 = arith.constant 0 : index
    %35 = vector.load %arg9[%c0_51, %c0_52] : memref<128x128xf32, #tpu.memory_space<vmem>>, vector<16x16xf32>
    tpu.vector_store %arg9[%c0_51, %c0_52], %34 {strides = array<i32>} : memref<128x128xf32, #tpu.memory_space<vmem>>, vector<16x16xf32>,
    %c0_53 = arith.constant 0 : index
    %c1_54 = arith.constant 1 : index
    %c0_55 = arith.constant 0 : index
    %c0_56 = arith.constant 0 : index
    %36 = vector.load %arg4[%c0_53, %c1_54, %c0_55, %c0_56] : memref<1x8x16x16xf32, #tpu.memory_space<vmem>>, vector<1x1x16x16xf32>
    %37 = vector.shape_cast %36 : vector<1x1x16x16xf32> to vector<16x16xf32>
    %c16_57 = arith.constant 16 : index
    %c16_58 = arith.constant 16 : index
    %38 = vector.load %arg9[%c16_57, %c16_58] : memref<128x128xf32, #tpu.memory_space<vmem>>, vector<16x16xf32>
    tpu.vector_store %arg9[%c16_57, %c16_58], %37 {strides = array<i32>} : memref<128x128xf32, #tpu.memory_space<vmem>>, vector<16x16xf32>,
    %c0_59 = arith.constant 0 : index
    %c2_60 = arith.constant 2 : index
    %c0_61 = arith.constant 0 : index
    %c0_62 = arith.constant 0 : index
    %39 = vector.load %arg4[%c0_59, %c2_60, %c0_61, %c0_62] : memref<1x8x16x16xf32, #tpu.memory_space<vmem>>, vector<1x1x16x16xf32>
    %40 = vector.shape_cast %39 : vector<1x1x16x16xf32> to vector<16x16xf32>
    %c32_63 = arith.constant 32 : index
    %c32_64 = arith.constant 32 : index
    %41 = vector.load %arg9[%c32_63, %c32_64] : memref<128x128xf32, #tpu.memory_space<vmem>>, vector<16x16xf32>
    tpu.vector_store %arg9[%c32_63, %c32_64], %40 {strides = array<i32>} : memref<128x128xf32, #tpu.memory_space<vmem>>, vector<16x16xf32>,
    %c0_65 = arith.constant 0 : index
    %c3_66 = arith.constant 3 : index
    %c0_67 = arith.constant 0 : index
    %c0_68 = arith.constant 0 : index
    %42 = vector.load %arg4[%c0_65, %c3_66, %c0_67, %c0_68] : memref<1x8x16x16xf32, #tpu.memory_space<vmem>>, vector<1x1x16x16xf32>
    %43 = vector.shape_cast %42 : vector<1x1x16x16xf32> to vector<16x16xf32>
    %c48_69 = arith.constant 48 : index
    %c48_70 = arith.constant 48 : index
    %44 = vector.load %arg9[%c48_69, %c48_70] : memref<128x128xf32, #tpu.memory_space<vmem>>, vector<16x16xf32>
    tpu.vector_store %arg9[%c48_69, %c48_70], %43 {strides = array<i32>} : memref<128x128xf32, #tpu.memory_space<vmem>>, vector<16x16xf32>,
    %c0_71 = arith.constant 0 : index
    %c4_72 = arith.constant 4 : index
    %c0_73 = arith.constant 0 : index
    %c0_74 = arith.constant 0 : index
    %45 = vector.load %arg4[%c0_71, %c4_72, %c0_73, %c0_74] : memref<1x8x16x16xf32, #tpu.memory_space<vmem>>, vector<1x1x16x16xf32>
    %46 = vector.shape_cast %45 : vector<1x1x16x16xf32> to vector<16x16xf32>
    %c64_75 = arith.constant 64 : index
    %c64_76 = arith.constant 64 : index
    %47 = vector.load %arg9[%c64_75, %c64_76] : memref<128x128xf32, #tpu.memory_space<vmem>>, vector<16x16xf32>
    tpu.vector_store %arg9[%c64_75, %c64_76], %46 {strides = array<i32>} : memref<128x128xf32, #tpu.memory_space<vmem>>, vector<16x16xf32>,
    %c0_77 = arith.constant 0 : index
    %c5_78 = arith.constant 5 : index
    %c0_79 = arith.constant 0 : index
    %c0_80 = arith.constant 0 : index
    %48 = vector.load %arg4[%c0_77, %c5_78, %c0_79, %c0_80] : memref<1x8x16x16xf32, #tpu.memory_space<vmem>>, vector<1x1x16x16xf32>
    %49 = vector.shape_cast %48 : vector<1x1x16x16xf32> to vector<16x16xf32>
    %c80_81 = arith.constant 80 : index
    %c80_82 = arith.constant 80 : index
    %50 = vector.load %arg9[%c80_81, %c80_82] : memref<128x128xf32, #tpu.memory_space<vmem>>, vector<16x16xf32>
    tpu.vector_store %arg9[%c80_81, %c80_82], %49 {strides = array<i32>} : memref<128x128xf32, #tpu.memory_space<vmem>>, vector<16x16xf32>,
    %c0_83 = arith.constant 0 : index
    %c6_84 = arith.constant 6 : index
    %c0_85 = arith.constant 0 : index
    %c0_86 = arith.constant 0 : index
    %51 = vector.load %arg4[%c0_83, %c6_84, %c0_85, %c0_86] : memref<1x8x16x16xf32, #tpu.memory_space<vmem>>, vector<1x1x16x16xf32>
    %52 = vector.shape_cast %51 : vector<1x1x16x16xf32> to vector<16x16xf32>
    %c96_87 = arith.constant 96 : index
    %c96_88 = arith.constant 96 : index
    %53 = vector.load %arg9[%c96_87, %c96_88] : memref<128x128xf32, #tpu.memory_space<vmem>>, vector<16x16xf32>
    tpu.vector_store %arg9[%c96_87, %c96_88], %52 {strides = array<i32>} : memref<128x128xf32, #tpu.memory_space<vmem>>, vector<16x16xf32>,
    %c0_89 = arith.constant 0 : index
    %c7_90 = arith.constant 7 : index
    %c0_91 = arith.constant 0 : index
    %c0_92 = arith.constant 0 : index
    %54 = vector.load %arg4[%c0_89, %c7_90, %c0_91, %c0_92] : memref<1x8x16x16xf32, #tpu.memory_space<vmem>>, vector<1x1x16x16xf32>
    %55 = vector.shape_cast %54 : vector<1x1x16x16xf32> to vector<16x16xf32>
    %c112_93 = arith.constant 112 : index
    %c112_94 = arith.constant 112 : index
    %56 = vector.load %arg9[%c112_93, %c112_94] : memref<128x128xf32, #tpu.memory_space<vmem>>, vector<16x16xf32>
    tpu.vector_store %arg9[%c112_93, %c112_94], %55 {strides = array<i32>} : memref<128x128xf32, #tpu.memory_space<vmem>>, vector<16x16xf32>,
    %c0_95 = arith.constant 0 : index
    %c0_96 = arith.constant 0 : index
    %57 = vector.load %arg9[%c0_95, %c0_96] : memref<128x128xf32, #tpu.memory_space<vmem>>, vector<128x128xf32>
    %cst_97 = arith.constant dense<0.000000e+00> : vector<8x128xf32>
    %58 = tpu.matmul %5, %57, %cst_97 {dimension_numbers = #tpu.dot_dimension_numbers<[1], [0], [0], [1], [0, 0, 1, 1], [], []>, precision = #tpu.contract_precision<fp32>} : vector<8x128xf32>, vector<128x128xf32>, vector<8x128xf32> -> vector<8x128xf32>
    %cst_98 = arith.constant dense<0.000000e+00> : vector<8x128xf32>
    %59 = tpu.matmul %58, %57, %cst_98 {dimension_numbers = #tpu.dot_dimension_numbers<[1], [0], [0], [1], [0, 0, 1, 1], [], []>, precision = #tpu.contract_precision<fp32>} : vector<8x128xf32>, vector<128x128xf32>, vector<8x128xf32> -> vector<8x128xf32>
    %c0_99 = arith.constant 0 : index
    %c0_100 = arith.constant 0 : index
    %c0_101 = arith.constant 0 : index
    %c0_102 = arith.constant 0 : index
    %60 = vector.load %arg5[%c0_99, %c0_100, %c0_101, %c0_102] : memref<1x8x16x16xf32, #tpu.memory_space<vmem>>, vector<1x1x16x16xf32>
    %61 = vector.shape_cast %60 : vector<1x1x16x16xf32> to vector<16x16xf32>
    %c0_103 = arith.constant 0 : index
    %c0_104 = arith.constant 0 : index
    %62 = vector.load %arg9[%c0_103, %c0_104] : memref<128x128xf32, #tpu.memory_space<vmem>>, vector<16x16xf32>
    tpu.vector_store %arg9[%c0_103, %c0_104], %61 {strides = array<i32>} : memref<128x128xf32, #tpu.memory_space<vmem>>, vector<16x16xf32>,
    %c0_105 = arith.constant 0 : index
    %c1_106 = arith.constant 1 : index
    %c0_107 = arith.constant 0 : index
    %c0_108 = arith.constant 0 : index
    %63 = vector.load %arg5[%c0_105, %c1_106, %c0_107, %c0_108] : memref<1x8x16x16xf32, #tpu.memory_space<vmem>>, vector<1x1x16x16xf32>
    %64 = vector.shape_cast %63 : vector<1x1x16x16xf32> to vector<16x16xf32>
    %c16_109 = arith.constant 16 : index
    %c16_110 = arith.constant 16 : index
    %65 = vector.load %arg9[%c16_109, %c16_110] : memref<128x128xf32, #tpu.memory_space<vmem>>, vector<16x16xf32>
    tpu.vector_store %arg9[%c16_109, %c16_110], %64 {strides = array<i32>} : memref<128x128xf32, #tpu.memory_space<vmem>>, vector<16x16xf32>,
    %c0_111 = arith.constant 0 : index
    %c2_112 = arith.constant 2 : index
    %c0_113 = arith.constant 0 : index
    %c0_114 = arith.constant 0 : index
    %66 = vector.load %arg5[%c0_111, %c2_112, %c0_113, %c0_114] : memref<1x8x16x16xf32, #tpu.memory_space<vmem>>, vector<1x1x16x16xf32>
    %67 = vector.shape_cast %66 : vector<1x1x16x16xf32> to vector<16x16xf32>
    %c32_115 = arith.constant 32 : index
    %c32_116 = arith.constant 32 : index
    %68 = vector.load %arg9[%c32_115, %c32_116] : memref<128x128xf32, #tpu.memory_space<vmem>>, vector<16x16xf32>
    tpu.vector_store %arg9[%c32_115, %c32_116], %67 {strides = array<i32>} : memref<128x128xf32, #tpu.memory_space<vmem>>, vector<16x16xf32>,
    %c0_117 = arith.constant 0 : index
    %c3_118 = arith.constant 3 : index
    %c0_119 = arith.constant 0 : index
    %c0_120 = arith.constant 0 : index
    %69 = vector.load %arg5[%c0_117, %c3_118, %c0_119, %c0_120] : memref<1x8x16x16xf32, #tpu.memory_space<vmem>>, vector<1x1x16x16xf32>
    %70 = vector.shape_cast %69 : vector<1x1x16x16xf32> to vector<16x16xf32>
    %c48_121 = arith.constant 48 : index
    %c48_122 = arith.constant 48 : index
    %71 = vector.load %arg9[%c48_121, %c48_122] : memref<128x128xf32, #tpu.memory_space<vmem>>, vector<16x16xf32>
    tpu.vector_store %arg9[%c48_121, %c48_122], %70 {strides = array<i32>} : memref<128x128xf32, #tpu.memory_space<vmem>>, vector<16x16xf32>,
    %c0_123 = arith.constant 0 : index
    %c4_124 = arith.constant 4 : index
    %c0_125 = arith.constant 0 : index
    %c0_126 = arith.constant 0 : index
    %72 = vector.load %arg5[%c0_123, %c4_124, %c0_125, %c0_126] : memref<1x8x16x16xf32, #tpu.memory_space<vmem>>, vector<1x1x16x16xf32>
    %73 = vector.shape_cast %72 : vector<1x1x16x16xf32> to vector<16x16xf32>
    %c64_127 = arith.constant 64 : index
    %c64_128 = arith.constant 64 : index
    %74 = vector.load %arg9[%c64_127, %c64_128] : memref<128x128xf32, #tpu.memory_space<vmem>>, vector<16x16xf32>
    tpu.vector_store %arg9[%c64_127, %c64_128], %73 {strides = array<i32>} : memref<128x128xf32, #tpu.memory_space<vmem>>, vector<16x16xf32>,
    %c0_129 = arith.constant 0 : index
    %c5_130 = arith.constant 5 : index
    %c0_131 = arith.constant 0 : index
    %c0_132 = arith.constant 0 : index
    %75 = vector.load %arg5[%c0_129, %c5_130, %c0_131, %c0_132] : memref<1x8x16x16xf32, #tpu.memory_space<vmem>>, vector<1x1x16x16xf32>
    %76 = vector.shape_cast %75 : vector<1x1x16x16xf32> to vector<16x16xf32>
    %c80_133 = arith.constant 80 : index
    %c80_134 = arith.constant 80 : index
    %77 = vector.load %arg9[%c80_133, %c80_134] : memref<128x128xf32, #tpu.memory_space<vmem>>, vector<16x16xf32>
    tpu.vector_store %arg9[%c80_133, %c80_134], %76 {strides = array<i32>} : memref<128x128xf32, #tpu.memory_space<vmem>>, vector<16x16xf32>,
    %c0_135 = arith.constant 0 : index
    %c6_136 = arith.constant 6 : index
    %c0_137 = arith.constant 0 : index
    %c0_138 = arith.constant 0 : index
    %78 = vector.load %arg5[%c0_135, %c6_136, %c0_137, %c0_138] : memref<1x8x16x16xf32, #tpu.memory_space<vmem>>, vector<1x1x16x16xf32>
    %79 = vector.shape_cast %78 : vector<1x1x16x16xf32> to vector<16x16xf32>
    %c96_139 = arith.constant 96 : index
    %c96_140 = arith.constant 96 : index
    %80 = vector.load %arg9[%c96_139, %c96_140] : memref<128x128xf32, #tpu.memory_space<vmem>>, vector<16x16xf32>
    tpu.vector_store %arg9[%c96_139, %c96_140], %79 {strides = array<i32>} : memref<128x128xf32, #tpu.memory_space<vmem>>, vector<16x16xf32>,
    %c0_141 = arith.constant 0 : index
    %c7_142 = arith.constant 7 : index
    %c0_143 = arith.constant 0 : index
    %c0_144 = arith.constant 0 : index
    %81 = vector.load %arg5[%c0_141, %c7_142, %c0_143, %c0_144] : memref<1x8x16x16xf32, #tpu.memory_space<vmem>>, vector<1x1x16x16xf32>
    %82 = vector.shape_cast %81 : vector<1x1x16x16xf32> to vector<16x16xf32>
    %c112_145 = arith.constant 112 : index
    %c112_146 = arith.constant 112 : index
    %83 = vector.load %arg9[%c112_145, %c112_146] : memref<128x128xf32, #tpu.memory_space<vmem>>, vector<16x16xf32>
    tpu.vector_store %arg9[%c112_145, %c112_146], %82 {strides = array<i32>} : memref<128x128xf32, #tpu.memory_space<vmem>>, vector<16x16xf32>,
    %c0_147 = arith.constant 0 : index
    %c0_148 = arith.constant 0 : index
    %84 = vector.load %arg9[%c0_147, %c0_148] : memref<128x128xf32, #tpu.memory_space<vmem>>, vector<128x128xf32>
    %cst_149 = arith.constant dense<0.000000e+00> : vector<8x128xf32>
    %85 = tpu.matmul %5, %84, %cst_149 {dimension_numbers = #tpu.dot_dimension_numbers<[1], [0], [0], [1], [0, 0, 1, 1], [], []>, precision = #tpu.contract_precision<fp32>} : vector<8x128xf32>, vector<128x128xf32>, vector<8x128xf32> -> vector<8x128xf32>
    %cst_150 = arith.constant dense<0.000000e+00> : vector<8x128xf32>
    %86 = tpu.matmul %85, %84, %cst_150 {dimension_numbers = #tpu.dot_dimension_numbers<[1], [0], [0], [1], [0, 0, 1, 1], [], []>, precision = #tpu.contract_precision<fp32>} : vector<8x128xf32>, vector<128x128xf32>, vector<8x128xf32> -> vector<8x128xf32>
    %87 = tpu.concatenate %5, %31, %32, %58, %59, %85, %86 in 0 : vector<8x128xf32>, vector<8x128xf32>, vector<8x128xf32>, vector<8x128xf32>, vector<8x128xf32>, vector<8x128xf32>, vector<8x128xf32> -> vector<56x128xf32>
    %cst_151 = arith.constant dense<0.000000e+00> : vector<8x128xf32>
    %88 = tpu.matmul %0, %87, %cst_151 {dimension_numbers = #tpu.dot_dimension_numbers<[1], [0], [0], [1], [0, 0, 1, 1], [], []>, precision = #tpu.contract_precision<fp32>} : vector<8x56xf32>, vector<56x128xf32>, vector<8x128xf32> -> vector<8x128xf32>
    %89 = vector.broadcast %1 : vector<8x1xf32> to vector<8x128xf32>
    %90 = arith.addf %88, %89 : vector<8x128xf32>
    %cst_152 = arith.constant 0.000000e+00 : f32
    %91 = vector.broadcast %cst_152 : f32 to vector<8x128xf32>
    %92 = arith.maximumf %90, %91 : vector<8x128xf32>
    %c0_153 = arith.constant 0 : index
    %c0_154 = arith.constant 0 : index
    %c0_155 = arith.constant 0 : index
    %c0_156 = arith.constant 0 : index
    %93 = vector.load %arg8[%c0_153, %c0_154, %c0_155, %c0_156] : memref<1x1x8x128xf32, #tpu.memory_space<vmem>>, vector<1x1x8x128xf32>
    %94 = vector.shape_cast %93 : vector<1x1x8x128xf32> to vector<8x128xf32>
    %95 = vector.shape_cast %92 : vector<8x128xf32> to vector<1x1x8x128xf32>
    tpu.vector_store %arg8[%c0_153, %c0_154, %c0_155, %c0_156], %95 {strides = array<i32>} : memref<1x1x8x128xf32, #tpu.memory_space<vmem>>, vector<1x1x8x128xf32>,
    return
  }
  func.func @transform_0(%arg0: i32, %arg1: i32) -> (i32, i32, i32, i32) {
    %c0_i32 = arith.constant 0 : i32
    %c0_i32_0 = arith.constant 0 : i32
    %c0_i32_1 = arith.constant 0 : i32
    return %arg0, %arg1, %c0_i32, %c0_i32_0 : i32, i32, i32, i32
  }
  func.func @transform_1(%arg0: i32, %arg1: i32) -> (i32, i32, i32, i32) {
    %c0_i32 = arith.constant 0 : i32
    %c0_i32_0 = arith.constant 0 : i32
    %c0_i32_1 = arith.constant 0 : i32
    return %arg0, %arg1, %c0_i32, %c0_i32_0 : i32, i32, i32, i32
  }
  func.func @transform_2(%arg0: i32, %arg1: i32) -> (i32, i32, i32, i32) {
    %c0_i32 = arith.constant 0 : i32
    %c0_i32_0 = arith.constant 0 : i32
    %c0_i32_1 = arith.constant 0 : i32
    return %arg0, %arg1, %c0_i32, %c0_i32_0 : i32, i32, i32, i32
  }
  func.func @transform_3(%arg0: i32, %arg1: i32) -> (i32, i32, i32, i32) {
    %c0_i32 = arith.constant 0 : i32
    %c0_i32_0 = arith.constant 0 : i32
    %c0_i32_1 = arith.constant 0 : i32
    return %arg0, %arg1, %c0_i32, %c0_i32_0 : i32, i32, i32, i32
  }
  func.func @transform_4(%arg0: i32, %arg1: i32) -> (i32, i32) {
    %c0_i32 = arith.constant 0 : i32
    %c0_i32_0 = arith.constant 0 : i32
    %c0_i32_1 = arith.constant 0 : i32
    return %c0_i32, %c0_i32_0 : i32, i32
  }
  func.func @transform_5(%arg0: i32, %arg1: i32) -> (i32, i32) {
    %c0_i32 = arith.constant 0 : i32
    %c0_i32_0 = arith.constant 0 : i32
    %c0_i32_1 = arith.constant 0 : i32
    return %c0_i32, %c0_i32_0 : i32, i32
  }
  func.func @transform_6(%arg0: i32, %arg1: i32) -> (i32, i32, i32, i32) {
    %c0_i32 = arith.constant 0 : i32
    %c0_i32_0 = arith.constant 0 : i32
    %c0_i32_1 = arith.constant 0 : i32
    return %arg0, %arg1, %c0_i32, %c0_i32_0 : i32, i32, i32, i32
  }
}

</mosaic_0001>

<bundles_post_ra>
// kernel: tpu_custom_call.1
= control target key start
LH: loop header
LB: loop body
LE: loop exit
PB: predicated region body
PF: predicated region fallthrough
CT: control target
= control target key end

     0   :  { %s10878_s0 = inlined_call_operand.hbm [shape: f32[2,1,8,128], index: 0, kind: input, shape index: {}]   ;;  %s10879_s1 = inlined_call_operand.hbm [shape: f32[2,8,16,16], index: 1, kind: input, shape index: {}]   ;;  %s10880_s2 = inlined_call_operand.hbm [shape: f32[2,8,16,16], index: 2, kind: input, shape index: {}]   ;;  %s10881_s3 = inlined_call_operand.hbm [shape: f32[2,8,16,16], index: 3, kind: input, shape index: {}]   ;;  %s10882_s4 = inlined_call_operand.vmem [shape: f32[8,56], index: 4, kind: input, shape index: {}]   ;;  %s10883_s5 = inlined_call_operand.vmem [shape: f32[8,1], index: 5, kind: input, shape index: {}]   ;;  %s10884_s6 = inlined_call_operand.hbm [shape: f32[2,1,8,128], index: 6, kind: output, shape index: {}]  }
   0x1   :  { %11006 = sst [smem:[#allocation80_spill]] %s10879_s1 }
   0x2   :  { %11 = vsyncpa [#allocation4], 0 }
   0x3   :  { %13 = vsyncpa [#allocation4 + $0x1], 0 }
   0x4   :  { %14 = vsyncpa [#allocation7], 0 }
   0x5   :  { %16 = vsyncpa [#allocation7 + $0x1], 0 }
   0x6   :  { %17 = vsyncpa [#allocation10], 0 }
   0x7   :  { %19 = vsyncpa [#allocation10 + $0x1], 0 }
   0x8   :  { %20 = vsyncpa [#allocation5], 0 }
   0x9   :  { %22 = vsyncpa [#allocation5 + $0x1], 0  ;;  %s8765_s21 = smov 0   ;;  %s8767_s22 = smov 0  }
   0xa   :  { %s8769_s23 = smov 0   ;;  %s8771_s24 = smov 0  }
   0xb   :  { %s8773_s25 = smov 0   ;;  %s8775_s26 = smov 0  }
   0xc LB: > { %11007 = sst [smem:[#allocation16_spill]] %s8690_s21  ;;  %s8796_s27 = sadd.s32 4294967295, %s8710_s26   ;;  %s8710_s26 = sphi %s8775_s26, %s28_s26   ;;  %s8706_s25 = sphi %s8773_s25, %s11252_s25   ;;  %s8702_s24 = sphi %s8771_s24, %s11251_s24   ;;  %s8698_s23 = sphi %s8769_s23, %s11250_s23   ;;  %s8694_s22 = sphi %s8767_s22, %s11254_s22   ;;  %s8690_s21 = sphi %s8765_s21, %s11253_s21  }
   0xd   : > { %11008 = sst [smem:[#allocation17_spill]] %s8698_s23  ;;  %s5331_s28 = sadd.s32 4294967294, %s8710_s26  }
   0xe   : > { %11009 = sst [smem:[#allocation18_spill]] %s8706_s25  ;;  %s40_s29 = sadd.s32 1, %s8706_s25 }
   0xf   : > { %11010 = sst [smem:[#allocation19_spill]] %s8710_s26  ;;  %s49_s30 = sadd.s32 1, %s8698_s23 }
  0x10   : > { %p42_p0 = scmp.ge.s32.totalorder %s40_s29, 2  ;;  %p56_p1 = scmp.ne.s32.totalorder %s8698_s23, %s8694_s22 }
  0x11   : > { %p57_p2 = scmp.eq.s32.totalorder %s8710_s26, 0  ;;  %p62_p3 = scmp.ne.s32.totalorder %s8694_s22, %s8690_s21 }
  0x12   : > { %s11256_s29 = smov (%p42_p0, %s40_s29), 0  ;;  %p63_p5 = scmp.eq.s32.totalorder %s8796_s27, 0 }
  0x13   : > { %11011 = sst [smem:[#allocation20_spill]] %s11256_s29  ;;  %p8808_p4 = por %p57_p2, %p56_p1 }
  0x14   : > { %s44_s8 = ssub.s32 %s8706_s25, %s11256_s29  ;;  %p214_p6 = scmp.eq.s32.totalorder %s8796_s27, 1 }
  0x15   : > { %p47_p7 = scmp.eq.s32.totalorder %s44_s8, 0  ;;  %p8816_p8 = por %p63_p5, %p62_p3 }
  0x16   : > { %p8820_p9 = por %p214_p6, %p56_p1  ;;  %p220_p10 = scmp.eq.s32.totalorder %s5331_s28, 1 }
  0x17   : > { %s11013_s9 = scalar_select %p8816_p8, 1, 0 }
  0x18   : > { %s11014_s10 = scalar_select %p8820_p9, 1, 0 }
  0x19   : > { %s8825_s11 = scalar_select %p47_p7, %s8698_s23, %s49_s30  }
  0x1a   : > { %p8827_p11 = por %p220_p10, %p62_p3  ;;  %p8436_p13 = scmp.lt.s32.totalorder %s8710_s26, 2 }
  0x1b   : > { %11015 = sst [smem:[#allocation21_spill]] %s8825_s11  ;;  %s8834_s13 = sand.u32 1, %s8698_s23  }
  0x1c   : > { %s11016_s12 = scalar_select %p8827_p11, 1, 0 }
  0x1d   : > { %s265_s14 = sand.u32 1, %s8710_s26   ;;  %s8838_s15 = sshll.u32 %s8834_s13, 7 }
  0x1e   : > { %11017 = sst [smem:[#allocation22_spill]] %s11016_s12  ;;  %p8842_p0 = pnand %p8436_p13, %p8808_p4 }
  0x1f   : > { %s8847_s17 = sshll.u32 %s8706_s25, 11  ;;  %s11019_s1 = sld [smem:[#allocation80_spill]] }
  0x20   : > { %s269_s28 = scalar_lea.vmem [#allocation6], %s8838_s15  ;;  %s8858_s7 = scalar_lea.sflag [#allocation7], %s265_s14 }
  0x21   : > { %s279_s30 = sshll.u32 %s269_s28, 4  ;;  %p8864_p2 = pneg %p8842_p0  ;;  %s8856_s30 = int_to_ptr.vmem [resolvable:$true] %s279_s30 }
  0x25   : > { %s8853_s20 = scalar_lea.hbm %s11019_s1, %s8847_s17  ;;  %s8505_s11 = scalar_lea.hbm %s11019_s1, 4096 }
  0x26   : > { %s8500_s8 = scalar_lea.hbm %s8853_s20, 2048  ;;  %p8506_p5 = scmp.lt.u32.totalorder %s8853_s20, %s11019_s1 }
  0x27   : > { %p8501_p1 = scmp.ne.s32.totalorder %s8853_s20, %s8500_s8  ;;  %p8507_p6 = scmp.lt.u32.totalorder %s8505_s11, %s8500_s8 }
  0x28   : > { %p8509_p10 = scmp.lt.u32.totalorder %s8500_s8, %s8853_s20 }
  0x29   : > { %p8503_p3 = pnand %p8864_p2, %p8501_p1  ;;  %p8508_p7 = por %p8507_p6, %p8506_p5 }
  0x2b   : > { %p8504_p4 = pneg %p8503_p3  ;;  %p8510_p13 = por %p8509_p10, %p8508_p7 }
  0x2d   : > { %p8511_p12 = pnand %p8510_p13, %p8504_p4 }
  0x2f   : > { %8514 = shalt.err (!%p8511_p12)
}
  0x30   : > { %s8515_s14 = scalar_lea.vmem %s8856_s30, 2048  ;;  %s8712_s18 = smov [#allocation6]  }
  0x31   : > { %p8516_p1 = scmp.ne.s32.totalorder %s8856_s30, %s8515_s14  ;;  %s8520_s19 = sshll.u32 %s8712_s18, 4  ;;  %s8521_s19 = int_to_ptr.vmem [resolvable:$false] %s8520_s19 }
  0x32   : > { %s8522_s23 = scalar_lea.vmem %s8521_s19, 4096  ;;  %p8523_p9 = scmp.lt.s32.totalorder %s8856_s30, %s8521_s19 }
  0x33   : > { %p8518_p3 = pnand %p8516_p1, %p8864_p2  ;;  %p8524_p8 = scmp.lt.s32.totalorder %s8522_s23, %s8515_s14 }
  0x35   : > { %p8519_p11 = pneg %p8518_p3  ;;  %p8525_p5 = por %p8524_p8, %p8523_p9 }
  0x37   : > { %p8526_p6 = pnand %p8525_p5, %p8519_p11 }
  0x39   : > { %8529 = shalt.err (!%p8526_p6)
}
  0x3a   : > { %s10891_s11 = smov 128   ;;  %s10893_s8 = smov 8  }
  0x3b   : > { %8425 = dma.hbm_to_vmem [thread:$0]  (!%p8842_p0), %s8853_s20, 2048, %s8856_s30, %s8858_s7, %s10891_s11, %s10891_s11, %s10893_s8  }
  0x3c   : > { %p5345_p8 = scmp.ge.s32.totalorder %s8710_s26, 1  ;;  %p335_p9 = scmp.lt.s32.totalorder %s8710_s26, 3 }
  0x3d   : > { %s5334_s14 = sshll.u32 %s8834_s13, 3  ;;  %s5335_s18 = sshll.u32 %s8706_s25, 7 }
  0x3e   : > { %p8893_p11 = pnand %p5345_p8, %p335_p9  ;;  %s8902_s1 = scalar_lea.hbm %s10878_s0, %s5335_s18 }
  0x3f   : > { %s250_s12 = scalar_lea.vmem [#allocation3], %s5334_s14  ;;  %s8910_s11 = scalar_lea.hbm %s10880_s2, %s8847_s17 }
  0x40   : > { %s11021_s28 = scalar_select %p8893_p11, 1, 0 }
  0x41   : > { %s258_s21 = sshll.u32 %s250_s12, 4  ;;  %s247_s8 = scalar_lea.sflag [#allocation4], %s8834_s13  ;;  %s8904_s21 = int_to_ptr.vmem [resolvable:$true] %s258_s21 }
  0x42   : > { %s8530_s25 = scalar_lea.hbm %s8902_s1, 128  ;;  %s8535_s23 = scalar_lea.hbm %s10878_s0, 256 }
  0x43   : > { %p8531_p12 = scmp.ne.s32.totalorder %s8902_s1, %s8530_s25  ;;  %p8536_p10 = scmp.lt.u32.totalorder %s8902_s1, %s10878_s0 }
  0x44   : > { %p8537_p13 = scmp.lt.u32.totalorder %s8535_s23, %s8530_s25  ;;  %p8539_p3 = scmp.lt.u32.totalorder %s8530_s25, %s8902_s1 }
  0x45   : > { %p8533_p4 = pnand %p8531_p12, %p8864_p2 }
  0x46   : > { %p8538_p1 = por %p8537_p13, %p8536_p10 }
  0x47   : > { %p8534_p7 = pneg %p8533_p4 }
  0x48   : > { %p8540_p5 = por %p8539_p3, %p8538_p1 }
  0x4a   : > { %p8541_p6 = pnand %p8540_p5, %p8534_p7 }
  0x4c   : > { %8544 = shalt.err (!%p8541_p6)
}
  0x4d   : > { %s8545_s12 = scalar_lea.vmem %s8904_s21, 128  ;;  %s8715_s20 = smov [#allocation3]  }
  0x4e   : > { %p8546_p8 = scmp.ne.s32.totalorder %s8904_s21, %s8545_s12  ;;  %s8550_s30 = sshll.u32 %s8715_s20, 4  ;;  %s8551_s30 = int_to_ptr.vmem [resolvable:$false] %s8550_s30 }
  0x4f   : > { %s8552_s26 = scalar_lea.vmem %s8551_s30, 256  ;;  %p8553_p4 = scmp.lt.s32.totalorder %s8904_s21, %s8551_s30 }
  0x50   : > { %p8548_p9 = pnand %p8546_p8, %p8864_p2  ;;  %p8554_p11 = scmp.lt.s32.totalorder %s8552_s26, %s8545_s12 }
  0x52   : > { %p8549_p12 = pneg %p8548_p9  ;;  %p8555_p10 = por %p8554_p11, %p8553_p4 }
  0x54   : > { %p8556_p13 = pnand %p8555_p10, %p8549_p12 }
  0x56   : > { %8559 = shalt.err (!%p8556_p13)
}
  0x57   : > { %8422 = dma.hbm_to_vmem [thread:$0]  (!%p8842_p0), %s8902_s1, 128, %s8904_s21, %s247_s8  }
  0x58   : > { %s293_s25 = scalar_lea.vmem [#allocation8], %s8838_s15  ;;  %s8560_s19 = scalar_lea.hbm %s8910_s11, 2048 }
  0x59   : > { %s303_s18 = sshll.u32 %s293_s25, 4  ;;  %p8561_p7 = scmp.ne.s32.totalorder %s8910_s11, %s8560_s19  ;;  %s8935_s18 = int_to_ptr.vmem [resolvable:$true] %s303_s18 }
  0x5a   : > { %s8565_s12 = scalar_lea.hbm %s10880_s2, 4096  ;;  %p8566_p3 = scmp.lt.u32.totalorder %s8910_s11, %s10880_s2 }
  0x5b   : > { %p8563_p11 = pnand %p8561_p7, %p8864_p2  ;;  %p8567_p5 = scmp.lt.u32.totalorder %s8565_s12, %s8560_s19 }
  0x5c   : > { %p8569_p8 = scmp.lt.u32.totalorder %s8560_s19, %s8910_s11 }
  0x5d   : > { %p8564_p1 = pneg %p8563_p11  ;;  %p8568_p6 = por %p8567_p5, %p8566_p3 }
  0x5f   : > { %p8570_p9 = por %p8569_p8, %p8568_p6 }
  0x61   : > { %p8571_p12 = pnand %p8570_p9, %p8564_p1 }
  0x63   : > { %8574 = shalt.err (!%p8571_p12)
}
  0x64   : > { %s8575_s1 = scalar_lea.vmem %s8935_s18, 2048  ;;  %s8716_s21 = smov [#allocation8]  }
  0x65   : > { %p8576_p4 = scmp.ne.s32.totalorder %s8935_s18, %s8575_s1  ;;  %s8580_s8 = sshll.u32 %s8716_s21, 4  ;;  %s8581_s8 = int_to_ptr.vmem [resolvable:$false] %s8580_s8 }
  0x66   : > { %s8582_s26 = scalar_lea.vmem %s8581_s8, 4096  ;;  %p8583_p7 = scmp.lt.s32.totalorder %s8935_s18, %s8581_s8 }
  0x67   : > { %p8578_p10 = pnand %p8576_p4, %p8864_p2  ;;  %p8584_p11 = scmp.lt.s32.totalorder %s8582_s26, %s8575_s1 }
  0x69   : > { %p8579_p13 = pneg %p8578_p10  ;;  %p8585_p3 = por %p8584_p11, %p8583_p7 }
  0x6b   : > { %p8586_p5 = pnand %p8585_p3, %p8579_p13 }
  0x6d   : > { %8589 = shalt.err (!%p8586_p5)
}
  0x6e   : > { %s11022_s25 = smov 8   ;;  %s11023_s19 = smov 128  }
  0x6f   : > { %8428 = dma.hbm_to_vmem [thread:$0]  (!%p8842_p0), %s8910_s11, 2048, %s8935_s18, %s8858_s7, %s11023_s19, %s11023_s19, %s11022_s25  }
  0x70   : > { %s8966_s12 = scalar_lea.hbm %s10881_s3, %s8847_s17  ;;  %s317_s20 = scalar_lea.vmem [#allocation9], %s8838_s15 }
  0x71   : > { %s327_s30 = sshll.u32 %s317_s20, 4  ;;  %s314_s1 = scalar_lea.sflag [#allocation10], %s8834_s13  ;;  %s8969_s30 = int_to_ptr.vmem [resolvable:$true] %s327_s30 }
  0x72   : > { %s8590_s21 = scalar_lea.hbm %s8966_s12, 2048  ;;  %s8595_s18 = scalar_lea.hbm %s10881_s3, 4096 }
  0x73   : > { %p8591_p1 = scmp.ne.s32.totalorder %s8966_s12, %s8590_s21  ;;  %p8596_p9 = scmp.lt.u32.totalorder %s8966_s12, %s10881_s3 }
  0x74   : > { %p8597_p12 = scmp.lt.u32.totalorder %s8595_s18, %s8590_s21  ;;  %p8599_p10 = scmp.lt.u32.totalorder %s8590_s21, %s8966_s12 }
  0x75   : > { %p8593_p6 = pnand %p8591_p1, %p8864_p2 }
  0x76   : > { %p8598_p4 = por %p8597_p12, %p8596_p9 }
  0x77   : > { %p8594_p8 = pneg %p8593_p6 }
  0x78   : > { %p8600_p13 = por %p8599_p10, %p8598_p4 }
  0x7a   : > { %p8601_p7 = pnand %p8600_p13, %p8594_p8 }
  0x7c   : > { %8604 = shalt.err (!%p8601_p7)
}
  0x7d   : > { %s8605_s15 = scalar_lea.vmem %s8969_s30, 2048  ;;  %s8717_s26 = smov [#allocation9]  }
  0x7e   : > { %p8606_p11 = scmp.ne.s32.totalorder %s8969_s30, %s8605_s15  ;;  %s8610_s23 = sshll.u32 %s8717_s26, 4  ;;  %s8611_s23 = int_to_ptr.vmem [resolvable:$false] %s8610_s23 }
  0x7f   : > { %s8612_s14 = scalar_lea.vmem %s8611_s23, 4096  ;;  %p8613_p1 = scmp.lt.s32.totalorder %s8969_s30, %s8611_s23 }
  0x80   : > { %p8608_p3 = pnand %p8606_p11, %p8864_p2  ;;  %p8614_p6 = scmp.lt.s32.totalorder %s8612_s14, %s8605_s15 }
  0x82   : > { %p8609_p5 = pneg %p8608_p3  ;;  %p8615_p9 = por %p8614_p6, %p8613_p1 }
  0x84   : > { %p8616_p12 = pnand %p8615_p9, %p8609_p5 }
  0x86   : > { %8619 = shalt.err (!%p8616_p12)
}
  0x87   : > { %8431 = dma.hbm_to_vmem [thread:$0]  (!%p8842_p0), %s8966_s12, 2048, %s8969_s30, %s314_s1, %s11023_s19, %s11023_s19, %s11022_s25  }
  0x88   : > { %p11024_p2 = scmp.ne.s32.totalorder %s11021_s28, 0 }
  0x8a   : > { %339 = sbr.rel (%p11024_p2) target bundleno = 1729 (0x6c1), region = 44 }
  0x91   : > { %s9001_s29 = sand.u32 1, %s8694_s22   ;;  %p11025_p8 = scmp.ne.s32.totalorder %s11013_s9, 0 }
  0x92   : > { %s5346_s20 = sshll.u32 %s9001_s29, 3  ;;  %s342_s16 = scalar_lea.sflag [#allocation4], %s9001_s29 }
  0x93   : > { %s9007_s21 = scalar_lea.vmem [#allocation3], %s5346_s20 }
  0x94   : > { %8673 = dma.done.wait (%p11025_p8), %s342_s16, 128  }
  0x95   : > { %8675 = vsyncadd (%p11025_p8), %s342_s16, 4294967168  ;;  %s350_s13 = sand.u32 1, %s8796_s27   ;;  %s5347_s28 = sshll.u32 %s9001_s29, 7 }
  0x96   : > { %s351_s25 = scalar_lea.sflag [#allocation7], %s350_s13  ;;  %s9015_s19 = scalar_lea.vmem [#allocation6], %s5347_s28 }
  0x97   : > { %8677 = dma.done.wait (%p11025_p8), %s351_s25, 4096  }
  0x98   : > { %8679 = vsyncadd (%p11025_p8), %s351_s25, 4294963200  ;;  %s9021_s12 = scalar_lea.vmem [#allocation8], %s5347_s28  ;;  %s369_s30 = scalar_lea.sflag [#allocation10], %s9001_s29 }
  0x99   : > { %s9024_s1 = scalar_lea.vmem [#allocation9], %s5347_s28 }
  0x9a   : > { %8681 = dma.done.wait (%p11025_p8), %s369_s30, 2048  }
  0x9b   : > { %8683 = vsyncadd (%p11025_p8), %s369_s30, 4294965248  ;;  %v10902_v0 = vmov 0.0   ;;  %v10911_v1 = vmov 0.0|0.0   ;;  %v5353_v2 = vld [vmem:[%s9015_s19 + $0x20] sm:$0xff]  ;;  %v5351_v3 = vld [vmem:[%s9015_s19 + $0x10] sm:$0xff]  ;;  %s8720_s27 = smov 32  }
  0x9c   : > { %425 = vst [vmem:[#allocation2 + $0x20] sm:$0xff] %v10902_v0  ;;  %421 = vst [vmem:[#allocation2] sm:$0xff] %v10902_v0  ;;  %7422 = vmatprep.subr.bf16.mxu1 %v10911_v1  ;;  %7446 = vmatprep.subr.bf16.mxu0 %v10911_v1  ;;  %s8721_s9 = smov 16   ;;  %v5354_v4 = vld [vmem:[%s9015_s19 + $0x28] sm:$0xff]  ;;  %v5352_v5 = vld [vmem:[%s9015_s19 + $0x18] sm:$0xff]  ;;  %vm440_vm0 = vcmask 130048  }
  0x9d   : > { %422 = vst [vmem:[#allocation2 + $0x8] sm:$0xff] %v10902_v0  ;;  %423 = vst [vmem:[#allocation2 + $0x10] sm:$0xff] %v10902_v0  ;;  %462 = vrot.lane.b32.xlu1 %v5353_v2, %s8720_s27  ;;  %448 = vrot.lane.b32.xlu0 %v5351_v3, %s8721_s9  ;;  %v438_v6 = vld [vmem:[%s9015_s19] sm:$0xff]  ;;  %v439_v7 = vld [vmem:[%s9015_s19 + $0x8] sm:$0xff]  ;;  %s8722_s7 = smov 48   ;;  %s8723_s11 = smov 64  }
  0x9e   : > { %424 = vst [vmem:[#allocation2 + $0x18] sm:$0xff] %v10902_v0  ;;  %426 = vst [vmem:[#allocation2 + $0x28] sm:$0xff] %v10902_v0  ;;  %v5356_v8 = vld [vmem:[%s9015_s19 + $0x38] sm:$0xff]  ;;  %v5355_v9 = vld [vmem:[%s9015_s19 + $0x30] sm:$0xff]  ;;  %s8724_s18 = smov 80   ;;  %s8725_s17 = smov 96  }
  0x9f   : > { %427 = vst [vmem:[#allocation2 + $0x30] sm:$0xff] %v10902_v0  ;;  %428 = vst [vmem:[#allocation2 + $0x38] sm:$0xff] %v10902_v0  ;;  %v5358_v10 = vld [vmem:[%s9015_s19 + $0x48] sm:$0xff]  ;;  %v5357_v11 = vld [vmem:[%s9015_s19 + $0x40] sm:$0xff]  ;;  %s8726_s8 = smov 112   ;;  %vm8727_vm1 = vmmov 0  }
  0xa0   : > { %429 = vst [vmem:[#allocation2 + $0x40] sm:$0xff] %v10902_v0  ;;  %430 = vst [vmem:[#allocation2 + $0x48] sm:$0xff] %v10902_v0  ;;  %v1839_v12 = vld [vmem:[%s9021_s12] sm:$0xff]  ;;  %v1840_v13 = vld [vmem:[%s9021_s12 + $0x8] sm:$0xff]  ;;  %6092 = vmatprep.mubr.msk.f32.mxu1 %vm8727_vm1, %v10902_v0  ;;  %6127 = vmatprep.mubr.msk.f32.mxu0 %vm8727_vm1, %v10902_v0  ;;  %vm468_vm2 = vcmask 392448   ;;  %vm454_vm3 = vcmask 261248  }
  0xa1   : > { %431 = vst [vmem:[#allocation2 + $0x50] sm:$0xff] %v10902_v0  ;;  %432 = vst [vmem:[#allocation2 + $0x58] sm:$0xff] %v10902_v0  ;;  %464 = vrot.lane.b32.xlu1 %v5354_v4, %s8720_s27  ;;  %450 = vrot.lane.b32.xlu0 %v5352_v5, %s8721_s9  ;;  %v5360_v16 = vld [vmem:[%s9015_s19 + $0x58] sm:$0xff]  ;;  %v5359_v17 = vld [vmem:[%s9015_s19 + $0x50] sm:$0xff]  ;;  %vm482_vm4 = vcmask 523648   ;;  %vm496_vm5 = vcmask 654848  }
  0xa2   : > { %433 = vst [vmem:[#allocation2 + $0x60] sm:$0xff] %v10902_v0  ;;  %434 = vst [vmem:[#allocation2 + $0x68] sm:$0xff] %v10902_v0  ;;  %v5362_v23 = vld [vmem:[%s9015_s19 + $0x68] sm:$0xff]  ;;  %v5361_v24 = vld [vmem:[%s9015_s19 + $0x60] sm:$0xff]  ;;  %vm510_vm6 = vcmask 786048   ;;  %vm524_vm7 = vcmask 917248  }
  0xa3   : > { %435 = vst [vmem:[#allocation2 + $0x70] sm:$0xff] %v10902_v0  ;;  %436 = vst [vmem:[#allocation2 + $0x78] sm:$0xff] %v10902_v0  ;;  %v5364_v29 = vld [vmem:[%s9015_s19 + $0x78] sm:$0xff]  ;;  %v5363_v30 = vld [vmem:[%s9015_s19 + $0x70] sm:$0xff]  ;;  %vm538_vm8 = vcmask 1048448   ;;  %vm4630_vm9 = vcmask 457728  }
  0xa4   : > { %441 = vst.msk [vmem:[#allocation2] sm:$0xff] %vm440_vm0, %v438_v6  ;;  %442 = vst.msk [vmem:[#allocation2 + $0x8] sm:$0xff] %vm440_vm0, %v439_v7  ;;  %v5366_v35 = vld [vmem:[%s9021_s12 + $0x18] sm:$0xff]  ;;  %v5365_v36 = vld [vmem:[%s9021_s12 + $0x10] sm:$0xff]  ;;  %s5394_s16 = sshll.u32 %s8702_s24, 7  ;;  %p11243_p4 = scmp.ne.s32.totalorder %s11014_s10, 0 }
  0xa5   : > { %478 = vrot.lane.b32.xlu1 %v5356_v8, %s8722_s7  ;;  %476 = vrot.lane.b32.xlu0 %v5355_v9, %s8722_s7  ;;  %v5368_v37 = vld [vmem:[%s9021_s12 + $0x28] sm:$0xff]  ;;  %v5367_v38 = vld [vmem:[%s9021_s12 + $0x20] sm:$0xff]  ;;  %s10829_s19 = scalar_lea.hbm %s10884_s6, %s5394_s16  ;;  %s8729_s24 = smov [#allocation11]  }
  0xa6   : > { %v5370_v39 = vld [vmem:[%s9021_s12 + $0x38] sm:$0xff]  ;;  %v5369_v40 = vld [vmem:[%s9021_s12 + $0x30] sm:$0xff]  ;;  %v5372_v41 = vld [vmem:[%s9021_s12 + $0x48] sm:$0xff] }
  0xa7   : > { %v5371_v42 = vld [vmem:[%s9021_s12 + $0x40] sm:$0xff]  ;;  %v5374_v43 = vld [vmem:[%s9021_s12 + $0x58] sm:$0xff]  ;;  %v5373_v44 = vld [vmem:[%s9021_s12 + $0x50] sm:$0xff] }
  0xa8   : > { %v5376_v45 = vld [vmem:[%s9021_s12 + $0x68] sm:$0xff]  ;;  %v5375_v46 = vld [vmem:[%s9021_s12 + $0x60] sm:$0xff]  ;;  %v5378_v47 = vld [vmem:[%s9021_s12 + $0x78] sm:$0xff] }
  0xa9   : > { %492 = vrot.lane.b32.xlu1 %v5358_v10, %s8723_s11  ;;  %490 = vrot.lane.b32.xlu0 %v5357_v11, %s8723_s11  ;;  %v5377_v48 = vld [vmem:[%s9021_s12 + $0x70] sm:$0xff]  ;;  %s5161_s12 = scalar_lea.sflag [#allocation5], %s9001_s29 }
  0xab   : > { %v541_v14 = vld [vmem:[#allocation2] sm:$0xff]  ;;  %v542_v15 = vld [vmem:[#allocation2 + $0x8] sm:$0xff] }
  0xac   : > { %v558_v18 = vand.u32 4294901760, %v541_v14  ;;  %v561_v19 = vand.u32 4294901760, %v542_v15  ;;  %1841 = vst.msk [vmem:[#allocation2] sm:$0xff] %vm440_vm0, %v1839_v12  ;;  %1842 = vst.msk [vmem:[#allocation2 + $0x8] sm:$0xff] %vm440_vm0, %v1840_v13 }
  0xad   : > { %506 = vrot.lane.b32.xlu1 %v5360_v16, %s8724_s18  ;;  %504 = vrot.lane.b32.xlu0 %v5359_v17, %s8724_s18 }
  0xae   : > { %v9074_v20 = vpack.c.bf16 %v561_v19, %v558_v18  ;;  %v9076_v21 = vsub.f32 %v541_v14, %v558_v18  ;;  %v9078_v22 = vsub.f32 %v542_v15, %v561_v19 }
  0xb0   : > { %7424 = vmatpush3.bf16.msra.mxu1 %v9074_v20  ;;  %v10901_v25 = vand.u32 4294901760, %v9076_v21  ;;  %v10900_v26 = vand.u32 4294901760, %v9078_v22  ;;  %v9110_v34 = vpack.c.bf16 %v9078_v22, %v9076_v21 }
  0xb1   : > { %7425 = vmatprep.subr.bf16.mxu1 %v10911_v1  ;;  %520 = vrot.lane.b32.xlu1 %v5362_v23, %s8725_s17 }
  0xb2   : > { %v652_v27 = vsub.f32 %v9076_v21, %v10901_v25  ;;  %v659_v28 = vsub.f32 %v9078_v22, %v10900_v26  ;;  %518 = vrot.lane.b32.xlu0 %v5361_v24, %s8725_s17  ;;  %11027 = vst [vmem:[#allocation24_spill] sm:$0xff] %v9110_v34 }
  0xb4   : > { %v653_v31 = vand.u32 4294901760, %v652_v27  ;;  %v660_v32 = vand.u32 4294901760, %v659_v28 }
  0xb5   : > { %534 = vrot.lane.b32.xlu1 %v5364_v29, %s8726_s8 }
  0xb6   : > { %v9098_v33 = vpack.c.bf16 %v660_v32, %v653_v31  ;;  %532 = vrot.lane.b32.xlu0 %v5363_v30, %s8726_s8  ;;  %v437_v30 = vld [vmem:[%s9007_s21] sm:$0xff]  ;;  %s415_s21 = scalar_lea.vmem [#allocation11], %s5346_s20  ;;  %s8624_s20 = sshll.u32 %s8729_s24, 4  ;;  %s8625_s20 = int_to_ptr.vmem [resolvable:$false] %s8624_s20 }
  0xb7   : > { %s5175_s13 = sshll.u32 %s415_s21, 4  ;;  %s10831_s13 = int_to_ptr.vmem [resolvable:$true] %s5175_s13 }
  0xb8   : > { %11026 = vst [vmem:[#allocation23_spill] sm:$0xff] %v9098_v33  ;;  %7448 = vmatpush3.bf16.msra.mxu0 %v9098_v33  ;;  %s8620_s30 = scalar_lea.vmem %s10831_s13, 128  ;;  %p8627_p7 = scmp.lt.s32.totalorder %s10831_s13, %s8625_s20 }
  0xb9   : > { %7449 = vmatprep.subr.bf16.mxu0 %v10911_v1  ;;  %1850 = vrot.lane.b32.xlu1 %v5366_v35, %s8721_s9  ;;  %p8621_p0 = scmp.ne.s32.totalorder %s10831_s13, %s8620_s30 }
  0xba   : > { %1848 = vrot.lane.b32.xlu0 %v5365_v36, %s8721_s9 }
  0xbb   : > { %p8622_p10 = pnand %p8621_p0, %p11243_p4 }
  0xbd   : > { %1863 = vrot.lane.b32.xlu1 %v5368_v37, %s8720_s27  ;;  %p8623_p13 = pneg %p8622_p10 }
  0xbe   : > { %1861 = vrot.lane.b32.xlu0 %v5367_v38, %s8720_s27 }
  0xc1   : > { %1876 = vrot.lane.b32.xlu1 %v5370_v39, %s8722_s7 }
  0xc2   : > { %1874 = vrot.lane.b32.xlu0 %v5369_v40, %s8722_s7 }
  0xc5   : > { %1889 = vrot.lane.b32.xlu1 %v5372_v41, %s8723_s11 }
  0xc6   : > { %1887 = vrot.lane.b32.xlu0 %v5371_v42, %s8723_s11 }
  0xc9   : > { %1902 = vrot.lane.b32.xlu1 %v5374_v43, %s8724_s18 }
  0xca   : > { %1900 = vrot.lane.b32.xlu0 %v5373_v44, %s8724_s18 }
  0xcd   : > { %1915 = vrot.lane.b32.xlu1 %v5376_v45, %s8725_s17 }
  0xce   : > { %1913 = vrot.lane.b32.xlu0 %v5375_v46, %s8725_s17  ;;  %v9189_v46 = vand.u32 4294901760, %v437_v30 }
  0xd1   : > { %1928 = vrot.lane.b32.xlu1 %v5378_v47, %s8726_s8 }
  0xd2   : > { %1926 = vrot.lane.b32.xlu0 %v5377_v48, %s8726_s8 }
 0x10f   : > { %v463_v49 = vpop.permute.xlu1 %462  ;;  %v449_v50 = vpop.permute.xlu0 %448 }
 0x110   : > { %469 = vst.msk [vmem:[#allocation2 + $0x20] sm:$0xff] %vm468_vm2, %v463_v49 }
 0x111   : > { %455 = vst.msk [vmem:[#allocation2 + $0x10] sm:$0xff] %vm454_vm3, %v449_v50 }
 0x113   : > { %v465_v51 = vpop.permute.xlu1 %464  ;;  %v451_v52 = vpop.permute.xlu0 %450 }
 0x114   : > { %470 = vst.msk [vmem:[#allocation2 + $0x28] sm:$0xff] %vm468_vm2, %v465_v51 }
 0x115   : > { %456 = vst.msk [vmem:[#allocation2 + $0x18] sm:$0xff] %vm454_vm3, %v451_v52 }
 0x117   : > { %v479_v53 = vpop.permute.xlu1 %478  ;;  %v477_v54 = vpop.permute.xlu0 %476  ;;  %v545_v56 = vld [vmem:[#allocation2 + $0x20] sm:$0xff] }
 0x118   : > { %v543_v55 = vld [vmem:[#allocation2 + $0x10] sm:$0xff]  ;;  %484 = vst.msk [vmem:[#allocation2 + $0x38] sm:$0xff] %vm482_vm4, %v479_v53  ;;  %483 = vst.msk [vmem:[#allocation2 + $0x30] sm:$0xff] %vm482_vm4, %v477_v54  ;;  %v570_v58 = vand.u32 4294901760, %v545_v56 }
 0x119   : > { %v564_v57 = vand.u32 4294901760, %v543_v55 }
 0x11a   : > { %v9148_v60 = vsub.f32 %v545_v56, %v570_v58 }
 0x11b   : > { %v9146_v59 = vsub.f32 %v543_v55, %v564_v57  ;;  %v493_v61 = vpop.permute.xlu1 %492  ;;  %v491_v62 = vpop.permute.xlu0 %490  ;;  %v546_v2 = vld [vmem:[#allocation2 + $0x28] sm:$0xff] }
 0x11c   : > { %v544_v63 = vld [vmem:[#allocation2 + $0x18] sm:$0xff]  ;;  %498 = vst.msk [vmem:[#allocation2 + $0x48] sm:$0xff] %vm496_vm5, %v493_v61  ;;  %497 = vst.msk [vmem:[#allocation2 + $0x40] sm:$0xff] %vm496_vm5, %v491_v62  ;;  %v573_v4 = vand.u32 4294901760, %v546_v2  ;;  %v679_v6 = vand.u32 4294901760, %v9148_v60 }
 0x11d   : > { %v567_v3 = vand.u32 4294901760, %v544_v63  ;;  %v665_v5 = vand.u32 4294901760, %v9146_v59 }
 0x11e   : > { %v9159_v14 = vsub.f32 %v546_v2, %v573_v4  ;;  %v9166_v18 = vpack.c.bf16 %v573_v4, %v570_v58  ;;  %v680_v19 = vsub.f32 %v9148_v60, %v679_v6 }
 0x11f   : > { %v9154_v7 = vpack.c.bf16 %v567_v3, %v564_v57  ;;  %v666_v8 = vsub.f32 %v9146_v59, %v665_v5  ;;  %v9157_v9 = vsub.f32 %v544_v63, %v567_v3  ;;  %v507_v10 = vpop.permute.xlu1 %506  ;;  %v505_v11 = vpop.permute.xlu0 %504  ;;  %v547_v12 = vld [vmem:[#allocation2 + $0x30] sm:$0xff]  ;;  %v548_v13 = vld [vmem:[#allocation2 + $0x38] sm:$0xff] }
 0x120   : > { %512 = vst.msk [vmem:[#allocation2 + $0x58] sm:$0xff] %vm510_vm6, %v507_v10  ;;  %511 = vst.msk [vmem:[#allocation2 + $0x50] sm:$0xff] %vm510_vm6, %v505_v11  ;;  %v576_v15 = vand.u32 4294901760, %v547_v12  ;;  %v579_v16 = vand.u32 4294901760, %v548_v13  ;;  %v686_v23 = vand.u32 4294901760, %v9159_v14  ;;  %v681_v53 = vand.u32 4294901760, %v680_v19 }
 0x121   : > { %7427 = vmatpush3.bf16.msra.mxu1 %v9154_v7  ;;  %v672_v17 = vand.u32 4294901760, %v9157_v9  ;;  %v667_v24 = vand.u32 4294901760, %v666_v8 }
 0x122   : > { %7428 = vmatprep.subr.bf16.mxu1 %v10911_v1  ;;  %v9171_v28 = vsub.f32 %v547_v12, %v576_v15  ;;  %v9173_v29 = vsub.f32 %v548_v13, %v579_v16  ;;  %v9176_v35 = vpack.c.bf16 %v579_v16, %v576_v15  ;;  %v687_v38 = vsub.f32 %v9159_v14, %v686_v23 }
 0x123   : > { %v673_v27 = vsub.f32 %v9157_v9, %v672_v17  ;;  %v521_v31 = vpop.permute.xlu1 %520  ;;  %v549_v36 = vld [vmem:[#allocation2 + $0x40] sm:$0xff]  ;;  %v550_v37 = vld [vmem:[#allocation2 + $0x48] sm:$0xff]  ;;  %v9179_v39 = vpack.c.bf16 %v672_v17, %v665_v5  ;;  %v9181_v40 = vpack.c.bf16 %v686_v23, %v679_v6  ;;  %v9220_v16 = vsub.f32 %v437_v30, %v9189_v46 }
 0x124   : > { %v519_v32 = vpop.permute.xlu0 %518  ;;  %526 = vst.msk [vmem:[#allocation2 + $0x68] sm:$0xff] %vm524_vm7, %v521_v31  ;;  %v582_v42 = vand.u32 4294901760, %v549_v36  ;;  %v585_v43 = vand.u32 4294901760, %v550_v37  ;;  %v693_v44 = vand.u32 4294901760, %v9171_v28  ;;  %v700_v45 = vand.u32 4294901760, %v9173_v29 }
 0x125   : > { %11028 = vst [vmem:[#allocation25_spill] sm:$0xff] %v9179_v39  ;;  %11029 = vst [vmem:[#allocation26_spill] sm:$0xff] %v9181_v40  ;;  %7430 = vmatpush3.bf16.msra.mxu1 %v9166_v18  ;;  %v674_v41 = vand.u32 4294901760, %v673_v27  ;;  %v688_v48 = vand.u32 4294901760, %v687_v38 }
 0x126   : > { %525 = vst.msk [vmem:[#allocation2 + $0x60] sm:$0xff] %vm524_vm7, %v519_v32  ;;  %7431 = vmatprep.subr.bf16.mxu1 %v10911_v1  ;;  %v694_v49 = vsub.f32 %v9171_v28, %v693_v44  ;;  %v9194_v50 = vsub.f32 %v549_v36, %v582_v42  ;;  %v701_v56 = vsub.f32 %v9173_v29, %v700_v45 }
 0x127   : > { %v9191_v47 = vpack.c.bf16 %v674_v41, %v667_v24  ;;  %v535_v51 = vpop.permute.xlu1 %534  ;;  %v551_v54 = vld [vmem:[#allocation2 + $0x50] sm:$0xff]  ;;  %v552_v55 = vld [vmem:[#allocation2 + $0x58] sm:$0xff]  ;;  %v9197_v57 = vsub.f32 %v550_v37, %v585_v43  ;;  %v9199_v58 = vpack.c.bf16 %v700_v45, %v693_v44  ;;  %v9205_v61 = vpack.c.bf16 %v585_v43, %v582_v42 }
 0x128   : > { %v533_v52 = vpop.permute.xlu0 %532  ;;  %540 = vst.msk [vmem:[#allocation2 + $0x78] sm:$0xff] %vm538_vm8, %v535_v51  ;;  %v588_v62 = vand.u32 4294901760, %v551_v54  ;;  %v591_v63 = vand.u32 4294901760, %v552_v55  ;;  %v707_v2 = vand.u32 4294901760, %v9194_v50  ;;  %v695_v3 = vand.u32 4294901760, %v694_v49 }
 0x129   : > { %11030 = vst [vmem:[#allocation27_spill] sm:$0xff] %v9191_v47  ;;  %11031 = vst [vmem:[#allocation28_spill] sm:$0xff] %v9199_v58  ;;  %7433 = vmatpush3.bf16.msra.mxu1 %v9176_v35  ;;  %7451 = vmatpush3.bf16.msra.mxu0 %v9191_v47  ;;  %v702_v4 = vand.u32 4294901760, %v701_v56  ;;  %v714_v5 = vand.u32 4294901760, %v9197_v57  ;;  %v9211_v6 = vpack.c.bf16 %v688_v48, %v681_v53  ;;  %v9241_v45 = vand.u32 4294901760, %v9220_v16 }
 0x12a   : > { %539 = vst.msk [vmem:[#allocation2 + $0x70] sm:$0xff] %vm538_vm8, %v533_v52  ;;  %7434 = vmatprep.subr.bf16.mxu1 %v10911_v1  ;;  %7452 = vmatprep.subr.bf16.mxu0 %v10911_v1  ;;  %v708_v8 = vsub.f32 %v9194_v50, %v707_v2  ;;  %v9214_v10 = vsub.f32 %v551_v54, %v588_v62 }
 0x12b   : > { %11032 = vst [vmem:[#allocation29_spill] sm:$0xff] %v9211_v6  ;;  %v9216_v11 = vsub.f32 %v552_v55, %v591_v63  ;;  %v554_v13 = vld [vmem:[#allocation2 + $0x68] sm:$0xff]  ;;  %v715_v15 = vsub.f32 %v9197_v57, %v714_v5  ;;  %v9222_v17 = vpack.c.bf16 %v714_v5, %v707_v2  ;;  %v9226_v19 = vpack.c.bf16 %v591_v63, %v588_v62 }
 0x12c   : > { %v597_v24 = vand.u32 4294901760, %v554_v13  ;;  %v721_v27 = vand.u32 4294901760, %v9214_v10  ;;  %v9231_v31 = vpack.c.bf16 %v702_v4, %v695_v3  ;;  %v709_v30 = vand.u32 4294901760, %v708_v8 }
 0x12d   : > { %v553_v12 = vld [vmem:[#allocation2 + $0x60] sm:$0xff]  ;;  %11033 = vst [vmem:[#allocation30_spill] sm:$0xff] %v9222_v17  ;;  %7436 = vmatpush3.bf16.msra.mxu1 %v9205_v61  ;;  %7454 = vmatpush3.bf16.msra.mxu0 %v9211_v6  ;;  %v728_v32 = vand.u32 4294901760, %v9216_v11  ;;  %v716_v36 = vand.u32 4294901760, %v715_v15  ;;  %v641_v4 = vsub.f32 %v9220_v16, %v9241_v45 }
 0x12e   : > { %v594_v23 = vand.u32 4294901760, %v553_v12  ;;  %7437 = vmatprep.subr.bf16.mxu1 %v10911_v1  ;;  %7455 = vmatprep.subr.bf16.mxu0 %v10911_v1  ;;  %11034 = vst [vmem:[#allocation31_spill] sm:$0xff] %v9231_v31  ;;  %v722_v37 = vsub.f32 %v9214_v10, %v721_v27  ;;  %v9237_v41 = vsub.f32 %v554_v13, %v597_v24 }
 0x12f   : > { %v556_v43 = vld [vmem:[#allocation2 + $0x78] sm:$0xff]  ;;  %v729_v44 = vsub.f32 %v9216_v11, %v728_v32  ;;  %v9243_v48 = vpack.c.bf16 %v728_v32, %v721_v27  ;;  %v9253_v62 = vpack.c.bf16 %v716_v36, %v709_v30 }
 0x130   : > { %v9235_v38 = vsub.f32 %v553_v12, %v594_v23  ;;  %v9247_v49 = vpack.c.bf16 %v597_v24, %v594_v23  ;;  %v603_v52 = vand.u32 4294901760, %v556_v43  ;;  %v723_v54 = vand.u32 4294901760, %v722_v37 }
 0x131   : > { %v555_v42 = vld [vmem:[#allocation2 + $0x70] sm:$0xff]  ;;  %11035 = vst [vmem:[#allocation32_spill] sm:$0xff] %v9243_v48  ;;  %7439 = vmatpush3.bf16.msra.mxu1 %v9226_v19  ;;  %7457 = vmatpush3.bf16.msra.mxu0 %v9231_v31  ;;  %v730_v55 = vand.u32 4294901760, %v729_v44  ;;  %v742_v56 = vand.u32 4294901760, %v9237_v41  ;;  %11036 = vst [vmem:[#allocation33_spill] sm:$0xff] %v9253_v62  ;;  %v9279_v37 = vand.u32 4294901760, %v641_v4 }
 0x132   : > { %v600_v51 = vand.u32 4294901760, %v555_v42  ;;  %v735_v53 = vand.u32 4294901760, %v9235_v38  ;;  %7440 = vmatprep.subr.bf16.mxu1 %v10911_v1  ;;  %7458 = vmatprep.subr.bf16.mxu0 %v10911_v1  ;;  %v9258_v3 = vsub.f32 %v556_v43, %v603_v52  ;;  %v1849_v43 = vpop.permute.xlu0 %1848  ;;  %v9302_v4 = vld [vmem:[#allocation2] sm:$0xff] }
 0x133   : > { %v743_v5 = vsub.f32 %v9237_v41, %v742_v56  ;;  %v9273_v23 = vpack.c.bf16 %v730_v55, %v723_v54  ;;  %1854 = vst.msk [vmem:[#allocation2 + $0x10] sm:$0xff] %vm454_vm3, %v1849_v43  ;;  %v3232_v43 = vld [vmem:[%s9024_s1] sm:$0xff] }
 0x134   : > { %v736_v63 = vsub.f32 %v9235_v38, %v735_v53  ;;  %v9256_v2 = vsub.f32 %v555_v42, %v600_v51  ;;  %v9263_v8 = vpack.c.bf16 %v742_v56, %v735_v53  ;;  %v9267_v12 = vpack.c.bf16 %v603_v52, %v600_v51  ;;  %v1851_v42 = vpop.permute.xlu1 %1850  ;;  %3234 = vst.msk [vmem:[#allocation2] sm:$0xff] %vm440_vm0, %v3232_v43 }
 0x135   : > { %7442 = vmatpush3.bf16.msra.mxu1 %v9247_v49  ;;  %7460 = vmatpush3.bf16.msra.mxu0 %v9253_v62  ;;  %v756_v15 = vand.u32 4294901760, %v9258_v3  ;;  %11039 = vst [vmem:[#allocation36_spill] sm:$0xff] %v9273_v23  ;;  %v744_v27 = vand.u32 4294901760, %v743_v5  ;;  %1855 = vst.msk [vmem:[#allocation2 + $0x18] sm:$0xff] %vm454_vm3, %v1851_v42  ;;  %v9304_v5 = vld [vmem:[#allocation2 + $0x8] sm:$0xff] }
 0x136   : > { %11037 = vst [vmem:[#allocation34_spill] sm:$0xff] %v9263_v8  ;;  %11038 = vst [vmem:[#allocation35_spill] sm:$0xff] %v9267_v12  ;;  %v749_v13 = vand.u32 4294901760, %v9256_v2  ;;  %7443 = vmatprep.subr.bf16.mxu1 %v10911_v1  ;;  %7461 = vmatprep.subr.bf16.mxu0 %v10911_v1  ;;  %v737_v24 = vand.u32 4294901760, %v736_v63  ;;  %v1862_v54 = vpop.permute.xlu0 %1861  ;;  %v11064_v47 = vand.u32 4294901760, %v9304_v5 }
 0x137   : > { %v757_v32 = vsub.f32 %v9258_v3, %v756_v15  ;;  %1867 = vst.msk [vmem:[#allocation2 + $0x20] sm:$0xff] %vm468_vm2, %v1862_v54  ;;  %v9337_v54 = vpack.c.bf16 %v9157_v9, %v9146_v59 }
 0x138   : > { %v750_v30 = vsub.f32 %v9256_v2, %v749_v13  ;;  %v9277_v36 = vpack.c.bf16 %v756_v15, %v749_v13  ;;  %v9287_v44 = vpack.c.bf16 %v744_v27, %v737_v24  ;;  %v1864_v53 = vpop.permute.xlu1 %1863  ;;  %v10905_v13 = vand.u32 4294901760, %v9302_v4 }
 0x139   : > { %7445 = vmatpush3.bf16.msra.mxu1 %v9267_v12  ;;  %7463 = vmatpush3.bf16.msra.mxu0 %v9273_v23  ;;  %v758_v52 = vand.u32 4294901760, %v757_v32  ;;  %1868 = vst.msk [vmem:[#allocation2 + $0x28] sm:$0xff] %vm468_vm2, %v1864_v53  ;;  %v10904_v15 = vand.u32 4294901760, %v9304_v5  ;;  %11043 = vst [vmem:[#allocation40_spill] sm:$0xff] %v9337_v54 }
 0x13a   : > { %11040 = vst [vmem:[#allocation37_spill] sm:$0xff] %v9277_v36  ;;  %7464 = vmatprep.subr.bf16.mxu0 %v10911_v1  ;;  %7566 = vmatprep.subr.bf16.mxu1 %v10911_v1  ;;  %11041 = vst [vmem:[#allocation38_spill] sm:$0xff] %v9287_v44  ;;  %v751_v51 = vand.u32 4294901760, %v750_v30  ;;  %v1875_v63 = vpop.permute.xlu0 %1874  ;;  %v9312_v24 = vld [vmem:[#allocation2 + $0x10] sm:$0xff] }
 0x13b   : > { %1880 = vst.msk [vmem:[#allocation2 + $0x30] sm:$0xff] %vm482_vm4, %v1875_v63  ;;  %v9321_v30 = vpack.c.bf16 %v10904_v15, %v10905_v13  ;;  %v10898_v32 = vand.u32 4294901760, %v9312_v24 }
 0x13c   : > { %6093 = vmatmul.mubr.f32.vlgmr.msra.gmra.mrb[0].mxu1 %v9279_v37  ;;  %v9296_v55 = vpack.c.bf16 %v758_v52, %v751_v51  ;;  %v1877_v56 = vpop.permute.xlu1 %1876  ;;  %v9314_v27 = vld [vmem:[#allocation2 + $0x18] sm:$0xff] }
 0x13d   : > { %7466 = vmatpush3.bf16.msra.mxu0 %v9287_v44  ;;  %7568 = vmatpush3.bf16.msra.mxu1 %v9074_v20  ;;  %1881 = vst.msk [vmem:[#allocation2 + $0x38] sm:$0xff] %vm482_vm4, %v1877_v56  ;;  %v10899_v42 = vand.u32 4294901760, %v9314_v27  ;;  %v3233_v51 = vld [vmem:[%s9024_s1 + $0x8] sm:$0xff]  ;;  %v9348_v43 = vsub.f32 %v9312_v24, %v10898_v32  ;;  %v9363_v32 = vpack.c.bf16 %v9159_v14, %v9148_v60 }
 0x13e   : > { %7467 = vmatprep.subr.bf16.mxu0 %v10911_v1  ;;  %7569 = vmatprep.subr.bf16.mxu1 %v10911_v1  ;;  %11042 = vst [vmem:[#allocation39_spill] sm:$0xff] %v9296_v55  ;;  %v1888_v53 = vpop.permute.xlu0 %1887  ;;  %3235 = vst.msk [vmem:[#allocation2 + $0x8] sm:$0xff] %vm440_vm0, %v3233_v51  ;;  %v9341_v56 = vld [vmem:[#allocation2 + $0x20] sm:$0xff]  ;;  %v9401_v14 = vpack.c.bf16 %v9173_v29, %v9171_v28 }
 0x13f   : > { %6302 = vmatprep.mubr.msk.f32.mxu1 %vm8727_vm1, %v10902_v0  ;;  %1893 = vst.msk [vmem:[#allocation2 + $0x40] sm:$0xff] %vm496_vm5, %v1888_v53  ;;  %v9353_v51 = vsub.f32 %v9314_v27, %v10899_v42  ;;  %v10906_v59 = vand.u32 4294901760, %v9341_v56  ;;  %11044 = vst [vmem:[#allocation41_spill] sm:$0xff] %v9363_v32  ;;  %v10910_v25 = vand.u32 4294901760, %v9348_v43 }
 0x140   : > { %v1890_v52 = vpop.permute.xlu1 %1889  ;;  %v9343_v63 = vld [vmem:[#allocation2 + $0x28] sm:$0xff]  ;;  %11046 = vst [vmem:[#allocation43_spill] sm:$0xff] %v9401_v14 }
 0x141   : > { %7469 = vmatpush3.bf16.msra.mxu0 %v9296_v55  ;;  %7571 = vmatpush3.bf16.msra.mxu1 %v9154_v7  ;;  %1894 = vst.msk [vmem:[#allocation2 + $0x48] sm:$0xff] %vm496_vm5, %v1890_v52  ;;  %v10907_v9 = vand.u32 4294901760, %v9343_v63  ;;  %v9376_v15 = vsub.f32 %v9341_v56, %v10906_v59  ;;  %v11052_v55 = vmov 0.0|0.0  }
 0x142   : > { %7470 = vmatprep.subr.bf16.mxu0 %v10911_v1  ;;  %7572 = vmatprep.subr.bf16.mxu1 %v10911_v1  ;;  %v1901_v53 = vpop.permute.xlu0 %1900  ;;  %v9367_v42 = vld [vmem:[#allocation2 + $0x30] sm:$0xff] }
 0x143   : > { %1906 = vst.msk [vmem:[#allocation2 + $0x50] sm:$0xff] %vm510_vm6, %v1901_v53  ;;  %v9381_v60 = vsub.f32 %v9343_v63, %v10907_v9  ;;  %v11049_v28 = vand.u32 4294901760, %v9376_v15 }
 0x144   : > { %6128 = vmatmul.mubr.f32.vlgmr.msra.gmra.mrb[0].mxu0 %v9189_v46  ;;  %v1903_v52 = vpop.permute.xlu1 %1902  ;;  %v9369_v26 = vld [vmem:[#allocation2 + $0x38] sm:$0xff] }
 0x145   : > { %7472 = vmatpush3.bf16.msra.mxu0 %v9110_v34  ;;  %7574 = vmatpush3.bf16.msra.mxu1 %v9166_v18  ;;  %1907 = vst.msk [vmem:[#allocation2 + $0x58] sm:$0xff] %vm510_vm6, %v1903_v52  ;;  %v11050_v29 = vand.u32 4294901760, %v9381_v60 }
 0x146   : > { %7473 = vmatprep.subr.bf16.mxu0 %v10911_v1  ;;  %7575 = vmatprep.subr.bf16.mxu1 %v10911_v1  ;;  %v1914_v13 = vpop.permute.xlu0 %1913 }
 0x147   : > { %6162 = vmatprep.mubr.msk.f32.mxu0 %vm8727_vm1, %v10902_v0  ;;  %v10909_v0 = vand.u32 4294901760, %v9353_v51  ;;  %1919 = vst.msk [vmem:[#allocation2 + $0x60] sm:$0xff] %vm524_vm7, %v1914_v13 }
 0x148   : > { %v1916_v53 = vpop.permute.xlu1 %1915 }
 0x149   : > { %7475 = vmatpush3.bf16.msra.mxu0 %v9337_v54  ;;  %7577 = vmatpush3.bf16.msra.mxu1 %v9176_v35  ;;  %v9391_v59 = vpack.c.bf16 %v10909_v0, %v10910_v25  ;;  %1920 = vst.msk [vmem:[#allocation2 + $0x68] sm:$0xff] %vm524_vm7, %v1916_v53  ;;  %v9405_v0 = vld [vmem:[#allocation2 + $0x48] sm:$0xff]  ;;  %v11047_v25 = vand.u32 4294901760, %v9367_v42  ;;  %v11048_v53 = vand.u32 4294901760, %v9369_v26  ;;  %v9423_v54 = vpack.c.bf16 %v11050_v29, %v11049_v28 }
 0x14a   : > { %7476 = vmatprep.subr.bf16.mxu0 %v10911_v1  ;;  %7578 = vmatprep.subr.bf16.mxu1 %v10911_v1  ;;  %v1927_v34 = vpop.permute.xlu0 %1926 }
 0x14b   : > { %11045 = vst [vmem:[#allocation42_spill] sm:$0xff] %v9391_v59  ;;  %v9415_v13 = vsub.f32 %v9369_v26, %v11048_v53  ;;  %11051 = vst [vmem:[#allocation44_spill] sm:$0xff] %v9423_v54  ;;  %v9431_v53 = vpack.c.bf16 %v9197_v57, %v9194_v50  ;;  %v9447_v50 = vld [vmem:[#allocation2 + $0x50] sm:$0xff] }
 0x14c   : > { %1932 = vst.msk [vmem:[#allocation2 + $0x70] sm:$0xff] %vm538_vm8, %v1927_v34  ;;  %v9449_v57 = vld [vmem:[#allocation2 + $0x58] sm:$0xff] }
 0x14d   : > { %7478 = vmatpush3.bf16.msra.mxu0 %v9363_v32  ;;  %7580 = vmatpush3.bf16.msra.mxu1 %v9205_v61  ;;  %v9403_v32 = vld [vmem:[#allocation2 + $0x40] sm:$0xff]  ;;  %11053 = vst [vmem:[#allocation45_spill] sm:$0xff] %v9431_v53  ;;  %v10922_v29 = vand.u32 4294901760, %v9415_v13  ;;  %v11062_v31 = vand.u32 4294901760, %v9449_v57 }
 0x14e   : > { %7479 = vmatprep.subr.bf16.mxu0 %v10911_v1  ;;  %7581 = vmatprep.subr.bf16.mxu1 %v10911_v1  ;;  %v9410_v1 = vsub.f32 %v9367_v42, %v11047_v25  ;;  %v10918_v52 = vand.u32 4294901760, %v9403_v32  ;;  %v1929_v25 = vpop.permute.xlu1 %1928 }
 0x14f   : > { %1933 = vst.msk [vmem:[#allocation2 + $0x78] sm:$0xff] %vm538_vm8, %v1929_v25 }
 0x150   : > { %v10923_v28 = vand.u32 4294901760, %v9410_v1  ;;  %v9440_v9 = vsub.f32 %v9403_v32, %v10918_v52  ;;  %v9469_v23 = vld [vmem:[#allocation2 + $0x68] sm:$0xff]  ;;  %v9486_v52 = vpack.c.bf16 %v9237_v41, %v9235_v38  ;;  %v11063_v41 = vand.u32 4294901760, %v9302_v4 }
 0x151   : > { %7481 = vmatpush3.bf16.msra.mxu0 %v9401_v14  ;;  %7583 = vmatpush3.bf16.msra.mxu1 %v9226_v19  ;;  %v11054_v14 = vand.u32 4294901760, %v9405_v0 }
 0x152   : > { %7482 = vmatprep.subr.bf16.mxu0 %v11052_v55  ;;  %7584 = vmatprep.subr.bf16.mxu1 %v11052_v55  ;;  %v9457_v34 = vpack.c.bf16 %v10922_v29, %v10923_v28  ;;  %v10927_v62 = vand.u32 4294901760, %v9440_v9  ;;  %11059 = vst [vmem:[#allocation50_spill] sm:$0xff] %v9486_v52  ;;  %v11060_v28 = vand.u32 4294901760, %v9447_v50  ;;  %v9508_v6 = vsub.f32 %v9302_v4, %v11063_v41 }
 0x153   : > { %v9445_v44 = vsub.f32 %v9405_v0, %v11054_v14  ;;  %v9463_v14 = vpack.c.bf16 %v9216_v11, %v9214_v10  ;;  %v9488_v25 = vld [vmem:[#allocation2 + $0x70] sm:$0xff] }
 0x154   : > { %11056 = vst [vmem:[#allocation47_spill] sm:$0xff] %v9457_v34  ;;  %v9495_v10 = vsub.f32 %v9447_v50, %v11060_v28  ;;  %v9513_v28 = vsub.f32 %v9304_v5, %v11064_v47  ;;  %v10936_v4 = vand.u32 4294901760, %v9508_v6  ;;  %v11067_v47 = vand.u32 4294901760, %v9488_v25 }
 0x155   : > { %11055 = vst [vmem:[#allocation46_spill] sm:$0xff] %v9445_v44  ;;  %7484 = vmatpush3.bf16.msra.mxu0 %v9431_v53  ;;  %7586 = vmatpush3.bf16.msra.mxu1 %v9247_v49  ;;  %11057 = vst [vmem:[#allocation48_spill] sm:$0xff] %v9463_v14  ;;  %v9467_v53 = vld [vmem:[#allocation2 + $0x60] sm:$0xff]  ;;  %v10926_v29 = vand.u32 4294901760, %v9445_v44 }
 0x156   : > { %7485 = vmatprep.subr.bf16.mxu0 %v11052_v55  ;;  %7587 = vmatprep.subr.bf16.mxu1 %v11052_v55  ;;  %11061 = vst [vmem:[#allocation51_spill] sm:$0xff] %v9495_v10  ;;  %v9532_v5 = vsub.f32 %v9488_v25, %v11067_v47  ;;  %v2045_v41 = vsub.f32 %v9508_v6, %v10936_v4  ;;  %v11070_v47 = vand.u32 4294901760, %v9513_v28 }
 0x157   : > { %v9481_v11 = vpack.c.bf16 %v10926_v29, %v10927_v62  ;;  %v9500_v29 = vsub.f32 %v9449_v57, %v11062_v31  ;;  %v11065_v31 = vand.u32 4294901760, %v9467_v53  ;;  %v11066_v62 = vand.u32 4294901760, %v9469_v23 }
 0x158   : > { %v2052_v54 = vsub.f32 %v9513_v28, %v11070_v47  ;;  %v2046_v59 = vand.u32 4294901760, %v2045_v41  ;;  %v10943_v44 = vand.u32 4294901760, %v9532_v5 }
 0x159   : > { %7487 = vmatpush3.bf16.msra.mxu0 %v9463_v14  ;;  %7589 = vmatpush3.bf16.msra.mxu1 %v9267_v12  ;;  %11058 = vst [vmem:[#allocation49_spill] sm:$0xff] %v9481_v11  ;;  %v9490_v14 = vld [vmem:[#allocation2 + $0x78] sm:$0xff]  ;;  %v9519_v33 = vsub.f32 %v9467_v53, %v11065_v31  ;;  %v9524_v38 = vsub.f32 %v9469_v23, %v11066_v62  ;;  %v10946_v62 = vand.u32 4294901760, %v9500_v29 }
 0x15a   : > { %7488 = vmatprep.subr.bf16.mxu0 %v11052_v55  ;;  %7590 = vmatprep.subr.bf16.mxu1 %v11052_v55  ;;  %v9536_v31 = vpack.c.bf16 %v9258_v3, %v9256_v2  ;;  %v11069_v11 = vand.u32 4294901760, %v9490_v14  ;;  %v2053_v4 = vand.u32 4294901760, %v2052_v54  ;;  %v11075_v54 = vmov 0.0  }
 0x15b   : > { %v10945_v2 = vand.u32 4294901760, %v9519_v33  ;;  %v10944_v3 = vand.u32 4294901760, %v9524_v38 }
 0x15c   : > { %11068 = vst [vmem:[#allocation52_spill] sm:$0xff] %v9536_v31  ;;  %v9543_v34 = vsub.f32 %v9490_v14, %v11069_v11 }
 0x15d   : > { %7490 = vmatpush3.bf16.msra.mxu0 %v9486_v52  ;;  %v2114_v52 = vand.u32 4294901760, %v9495_v10  ;;  %v9570_v10 = vpack.c.bf16 %v2053_v4, %v2046_v59  ;;  %v11076_v59 = vand.u32 4294901760, %v9076_v21  ;;  %v11077_v4 = vand.u32 4294901760, %v9078_v22  ;;  %v5380_v21 = vld [vmem:[%s9024_s1 + $0x18] sm:$0xff]  ;;  %v5382_v22 = vld [vmem:[%s9024_s1 + $0x28] sm:$0xff] }
 0x15e   : > { %7491 = vmatprep.subr.bf16.mxu0 %v11052_v55  ;;  %v10942_v47 = vand.u32 4294901760, %v9543_v34  ;;  %3243 = vrot.lane.b32.xlu1 %v5380_v21, %s8721_s9  ;;  %v5385_v21 = vld [vmem:[%s9024_s1 + $0x40] sm:$0xff] }
 0x15f   : > { %v9558_v11 = vpack.c.bf16 %v10946_v62, %v2114_v52  ;;  %11073 = vst [vmem:[#allocation55_spill] sm:$0xff] %v9570_v10 }
 0x160   : > { %v9576_v41 = vpack.c.bf16 %v10942_v47, %v10943_v44  ;;  %v9599_v47 = vpack.c.bf16 %v11077_v4, %v11076_v59  ;;  %v9605_v44 = vpack.c.bf16 %v9513_v28, %v9508_v6  ;;  %v5381_v59 = vld [vmem:[%s9024_s1 + $0x20] sm:$0xff]  ;;  %v5384_v4 = vld [vmem:[%s9024_s1 + $0x38] sm:$0xff] }
 0x161   : > { %7493 = vmatpush3.bf16.msra.mxu0 %v9536_v31  ;;  %11071 = vst [vmem:[#allocation53_spill] sm:$0xff] %v9558_v11  ;;  %v9567_v31 = vpack.c.bf16 %v10944_v3, %v10945_v2  ;;  %v5379_v3 = vld [vmem:[%s9024_s1 + $0x10] sm:$0xff] }
 0x162   : > { %7494 = vmatprep.subr.bf16.mxu0 %v11052_v55  ;;  %11074 = vst [vmem:[#allocation56_spill] sm:$0xff] %v9576_v41  ;;  %11078 = vst [vmem:[#allocation57_spill] sm:$0xff] %v9599_v47  ;;  %3241 = vrot.lane.b32.xlu0 %v5379_v3, %s8721_s9  ;;  %v5383_v2 = vld [vmem:[%s9024_s1 + $0x30] sm:$0xff]  ;;  %v5386_v3 = vld [vmem:[%s9024_s1 + $0x48] sm:$0xff] }
 0x163   : > { %11072 = vst [vmem:[#allocation54_spill] sm:$0xff] %v9567_v31  ;;  %11079 = vst [vmem:[#allocation58_spill] sm:$0xff] %v9605_v44  ;;  %3256 = vrot.lane.b32.xlu1 %v5382_v22, %s8720_s27  ;;  %v5388_v22 = vld [vmem:[%s9024_s1 + $0x58] sm:$0xff] }
 0x164   : > { %6163 = vmatmul.mubr.f32.vlgmr.msra.gmra.mrb[0].mxu0 %v9220_v16 }
 0x165   : > { %7496 = vmatpush3.bf16.msra.mxu0 %v9074_v20  ;;  %6197 = vmatprep.mubr.msk.f32.mxu0 %vm8727_vm1, %v11075_v54 }
 0x166   : > { %7497 = vmatprep.subr.bf16.mxu0 %v11052_v55  ;;  %3254 = vrot.lane.b32.xlu0 %v5381_v59, %s8720_s27  ;;  %v5387_v59 = vld [vmem:[%s9024_s1 + $0x50] sm:$0xff] }
 0x167   : > { %3269 = vrot.lane.b32.xlu1 %v5384_v4, %s8722_s7  ;;  %v5389_v4 = vld [vmem:[%s9024_s1 + $0x60] sm:$0xff] }
 0x169   : > { %7499 = vmatpush3.bf16.msra.mxu0 %v9154_v7 }
 0x16a   : > { %7500 = vmatprep.subr.bf16.mxu0 %v11052_v55  ;;  %3267 = vrot.lane.b32.xlu0 %v5383_v2, %s8722_s7  ;;  %v5390_v2 = vld [vmem:[%s9024_s1 + $0x68] sm:$0xff] }
 0x16b   : > { %3282 = vrot.lane.b32.xlu1 %v5386_v3, %s8723_s11  ;;  %v5392_v3 = vld [vmem:[%s9024_s1 + $0x78] sm:$0xff] }
 0x16d   : > { %7502 = vmatpush3.bf16.msra.mxu0 %v9166_v18 }
 0x16e   : > { %7503 = vmatprep.subr.bf16.mxu0 %v11052_v55  ;;  %3280 = vrot.lane.b32.xlu0 %v5385_v21, %s8723_s11  ;;  %v5391_v21 = vld [vmem:[%s9024_s1 + $0x70] sm:$0xff]  ;;  %s8626_s1 = scalar_lea.vmem %s8625_s20, 256 }
 0x16f   : > { %3295 = vrot.lane.b32.xlu1 %v5388_v22, %s8724_s18  ;;  %v11080_v22 = vand.u32 4294901760, %v9312_v24  ;;  %v11084_v24 = vand.u32 4294901760, %v9367_v42  ;;  %v11088_v42 = vand.u32 4294901760, %v9447_v50  ;;  %v11094_v50 = vand.u32 4294901760, %v9488_v25  ;;  %p8628_p11 = scmp.lt.s32.totalorder %s8626_s1, %s8620_s30 }
 0x170   : > { %v11099_v25 = vand.u32 4294901760, %v9376_v15 }
 0x171   : > { %7505 = vmatpush3.bf16.msra.mxu0 %v9176_v35  ;;  %p8629_p3 = por %p8628_p11, %p8627_p7 }
 0x172   : > { %7506 = vmatprep.subr.bf16.mxu0 %v11052_v55  ;;  %3293 = vrot.lane.b32.xlu0 %v5387_v59, %s8724_s18  ;;  %v11081_v59 = vand.u32 4294901760, %v9314_v27  ;;  %v11085_v27 = vand.u32 4294901760, %v9369_v26  ;;  %v11089_v26 = vand.u32 4294901760, %v9449_v57  ;;  %v11095_v57 = vand.u32 4294901760, %v9490_v14 }
 0x173   : > { %3308 = vrot.lane.b32.xlu1 %v5390_v2, %s8725_s17  ;;  %v2073_v14 = vsub.f32 %v9376_v15, %v11099_v25  ;;  %p8630_p5 = pnand %p8629_p3, %p8623_p13 }
 0x174   : > { %v9678_v2 = vpack.c.bf16 %v11081_v59, %v11080_v22  ;;  %v9696_v22 = vpack.c.bf16 %v11085_v27, %v11084_v24  ;;  %v9728_v24 = vpack.c.bf16 %v11095_v57, %v11094_v50  ;;  %v11097_v27 = vand.u32 4294901760, %v9348_v43 }
 0x175   : > { %7508 = vmatpush3.bf16.msra.mxu0 %v9205_v61 }
 0x176   : > { %7509 = vmatprep.subr.bf16.mxu0 %v11052_v55  ;;  %3306 = vrot.lane.b32.xlu0 %v5389_v4, %s8725_s17  ;;  %v11082_v4 = vand.u32 4294901760, %v9341_v56  ;;  %v11086_v56 = vand.u32 4294901760, %v9403_v32  ;;  %v11091_v32 = vand.u32 4294901760, %v9467_v53  ;;  %11096 = vst [vmem:[#allocation61_spill] sm:$0xff] %v9728_v24  ;;  %v2059_v53 = vsub.f32 %v9348_v43, %v11097_v27 }
 0x177   : > { %3321 = vrot.lane.b32.xlu1 %v5392_v3, %s8726_s8  ;;  %v11083_v3 = vand.u32 4294901760, %v9343_v63  ;;  %v11087_v63 = vand.u32 4294901760, %v9405_v0  ;;  %v11092_v0 = vand.u32 4294901760, %v9469_v23  ;;  %v11098_v23 = vand.u32 4294901760, %v9353_v51 }
 0x178   : > { %v11102_v27 = vand.u32 4294901760, %v9410_v1 }
 0x179   : > { %7511 = vmatpush3.bf16.msra.mxu0 %v9226_v19  ;;  %v9704_v59 = vpack.c.bf16 %v11087_v63, %v11086_v56  ;;  %v2066_v56 = vsub.f32 %v9353_v51, %v11098_v23  ;;  %v11100_v63 = vand.u32 4294901760, %v9381_v60 }
 0x17a   : > { %7512 = vmatprep.subr.bf16.mxu0 %v11052_v55  ;;  %3319 = vrot.lane.b32.xlu0 %v5391_v21, %s8726_s8  ;;  %v9688_v21 = vpack.c.bf16 %v11083_v3, %v11082_v4  ;;  %v9712_v4 = vpack.c.bf16 %v11089_v26, %v11088_v42  ;;  %v9720_v3 = vpack.c.bf16 %v11092_v0, %v11091_v32  ;;  %v2060_v26 = vand.u32 4294901760, %v2059_v53 }
 0x17b   : > { %v2080_v42 = vsub.f32 %v9381_v60, %v11100_v63  ;;  %v2067_v32 = vand.u32 4294901760, %v2066_v56  ;;  %v2074_v0 = vand.u32 4294901760, %v2073_v14  ;;  %v2087_v23 = vsub.f32 %v9410_v1, %v11102_v27 }
 0x17c   : > { %11090 = vst [vmem:[#allocation59_spill] sm:$0xff] %v9712_v4  ;;  %11093 = vst [vmem:[#allocation60_spill] sm:$0xff] %v9720_v3  ;;  %v11103_v53 = vand.u32 4294901760, %v9415_v13  ;;  %v11105_v14 = vand.u32 4294901760, %v9440_v9 }
 0x17d   : > { %7514 = vmatpush3.bf16.msra.mxu0 %v9247_v49  ;;  %v2081_v50 = vand.u32 4294901760, %v2080_v42  ;;  %v9750_v57 = vpack.c.bf16 %v2067_v32, %v2060_v26  ;;  %v2088_v63 = vand.u32 4294901760, %v2087_v23  ;;  %v11106_v26 = vld [vmem:[#allocation46_spill] sm:$0xff] }
 0x17e   : > { %7515 = vmatprep.subr.bf16.mxu0 %v11052_v55  ;;  %v2094_v56 = vsub.f32 %v9415_v13, %v11103_v53  ;;  %v2101_v42 = vsub.f32 %v9440_v9, %v11105_v14  ;;  %v11107_v32 = vand.u32 4294901760, %v11106_v26  ;;  %v11108_v53 = vld [vmem:[#allocation51_spill] sm:$0xff] }
 0x17f   : > { %11101 = vst [vmem:[#allocation62_spill] sm:$0xff] %v9750_v57  ;;  %v9760_v25 = vpack.c.bf16 %v2081_v50, %v2074_v0  ;;  %v11109_v0 = vand.u32 4294901760, %v9500_v29 }
 0x180   : > { %v2095_v62 = vand.u32 4294901760, %v2094_v56  ;;  %v2108_v27 = vsub.f32 %v11106_v26, %v11107_v32  ;;  %v2102_v56 = vand.u32 4294901760, %v2101_v42 }
 0x181   : > { %7517 = vmatpush3.bf16.msra.mxu0 %v9267_v12  ;;  %11104 = vst [vmem:[#allocation63_spill] sm:$0xff] %v9760_v25  ;;  %v2122_v50 = vsub.f32 %v9500_v29, %v11109_v0 }
 0x182   : > { %7518 = vmatprep.subr.bf16.mxu0 %v11052_v55  ;;  %v9776_v23 = vpack.c.bf16 %v2095_v62, %v2088_v63  ;;  %v2109_v14 = vand.u32 4294901760, %v2108_v27 }
 0x184   : > { %6198 = vmatmul.mubr.f32.vlgmr.msra.gmra.mrb[0].mxu0 %v9241_v45  ;;  %11110 = vst [vmem:[#allocation46_spill] sm:$0xff] %v9776_v23 }
 0x185   : > { %7520 = vmatpush3.bf16.msra.mxu0 %v9599_v47  ;;  %6232 = vmatprep.mubr.msk.f32.mxu0 %vm8727_vm1, %v11075_v54 }
 0x186   : > { %7521 = vmatprep.subr.bf16.mxu0 %v11052_v55 }
 0x189   : > { %7523 = vmatpush3.bf16.msra.mxu0 %v9179_v39 }
 0x18a   : > { %7524 = vmatprep.subr.bf16.mxu0 %v11052_v55 }
 0x18d   : > { %7526 = vmatpush3.bf16.msra.mxu0 %v9181_v40 }
 0x18e   : > { %7527 = vmatprep.subr.bf16.mxu0 %v11052_v55 }
 0x191   : > { %7529 = vmatpush3.bf16.msra.mxu0 %v9199_v58 }
 0x192   : > { %7530 = vmatprep.subr.bf16.mxu0 %v11052_v55 }
 0x195   : > { %7532 = vmatpush3.bf16.msra.mxu0 %v9222_v17 }
 0x196   : > { %7533 = vmatprep.subr.bf16.mxu0 %v11052_v55 }
 0x199   : > { %7535 = vmatpush3.bf16.msra.mxu0 %v9243_v48 }
 0x19a   : > { %7536 = vmatprep.subr.bf16.mxu0 %v11052_v55 }
 0x19d   : > { %7538 = vmatpush3.bf16.msra.mxu0 %v9263_v8  ;;  %v11113_v8 = vand.u32 4294901760, %v9524_v38 }
 0x19e   : > { %7539 = vmatprep.subr.bf16.mxu0 %v11052_v55 }
 0x19f   : > { %v2136_v0 = vsub.f32 %v9524_v38, %v11113_v8 }
 0x1a1   : > { %7541 = vmatpush3.bf16.msra.mxu0 %v9277_v36  ;;  %v11112_v36 = vand.u32 4294901760, %v9519_v33  ;;  %v2137_v42 = vand.u32 4294901760, %v2136_v0 }
 0x1a2   : > { %7542 = vmatprep.subr.bf16.mxu0 %v11052_v55 }
 0x1a4   : > { %6233 = vmatmul.mubr.f32.vlgmr.msra.gmra.mrb[0].mxu0 %v9189_v46 }
 0x1a5   : > { %7544 = vmatpush3.bf16.msra.mxu0 %v9074_v20  ;;  %6267 = vmatprep.mubr.msk.f32.mxu0 %vm8727_vm1, %v11075_v54 }
 0x1a6   : > { %7545 = vmatprep.subr.bf16.mxu0 %v11052_v55 }
 0x1a9   : > { %7547 = vmatpush3.bf16.msra.mxu0 %v9154_v7 }
 0x1aa   : > { %7548 = vmatprep.subr.bf16.mxu0 %v11052_v55 }
 0x1ad   : > { %7550 = vmatpush3.bf16.msra.mxu0 %v9166_v18 }
 0x1ae   : > { %7551 = vmatprep.subr.bf16.mxu0 %v11052_v55 }
 0x1b1   : > { %7553 = vmatpush3.bf16.msra.mxu0 %v9176_v35 }
 0x1b2   : > { %7554 = vmatprep.subr.bf16.mxu0 %v11052_v55 }
 0x1b5   : > { %7556 = vmatpush3.bf16.msra.mxu0 %v9205_v61 }
 0x1b6   : > { %7557 = vmatprep.subr.bf16.mxu0 %v11052_v55 }
 0x1b9   : > { %7559 = vmatpush3.bf16.msra.mxu0 %v9226_v19 }
 0x1ba   : > { %7560 = vmatprep.subr.bf16.mxu0 %v11052_v55 }
 0x1bd   : > { %7562 = vmatpush3.bf16.msra.mxu0 %v9247_v49 }
 0x1be   : > { %7563 = vmatprep.subr.bf16.mxu0 %v11052_v55 }
 0x1c1   : > { %7565 = vmatpush3.bf16.msra.mxu0 %v9267_v12 }
 0x1c2   : > { %7710 = vmatprep.subr.bf16.mxu0 %v11052_v55 }
 0x1c4   : > { %6268 = vmatmul.mubr.f32.vlgmr.msra.gmra.mrb[0].mxu0 %v9189_v46 }
 0x1c5   : > { %7712 = vmatpush3.bf16.msra.mxu0 %v9321_v30  ;;  %6512 = vmatprep.mubr.msk.f32.mxu0 %vm8727_vm1, %v11075_v54 }
 0x1c6   : > { %7713 = vmatprep.subr.bf16.mxu0 %v11052_v55 }
 0x1c9   : > { %7715 = vmatpush3.bf16.msra.mxu0 %v9678_v2 }
 0x1ca   : > { %7716 = vmatprep.subr.bf16.mxu0 %v11052_v55 }
 0x1cd   : > { %7718 = vmatpush3.bf16.msra.mxu0 %v9688_v21 }
 0x1ce   : > { %7719 = vmatprep.subr.bf16.mxu0 %v11052_v55 }
 0x1d1   : > { %7721 = vmatpush3.bf16.msra.mxu0 %v9696_v22 }
 0x1d2   : > { %7722 = vmatprep.subr.bf16.mxu0 %v11052_v55 }
 0x1d4   : > { %v3242_v8 = vpop.permute.xlu0 %3241 }
 0x1d5   : > { %7724 = vmatpush3.bf16.msra.mxu0 %v9704_v59  ;;  %3247 = vst.msk [vmem:[#allocation2 + $0x10] sm:$0xff] %vm454_vm3, %v3242_v8 }
 0x1d6   : > { %7725 = vmatprep.subr.bf16.mxu0 %v11052_v55 }
 0x1d8   : > { %v3255_v0 = vpop.permute.xlu0 %3254 }
 0x1d9   : > { %7727 = vmatpush3.bf16.msra.mxu0 %v9712_v4  ;;  %3260 = vst.msk [vmem:[#allocation2 + $0x20] sm:$0xff] %vm468_vm2, %v3255_v0 }
 0x1da   : > { %7728 = vmatprep.subr.bf16.mxu0 %v11052_v55 }
 0x1dd   : > { %7730 = vmatpush3.bf16.msra.mxu0 %v9720_v3 }
 0x1de   : > { %7731 = vmatprep.subr.bf16.mxu0 %v11052_v55 }
 0x1e1   : > { %7733 = vmatpush3.bf16.msra.mxu0 %v9728_v24 }
 0x1e2   : > { %7734 = vmatprep.subr.bf16.mxu0 %v11052_v55 }
 0x1e4   : > { %6513 = vmatmul.mubr.f32.vlgmr.msra.gmra.mrb[2].mxu0 %v9279_v37 }
 0x1e5   : > { %7736 = vmatpush3.bf16.msra.mxu0 %v9570_v10  ;;  %6547 = vmatprep.mubr.msk.f32.mxu0 %vm8727_vm1, %v11075_v54  ;;  %v9780_v10 = vpack.c.bf16 %v2109_v14, %v2102_v56  ;;  %v3244_v56 = vpop.permute.xlu1 %3243 }
 0x1e6   : > { %7737 = vmatprep.subr.bf16.mxu0 %v11052_v55  ;;  %3248 = vst.msk [vmem:[#allocation2 + $0x18] sm:$0xff] %vm454_vm3, %v3244_v56  ;;  %v3268_v56 = vpop.permute.xlu0 %3267 }
 0x1e7   : > { %11111 = vst [vmem:[#allocation51_spill] sm:$0xff] %v9780_v10  ;;  %3273 = vst.msk [vmem:[#allocation2 + $0x30] sm:$0xff] %vm482_vm4, %v3268_v56 }
 0x1e9   : > { %7739 = vmatpush3.bf16.msra.mxu0 %v9750_v57  ;;  %v2115_v57 = vsub.f32 %v11108_v53, %v2114_v52  ;;  %v2129_v52 = vsub.f32 %v9519_v33, %v11112_v36 }
 0x1ea   : > { %7740 = vmatprep.subr.bf16.mxu0 %v11052_v55 }
 0x1eb   : > { %v2116_v32 = vand.u32 4294901760, %v2115_v57  ;;  %v2130_v63 = vand.u32 4294901760, %v2129_v52  ;;  %v11115_v57 = vand.u32 4294901760, %v9532_v5  ;;  %v3257_v52 = vpop.permute.xlu1 %3256 }
 0x1ec   : > { %3261 = vst.msk [vmem:[#allocation2 + $0x28] sm:$0xff] %vm468_vm2, %v3257_v52  ;;  %v9831_v52 = vld [vmem:[#allocation2 + $0x20] sm:$0xff] }
 0x1ed   : > { %7742 = vmatpush3.bf16.msra.mxu0 %v9760_v25  ;;  %v2123_v25 = vand.u32 4294901760, %v2122_v50  ;;  %v2143_v27 = vsub.f32 %v9532_v5, %v11115_v57  ;;  %v11116_v50 = vand.u32 4294901760, %v9543_v34 }
 0x1ee   : > { %7743 = vmatprep.subr.bf16.mxu0 %v11052_v55 }
 0x1ef   : > { %v9790_v62 = vpack.c.bf16 %v2123_v25, %v2116_v32  ;;  %v2150_v36 = vsub.f32 %v9543_v34, %v11116_v50  ;;  %v9802_v25 = vpack.c.bf16 %v2137_v42, %v2130_v63  ;;  %v2144_v14 = vand.u32 4294901760, %v2143_v27  ;;  %v3270_v50 = vpop.permute.xlu1 %3269  ;;  %v9814_v63 = vld [vmem:[#allocation2 + $0x10] sm:$0xff]  ;;  %v9816_v42 = vld [vmem:[#allocation2 + $0x18] sm:$0xff] }
 0x1f0   : > { %3274 = vst.msk [vmem:[#allocation2 + $0x38] sm:$0xff] %vm482_vm4, %v3270_v50  ;;  %v10954_v27 = vand.u32 4294901760, %v9814_v63 }
 0x1f1   : > { %7745 = vmatpush3.bf16.msra.mxu0 %v9776_v23  ;;  %11114 = vst [vmem:[#allocation64_spill] sm:$0xff] %v9790_v62  ;;  %11117 = vst [vmem:[#allocation65_spill] sm:$0xff] %v9802_v25  ;;  %v2151_v32 = vand.u32 4294901760, %v2150_v36  ;;  %v10953_v36 = vand.u32 4294901760, %v9816_v42 }
 0x1f2   : > { %7746 = vmatprep.subr.bf16.mxu0 %v11052_v55  ;;  %v9838_v50 = vsub.f32 %v9814_v63, %v10954_v27 }
 0x1f3   : > { %v9808_v57 = vpack.c.bf16 %v2151_v32, %v2144_v14  ;;  %v3283_v8 = vpop.permute.xlu1 %3282  ;;  %v3281_v14 = vpop.permute.xlu0 %3280  ;;  %v9829_v32 = vpack.c.bf16 %v9353_v51, %v9348_v43  ;;  %v9833_v0 = vld [vmem:[#allocation2 + $0x28] sm:$0xff]  ;;  %v9843_v56 = vsub.f32 %v9816_v42, %v10953_v36  ;;  %v9855_v36 = vld [vmem:[#allocation2 + $0x30] sm:$0xff] }
 0x1f4   : > { %3287 = vst.msk [vmem:[#allocation2 + $0x48] sm:$0xff] %vm496_vm5, %v3283_v8  ;;  %3286 = vst.msk [vmem:[#allocation2 + $0x40] sm:$0xff] %vm496_vm5, %v3281_v14  ;;  %v11123_v8 = vand.u32 4294901760, %v9838_v50 }
 0x1f5   : > { %7748 = vmatpush3.bf16.msra.mxu0 %v9780_v10  ;;  %11118 = vst [vmem:[#allocation66_spill] sm:$0xff] %v9808_v57  ;;  %11119 = vst [vmem:[#allocation67_spill] sm:$0xff] %v9829_v32 }
 0x1f6   : > { %7749 = vmatprep.subr.bf16.mxu0 %v11052_v55 }
 0x1f7   : > { %v3296_v43 = vpop.permute.xlu1 %3295  ;;  %v3294_v51 = vpop.permute.xlu0 %3293  ;;  %v9857_v27 = vld [vmem:[#allocation2 + $0x38] sm:$0xff] }
 0x1f8   : > { %3300 = vst.msk [vmem:[#allocation2 + $0x58] sm:$0xff] %vm510_vm6, %v3296_v43  ;;  %3299 = vst.msk [vmem:[#allocation2 + $0x50] sm:$0xff] %vm510_vm6, %v3294_v51 }
 0x1f9   : > { %7751 = vmatpush3.bf16.msra.mxu0 %v9790_v62  ;;  %v11124_v62 = vand.u32 4294901760, %v9843_v56 }
 0x1fa   : > { %7752 = vmatprep.subr.bf16.mxu0 %v11052_v55 }
 0x1fb   : > { %v3307_v14 = vpop.permute.xlu0 %3306  ;;  %v9878_v10 = vpack.c.bf16 %v11124_v62, %v11123_v8  ;;  %v9889_v51 = vld [vmem:[#allocation2 + $0x48] sm:$0xff]  ;;  %v11127_v62 = vand.u32 4294901760, %v9855_v36 }
 0x1fc   : > { %3312 = vst.msk [vmem:[#allocation2 + $0x60] sm:$0xff] %vm524_vm7, %v3307_v14 }
 0x1fd   : > { %7754 = vmatpush3.bf16.msra.mxu0 %v9802_v25  ;;  %v3309_v25 = vpop.permute.xlu1 %3308  ;;  %11125 = vst [vmem:[#allocation69_spill] sm:$0xff] %v9878_v10  ;;  %v9896_v8 = vsub.f32 %v9855_v36, %v11127_v62  ;;  %v9915_v62 = vpack.c.bf16 %v11106_v26, %v9440_v9 }
 0x1fe   : > { %7755 = vmatprep.subr.bf16.mxu0 %v11052_v55  ;;  %3313 = vst.msk [vmem:[#allocation2 + $0x68] sm:$0xff] %vm524_vm7, %v3309_v25 }
 0x1ff   : > { %v3320_v43 = vpop.permute.xlu0 %3319  ;;  %11132 = vst [vmem:[#allocation72_spill] sm:$0xff] %v9915_v62  ;;  %v9931_v9 = vld [vmem:[#allocation2 + $0x50] sm:$0xff]  ;;  %v9933_v26 = vld [vmem:[#allocation2 + $0x58] sm:$0xff] }
 0x200   : > { %3325 = vst.msk [vmem:[#allocation2 + $0x70] sm:$0xff] %vm538_vm8, %v3320_v43 }
 0x201   : > { %7757 = vmatpush3.bf16.msra.mxu0 %v9808_v57  ;;  %v3322_v23 = vpop.permute.xlu1 %3321 }
 0x202   : > { %7758 = vmatprep.subr.bf16.mxu0 %v11052_v55  ;;  %3326 = vst.msk [vmem:[#allocation2 + $0x78] sm:$0xff] %vm538_vm8, %v3322_v23 }
 0x204   : > { %6548 = vmatmul.mubr.f32.vlgmr.msra.gmra.mrb[2].mxu0 %v9189_v46 }
 0x205   : > { %7760 = vmatpush3.bf16.msra.mxu0 %v9605_v44  ;;  %6582 = vmatprep.mubr.msk.f32.mxu0 %vm8727_vm1, %v11075_v54  ;;  %v9851_v44 = vpack.c.bf16 %v9381_v60, %v9376_v15  ;;  %v11122_v15 = vand.u32 4294901760, %v9833_v0  ;;  %v9953_v40 = vld [vmem:[#allocation2 + $0x68] sm:$0xff] }
 0x206   : > { %7761 = vmatprep.subr.bf16.mxu0 %v11052_v55 }
 0x207   : > { %11120 = vst [vmem:[#allocation68_spill] sm:$0xff] %v9851_v44  ;;  %v9869_v60 = vsub.f32 %v9833_v0, %v11122_v15  ;;  %v9887_v15 = vld [vmem:[#allocation2 + $0x40] sm:$0xff] }
 0x208   : > { %v10965_v25 = vand.u32 4294901760, %v9887_v15 }
 0x209   : > { %7763 = vmatpush3.bf16.msra.mxu0 %v9829_v32  ;;  %v11121_v32 = vand.u32 4294901760, %v9831_v52  ;;  %v11130_v48 = vand.u32 4294901760, %v9869_v60  ;;  %v9973_v58 = vld [vmem:[#allocation2 + $0x78] sm:$0xff] }
 0x20a   : > { %7764 = vmatprep.subr.bf16.mxu0 %v11052_v55  ;;  %v11143_v39 = vand.u32 4294901760, %v9973_v58 }
 0x20b   : > { %v9864_v57 = vsub.f32 %v9831_v52, %v11121_v32  ;;  %v9883_v32 = vpack.c.bf16 %v9415_v13, %v9410_v1  ;;  %v11128_v1 = vand.u32 4294901760, %v9857_v27 }
 0x20d   : > { %7766 = vmatpush3.bf16.msra.mxu0 %v9851_v44  ;;  %11126 = vst [vmem:[#allocation70_spill] sm:$0xff] %v9883_v32  ;;  %v9901_v13 = vsub.f32 %v9857_v27, %v11128_v1  ;;  %v11129_v44 = vand.u32 4294901760, %v9864_v57  ;;  %v10972_v1 = vand.u32 4294901760, %v9896_v8 }
 0x20e   : > { %7767 = vmatprep.subr.bf16.mxu0 %v11052_v55 }
 0x20f   : > { %v9910_v17 = vpack.c.bf16 %v11130_v48, %v11129_v44  ;;  %v10971_v14 = vand.u32 4294901760, %v9901_v13  ;;  %v11133_v48 = vand.u32 4294901760, %v9889_v51  ;;  %v9936_v23 = vpop.f32.mrb[0].mxu1 }
 0x211   : > { %7769 = vmatpush3.bf16.msra.mxu0 %v9883_v32  ;;  %11131 = vst [vmem:[#allocation71_spill] sm:$0xff] %v9910_v17  ;;  %v9924_v32 = vsub.f32 %v9887_v15, %v10965_v25  ;;  %v9929_v44 = vsub.f32 %v9889_v51, %v11133_v48  ;;  %v9942_v43 = vpack.c.bf16 %v10971_v14, %v10972_v1  ;;  %v6094_v25 = vpop.f32.mrb[1].mxu1  ;;  %v9971_v17 = vld [vmem:[#allocation2 + $0x70] sm:$0xff]  ;;  %v11138_v1 = vand.u32 4294901760, %v9931_v9 }
 0x212   : > { %7770 = vmatprep.subr.bf16.mxu0 %v11052_v55  ;;  %v9947_v48 = vpack.c.bf16 %v9500_v29, %v11108_v53  ;;  %v9969_v25 = vpack.c.bf16 %v9524_v38, %v9519_v33 }
 0x213   : > { %11134 = vst [vmem:[#allocation73_spill] sm:$0xff] %v9942_v43  ;;  %v10975_v10 = vand.u32 4294901760, %v9924_v32  ;;  %v10974_v14 = vand.u32 4294901760, %v9929_v44  ;;  %v9978_v29 = vsub.f32 %v9931_v9, %v11138_v1  ;;  %v11141_v43 = vand.u32 4294901760, %v9953_v40 }
 0x214   : > { %11135 = vst [vmem:[#allocation74_spill] sm:$0xff] %v9947_v48  ;;  %11137 = vst [vmem:[#allocation76_spill] sm:$0xff] %v9969_v25 }
 0x215   : > { %7772 = vmatpush3.bf16.msra.mxu0 %v9915_v62  ;;  %v9951_v62 = vld [vmem:[#allocation2 + $0x60] sm:$0xff]  ;;  %v9964_v53 = vpack.c.bf16 %v10974_v14, %v10975_v10  ;;  %v10981_v10 = vand.u32 4294901760, %v9971_v17  ;;  %v9996_v1 = vsub.f32 %v9953_v40, %v11141_v43  ;;  %v10013_v43 = vsub.f32 %v9973_v58, %v11143_v39 }
 0x216   : > { %7773 = vmatprep.subr.bf16.mxu0 %v11052_v55  ;;  %v11140_v33 = vand.u32 4294901760, %v9951_v62 }
 0x217   : > { %11136 = vst [vmem:[#allocation75_spill] sm:$0xff] %v9964_v53  ;;  %v10006_v53 = vpack.c.bf16 %v9543_v34, %v9532_v5  ;;  %v10985_v12 = vand.u32 4294901760, %v10013_v43 }
 0x218   : > { %v9991_v38 = vsub.f32 %v9951_v62, %v11140_v33 }
 0x219   : > { %7775 = vmatpush3.bf16.msra.mxu0 %v9947_v48  ;;  %v11139_v48 = vand.u32 4294901760, %v9933_v26  ;;  %11142 = vst [vmem:[#allocation77_spill] sm:$0xff] %v10006_v53 }
 0x21a   : > { %7776 = vmatprep.subr.bf16.mxu0 %v11052_v55  ;;  %v10988_v47 = vand.u32 4294901760, %v9991_v38 }
 0x21b   : > { %v9983_v14 = vsub.f32 %v9933_v26, %v11139_v48  ;;  %v10002_v48 = vsub.f32 %v9971_v17, %v10981_v10  ;;  %v10987_v10 = vand.u32 4294901760, %v9996_v1 }
 0x21d   : > { %7778 = vmatpush3.bf16.msra.mxu0 %v9969_v25  ;;  %v10989_v25 = vand.u32 4294901760, %v9978_v29  ;;  %v10984_v33 = vand.u32 4294901760, %v9983_v14  ;;  %v10986_v5 = vand.u32 4294901760, %v10002_v48  ;;  %v10031_v39 = vpack.c.bf16 %v10987_v10, %v10988_v47  ;;  %v11147_v47 = vld [vmem:[#allocation42_spill] sm:$0xff] }
 0x21e   : > { %7779 = vmatprep.subr.bf16.mxu0 %v11052_v55 }
 0x21f   : > { %v10022_v34 = vpack.c.bf16 %v10984_v33, %v10989_v25  ;;  %v10038_v33 = vpack.c.bf16 %v10985_v12, %v10986_v5  ;;  %v11144_v12 = vand.u32 4294901760, %v9508_v6  ;;  %v11145_v5 = vand.u32 4294901760, %v9513_v28  ;;  %v11148_v6 = vld [vmem:[#allocation44_spill] sm:$0xff]  ;;  %v11150_v28 = vld [vmem:[#allocation49_spill] sm:$0xff] }
 0x220   : > { %v3328_v25 = vld [vmem:[#allocation2 + $0x8] sm:$0xff] }
 0x221   : > { %7781 = vmatpush3.bf16.msra.mxu0 %v10006_v53  ;;  %v10061_v10 = vpack.c.bf16 %v11145_v5, %v11144_v12  ;;  %v11149_v12 = vld [vmem:[#allocation47_spill] sm:$0xff] }
 0x222   : > { %7782 = vmatprep.subr.bf16.mxu0 %v11052_v55  ;;  %v3327_v5 = vld [vmem:[#allocation2] sm:$0xff] }
 0x223   : > { %11146 = vst [vmem:[#allocation78_spill] sm:$0xff] %v10061_v10 }
 0x224   : > { %6583 = vmatmul.mubr.f32.vlgmr.msra.gmra.mrb[2].mxu0 %v9220_v16 }
 0x225   : > { %7784 = vmatpush3.bf16.msra.mxu0 %v9321_v30  ;;  %6617 = vmatprep.mubr.msk.f32.mxu0 %vm8727_vm1, %v11075_v54 }
 0x226   : > { %7785 = vmatprep.subr.bf16.mxu0 %v11052_v55 }
 0x229   : > { %7787 = vmatpush3.bf16.msra.mxu0 %v9678_v2 }
 0x22a   : > { %7788 = vmatprep.subr.bf16.mxu0 %v11052_v55 }
 0x22d   : > { %7790 = vmatpush3.bf16.msra.mxu0 %v9688_v21 }
 0x22e   : > { %7791 = vmatprep.subr.bf16.mxu0 %v11052_v55 }
 0x231   : > { %7793 = vmatpush3.bf16.msra.mxu0 %v9696_v22 }
 0x232   : > { %7794 = vmatprep.subr.bf16.mxu0 %v11052_v55 }
 0x235   : > { %7796 = vmatpush3.bf16.msra.mxu0 %v9704_v59 }
 0x236   : > { %7797 = vmatprep.subr.bf16.mxu0 %v11052_v55 }
 0x239   : > { %7799 = vmatpush3.bf16.msra.mxu0 %v9712_v4 }
 0x23a   : > { %7800 = vmatprep.subr.bf16.mxu0 %v11052_v55 }
 0x23d   : > { %7802 = vmatpush3.bf16.msra.mxu0 %v9720_v3 }
 0x23e   : > { %7803 = vmatprep.subr.bf16.mxu0 %v11052_v55 }
 0x241   : > { %7805 = vmatpush3.bf16.msra.mxu0 %v9728_v24 }
 0x242   : > { %7806 = vmatprep.subr.bf16.mxu0 %v11052_v55 }
 0x244   : > { %6618 = vmatmul.mubr.f32.vlgmr.msra.gmra.mrb[2].mxu0 %v9241_v45 }
 0x245   : > { %7808 = vmatpush3.bf16.msra.mxu0 %v10061_v10  ;;  %6652 = vmatprep.mubr.msk.f32.mxu0 %vm8727_vm1, %v11075_v54  ;;  %v11154_v10 = vand.u32 4294901760, %v9833_v0  ;;  %v11158_v0 = vand.u32 4294901760, %v9889_v51 }
 0x246   : > { %7809 = vmatprep.subr.bf16.mxu0 %v11052_v55 }
 0x249   : > { %7811 = vmatpush3.bf16.msra.mxu0 %v11147_v47  ;;  %v11153_v47 = vand.u32 4294901760, %v9831_v52  ;;  %v11157_v52 = vand.u32 4294901760, %v9887_v15 }
 0x24a   : > { %7812 = vmatprep.subr.bf16.mxu0 %v11052_v55 }
 0x24b   : > { %v10120_v53 = vpack.c.bf16 %v11154_v10, %v11153_v47  ;;  %v10136_v10 = vpack.c.bf16 %v11158_v0, %v11157_v52 }
 0x24d   : > { %7814 = vmatpush3.bf16.msra.mxu0 %v11148_v6 }
 0x24e   : > { %7815 = vmatprep.subr.bf16.mxu0 %v11052_v55 }
 0x251   : > { %7817 = vmatpush3.bf16.msra.mxu0 %v11149_v12  ;;  %v11152_v12 = vand.u32 4294901760, %v9816_v42  ;;  %v11156_v42 = vand.u32 4294901760, %v9857_v27  ;;  %v11159_v27 = vand.u32 4294901760, %v9931_v9  ;;  %v11162_v9 = vand.u32 4294901760, %v9953_v40 }
 0x252   : > { %7818 = vmatprep.subr.bf16.mxu0 %v11052_v55  ;;  %v11163_v40 = vand.u32 4294901760, %v9971_v17 }
 0x255   : > { %7820 = vmatpush3.bf16.msra.mxu0 %v11150_v28  ;;  %v11151_v28 = vand.u32 4294901760, %v9814_v63  ;;  %v11155_v63 = vand.u32 4294901760, %v9855_v36  ;;  %v11160_v36 = vand.u32 4294901760, %v9933_v26 }
 0x256   : > { %7821 = vmatprep.subr.bf16.mxu0 %v11052_v55 }
 0x257   : > { %v10110_v6 = vpack.c.bf16 %v11152_v12, %v11151_v28  ;;  %v10128_v12 = vpack.c.bf16 %v11156_v42, %v11155_v63  ;;  %v10148_v63 = vpack.c.bf16 %v11160_v36, %v11159_v27 }
 0x259   : > { %7823 = vmatpush3.bf16.msra.mxu0 %v9558_v11 }
 0x25a   : > { %7824 = vmatprep.subr.bf16.mxu0 %v11052_v55 }
 0x25d   : > { %7826 = vmatpush3.bf16.msra.mxu0 %v9567_v31  ;;  %v3347_v31 = vand.u32 4294901760, %v3328_v25 }
 0x25e   : > { %7827 = vmatprep.subr.bf16.mxu0 %v11052_v55 }
 0x25f   : > { %v10140_v28 = vsub.f32 %v3328_v25, %v3347_v31 }
 0x261   : > { %7829 = vmatpush3.bf16.msra.mxu0 %v9576_v41  ;;  %v3344_v41 = vand.u32 4294901760, %v3327_v5  ;;  %v10995_v51 = vand.u32 4294901760, %v10140_v28 }
 0x262   : > { %7830 = vmatprep.subr.bf16.mxu0 %v11052_v55 }
 0x263   : > { %v10101_v11 = vpack.c.bf16 %v3347_v31, %v3344_v41  ;;  %v10138_v47 = vsub.f32 %v3327_v5, %v3344_v41  ;;  %v11161_v5 = vand.u32 4294901760, %v9951_v62  ;;  %v3445_v52 = vsub.f32 %v10140_v28, %v10995_v51 }
 0x264   : > { %6653 = vmatmul.mubr.f32.vlgmr.msra.gmra.mrb[2].mxu0 %v9189_v46  ;;  %v11164_v62 = vand.u32 4294901760, %v9973_v58 }
 0x265   : > { %7832 = vmatpush3.bf16.msra.mxu0 %v9321_v30  ;;  %6687 = vmatprep.mubr.msk.f32.mxu0 %vm8727_vm1, %v11075_v54  ;;  %v10996_v15 = vand.u32 4294901760, %v10138_v47  ;;  %v10159_v42 = vpack.c.bf16 %v11162_v9, %v11161_v5  ;;  %v11165_v5 = vand.u32 4294901760, %v9838_v50  ;;  %v11166_v9 = vand.u32 4294901760, %v9843_v56 }
 0x266   : > { %7833 = vmatprep.subr.bf16.mxu0 %v11052_v55  ;;  %v10178_v27 = vpack.c.bf16 %v11164_v62, %v11163_v40  ;;  %v11169_v62 = vand.u32 4294901760, %v9869_v60 }
 0x267   : > { %v3438_v26 = vsub.f32 %v10138_v47, %v10996_v15  ;;  %v3459_v51 = vsub.f32 %v9843_v56, %v11166_v9 }
 0x269   : > { %7835 = vmatpush3.bf16.msra.mxu0 %v9678_v2  ;;  %v3439_v36 = vand.u32 4294901760, %v3438_v26  ;;  %v3460_v15 = vand.u32 4294901760, %v3459_v51 }
 0x26a   : > { %7836 = vmatprep.subr.bf16.mxu0 %v11052_v55 }
 0x26d   : > { %7838 = vmatpush3.bf16.msra.mxu0 %v9688_v21 }
 0x26e   : > { %7839 = vmatprep.subr.bf16.mxu0 %v11052_v55 }
 0x271   : > { %7841 = vmatpush3.bf16.msra.mxu0 %v9696_v22 }
 0x272   : > { %7842 = vmatprep.subr.bf16.mxu0 %v11052_v55 }
 0x275   : > { %7844 = vmatpush3.bf16.msra.mxu0 %v9704_v59 }
 0x276   : > { %7845 = vmatprep.subr.bf16.mxu0 %v11052_v55 }
 0x279   : > { %7847 = vmatpush3.bf16.msra.mxu0 %v9712_v4 }
 0x27a   : > { %7848 = vmatprep.subr.bf16.mxu0 %v11052_v55 }
 0x27d   : > { %7850 = vmatpush3.bf16.msra.mxu0 %v9720_v3  ;;  %v11178_v3 = vld [vmem:[#allocation29_spill] sm:$0xff] }
 0x27e   : > { %7851 = vmatprep.subr.bf16.mxu0 %v11052_v55 }
 0x281   : > { %7853 = vmatpush3.bf16.msra.mxu0 %v9728_v24 }
 0x282   : > { %7998 = vmatprep.subr.bf16.mxu0 %v11052_v55 }
 0x284   : > { %6688 = vmatmul.mubr.f32.vlgmr.msra.gmra.mrb[2].mxu0 %v9189_v46 }
 0x285   : > { %8000 = vmatpush3.bf16.msra.mxu0 %v10101_v11  ;;  %6932 = vmatprep.mubr.msk.f32.mxu0 %vm8727_vm1, %v11075_v54 }
 0x286   : > { %8001 = vmatprep.subr.bf16.mxu0 %v11052_v55 }
 0x289   : > { %8003 = vmatpush3.bf16.msra.mxu0 %v10110_v6 }
 0x28a   : > { %8004 = vmatprep.subr.bf16.mxu0 %v11052_v55 }
 0x28d   : > { %8006 = vmatpush3.bf16.msra.mxu0 %v10120_v53 }
 0x28e   : > { %8007 = vmatprep.subr.bf16.mxu0 %v11052_v55 }
 0x291   : > { %8009 = vmatpush3.bf16.msra.mxu0 %v10128_v12 }
 0x292   : > { %8010 = vmatprep.subr.bf16.mxu0 %v11052_v55 }
 0x295   : > { %8012 = vmatpush3.bf16.msra.mxu0 %v10136_v10 }
 0x296   : > { %8013 = vmatprep.subr.bf16.mxu0 %v11052_v55 }
 0x297   : > { %v1194_v41 = vpop.f32.mrb[0].mxu0 }
 0x298   : > { %v8340_v31 = vadd.f32 %v1194_v41, %v9936_v23  ;;  %v6269_v25 = vpop.f32.mrb[1].mxu0  ;;  %v3446_v41 = vand.u32 4294901760, %v3445_v52  ;;  %v11168_v52 = vand.u32 4294901760, %v9864_v57 }
 0x299   : > { %8015 = vmatpush3.bf16.msra.mxu0 %v10148_v63 }
 0x29a   : > { %v10167_v0 = vand.u32 4294901760, %v8340_v31  ;;  %8016 = vmatprep.subr.bf16.mxu0 %v11052_v55  ;;  %v10193_v17 = vpack.c.bf16 %v3446_v41, %v3439_v36  ;;  %v3466_v40 = vsub.f32 %v9864_v57, %v11168_v52  ;;  %v11170_v36 = vld [vmem:[#allocation23_spill] sm:$0xff] }
 0x29c   : > { %v10171_v23 = vsub.f32 %v8340_v31, %v10167_v0  ;;  %v3452_v31 = vsub.f32 %v9838_v50, %v11165_v5  ;;  %11167 = vst [vmem:[#allocation79_spill] sm:$0xff] %v10193_v17  ;;  %v3473_v5 = vsub.f32 %v9869_v60, %v11169_v62  ;;  %v3467_v41 = vand.u32 4294901760, %v3466_v40 }
 0x29d   : > { %8018 = vmatpush3.bf16.msra.mxu0 %v10159_v42  ;;  %v11172_v62 = vand.u32 4294901760, %v9896_v8 }
 0x29e   : > { %v10181_v25 = vand.u32 4294901760, %v10171_v23  ;;  %8019 = vmatprep.subr.bf16.mxu0 %v11052_v55  ;;  %v3453_v9 = vand.u32 4294901760, %v3452_v31  ;;  %v11173_v31 = vand.u32 4294901760, %v9901_v13 }
 0x29f   : > { %v3480_v51 = vsub.f32 %v9896_v8, %v11172_v62 }
 0x2a0   : > { %v1282_v58 = vsub.f32 %v10171_v23, %v10181_v25  ;;  %v10210_v52 = vpack.c.bf16 %v3460_v15, %v3453_v9  ;;  %v3487_v24 = vsub.f32 %v9901_v13, %v11173_v31  ;;  %v11176_v9 = vand.u32 4294901760, %v9924_v32 }
 0x2a1   : > { %8021 = vmatpush3.bf16.msra.mxu0 %v10178_v27  ;;  %v3481_v40 = vand.u32 4294901760, %v3480_v51  ;;  %v11177_v31 = vand.u32 4294901760, %v9929_v44 }
 0x2a2   : > { %v10195_v26 = vand.u32 4294901760, %v1282_v58  ;;  %8022 = vmatprep.subr.bf16.mxu0 %v11052_v55  ;;  %v3474_v58 = vand.u32 4294901760, %v3473_v5  ;;  %11171 = vst [vmem:[#allocation23_spill] sm:$0xff] %v10210_v52  ;;  %v3488_v5 = vand.u32 4294901760, %v3487_v24  ;;  %v3494_v62 = vsub.f32 %v9924_v32, %v11176_v9 }
 0x2a4   : > { %6303 = vmatmul.mubr.f32.vlgmr.msra.gmra.mrb[2].mxu1 %v10195_v26  ;;  %6933 = vmatmul.mubr.f32.vlgmr.msra.gmra.mrb[4].mxu0 %v9279_v37  ;;  %v10226_v15 = vpack.c.bf16 %v3474_v58, %v3467_v41  ;;  %v11179_v41 = vand.u32 4294901760, %v9978_v29  ;;  %v11180_v58 = vand.u32 4294901760, %v9983_v14  ;;  %v3495_v9 = vand.u32 4294901760, %v3494_v62 }
 0x2a5   : > { %7592 = vmatpush3.bf16.msra.mxu1 %v11170_v36  ;;  %8024 = vmatpush3.bf16.msra.mxu0 %v10193_v17  ;;  %v11174_v36 = vld [vmem:[#allocation27_spill] sm:$0xff]  ;;  %v3501_v17 = vsub.f32 %v9929_v44, %v11177_v31 }
 0x2a6   : > { %7593 = vmatprep.subr.bf16.mxu1 %v11052_v55  ;;  %8025 = vmatprep.subr.bf16.mxu0 %v11052_v55  ;;  %11175 = vst [vmem:[#allocation27_spill] sm:$0xff] %v10226_v15  ;;  %v3508_v24 = vsub.f32 %v9978_v29, %v11179_v41  ;;  %v3515_v51 = vsub.f32 %v9983_v14, %v11180_v58  ;;  %v11182_v41 = vand.u32 4294901760, %v9991_v38 }
 0x2a7   : > { %6337 = vmatprep.mubr.msk.f32.mxu1 %vm8727_vm1, %v11075_v54  ;;  %6967 = vmatprep.mubr.msk.f32.mxu0 %vm8727_vm1, %v11075_v54  ;;  %v3502_v31 = vand.u32 4294901760, %v3501_v17 }
 0x2a8   : > { %v3522_v58 = vsub.f32 %v9991_v38, %v11182_v41 }
 0x2a9   : > { %7595 = vmatpush3.bf16.msra.mxu1 %v11174_v36  ;;  %8027 = vmatpush3.bf16.msra.mxu0 %v10210_v52  ;;  %v10244_v36 = vpack.c.bf16 %v3488_v5, %v3481_v40  ;;  %v11181_v52 = vld [vmem:[#allocation31_spill] sm:$0xff]  ;;  %v10250_v4 = vpack.c.bf16 %v3502_v31, %v3495_v9  ;;  %v11183_v40 = vand.u32 4294901760, %v9996_v1  ;;  %v11184_v5 = vld [vmem:[#allocation33_spill] sm:$0xff]  ;;  %v11186_v31 = vand.u32 4294901760, %v10013_v43 }
 0x2aa   : > { %7596 = vmatprep.subr.bf16.mxu1 %v11052_v55  ;;  %8028 = vmatprep.subr.bf16.mxu0 %v11052_v55  ;;  %v3523_v62 = vand.u32 4294901760, %v3522_v58 }
 0x2ab   : > { %v3529_v17 = vsub.f32 %v9996_v1, %v11183_v40  ;;  %v3543_v41 = vsub.f32 %v10013_v43, %v11186_v31  ;;  %v11187_v40 = vld [vmem:[#allocation36_spill] sm:$0xff] }
 0x2ac   : > { %v11191_v31 = vld [vmem:[#allocation40_spill] sm:$0xff] }
 0x2ad   : > { %7598 = vmatpush3.bf16.msra.mxu1 %v11178_v3  ;;  %8030 = vmatpush3.bf16.msra.mxu0 %v10226_v15  ;;  %v3509_v3 = vand.u32 4294901760, %v3508_v24  ;;  %v3516_v15 = vand.u32 4294901760, %v3515_v51  ;;  %v3530_v24 = vand.u32 4294901760, %v3529_v17  ;;  %v11185_v51 = vand.u32 4294901760, %v10002_v48  ;;  %v11188_v17 = vld [vmem:[#allocation38_spill] sm:$0xff] }
 0x2ae   : > { %7599 = vmatprep.subr.bf16.mxu1 %v11052_v55  ;;  %8031 = vmatprep.subr.bf16.mxu0 %v11052_v55  ;;  %v3544_v58 = vand.u32 4294901760, %v3543_v41  ;;  %v10310_v41 = vpack.c.bf16 %v9869_v60, %v9864_v57  ;;  %v10326_v57 = vpack.c.bf16 %v9929_v44, %v9924_v32  ;;  %v11194_v60 = vld [vmem:[#allocation45_spill] sm:$0xff]  ;;  %v10342_v32 = vpack.c.bf16 %v9996_v1, %v9991_v38  ;;  %v11196_v44 = vld [vmem:[#allocation50_spill] sm:$0xff]  ;;  %v11198_v38 = vld [vmem:[#allocation35_spill] sm:$0xff] }
 0x2af   : > { %v3536_v9 = vsub.f32 %v10002_v48, %v11185_v51  ;;  %v11189_v51 = vld [vmem:[#allocation39_spill] sm:$0xff]  ;;  %v11199_v1 = vand.u32 4294901760, %v10138_v47 }
 0x2b1   : > { %7601 = vmatpush3.bf16.msra.mxu1 %v11181_v52  ;;  %8033 = vmatpush3.bf16.msra.mxu0 %v10244_v36  ;;  %v10262_v52 = vpack.c.bf16 %v3516_v15, %v3509_v3  ;;  %v10274_v15 = vpack.c.bf16 %v3530_v24, %v3523_v62  ;;  %v3537_v3 = vand.u32 4294901760, %v3536_v9  ;;  %v10286_v62 = vpack.c.bf16 %v10140_v28, %v10138_v47  ;;  %v11190_v24 = vld [vmem:[#allocation24_spill] sm:$0xff]  ;;  %v11202_v47 = vld [vmem:[#allocation25_spill] sm:$0xff] }
 0x2b2   : > { %7602 = vmatprep.subr.bf16.mxu1 %v11052_v55  ;;  %8034 = vmatprep.subr.bf16.mxu0 %v11052_v55  ;;  %v10298_v9 = vpack.c.bf16 %v9843_v56, %v9838_v50  ;;  %v11192_v50 = vld [vmem:[#allocation41_spill] sm:$0xff]  ;;  %v10318_v56 = vpack.c.bf16 %v9901_v13, %v9896_v8  ;;  %v10334_v8 = vpack.c.bf16 %v9983_v14, %v9978_v29  ;;  %v11195_v13 = vld [vmem:[#allocation48_spill] sm:$0xff] }
 0x2b3   : > { %v10350_v14 = vpack.c.bf16 %v10013_v43, %v10002_v48  ;;  %v11197_v29 = vld [vmem:[#allocation52_spill] sm:$0xff]  ;;  %v11200_v48 = vand.u32 4294901760, %v10140_v28  ;;  %v11203_v28 = vld [vmem:[#allocation69_spill] sm:$0xff] }
 0x2b5   : > { %7604 = vmatpush3.bf16.msra.mxu1 %v11184_v5  ;;  %8036 = vmatpush3.bf16.msra.mxu0 %v10250_v4  ;;  %v10280_v5 = vpack.c.bf16 %v3544_v58, %v3537_v3  ;;  %v10396_v43 = vpack.c.bf16 %v11200_v48, %v11199_v1  ;;  %v11201_v3 = vld [vmem:[#allocation57_spill] sm:$0xff]  ;;  %v11204_v58 = vld [vmem:[#allocation26_spill] sm:$0xff]  ;;  %v11218_v48 = vld [vmem:[#allocation63_spill] sm:$0xff] }
 0x2b6   : > { %7605 = vmatprep.subr.bf16.mxu1 %v11052_v55  ;;  %8037 = vmatprep.subr.bf16.mxu0 %v11052_v55  ;;  %v11217_v1 = vld [vmem:[#allocation62_spill] sm:$0xff] }
 0x2b9   : > { %7607 = vmatpush3.bf16.msra.mxu1 %v11187_v40  ;;  %8039 = vmatpush3.bf16.msra.mxu0 %v10262_v52  ;;  %v11193_v40 = vld [vmem:[#allocation43_spill] sm:$0xff] }
 0x2ba   : > { %7608 = vmatprep.subr.bf16.mxu1 %v11052_v55  ;;  %8040 = vmatprep.subr.bf16.mxu0 %v11052_v55 }
 0x2bd   : > { %7610 = vmatpush3.bf16.msra.mxu1 %v11188_v17  ;;  %8042 = vmatpush3.bf16.msra.mxu0 %v10274_v15  ;;  %v11205_v17 = vld [vmem:[#allocation71_spill] sm:$0xff] }
 0x2be   : > { %7611 = vmatprep.subr.bf16.mxu1 %v11052_v55  ;;  %8043 = vmatprep.subr.bf16.mxu0 %v11052_v55 }
 0x2c1   : > { %7613 = vmatpush3.bf16.msra.mxu1 %v11189_v51  ;;  %8045 = vmatpush3.bf16.msra.mxu0 %v10280_v5  ;;  %v11206_v51 = vld [vmem:[#allocation28_spill] sm:$0xff] }
 0x2c2   : > { %7614 = vmatprep.subr.bf16.mxu1 %v11052_v55  ;;  %8046 = vmatprep.subr.bf16.mxu0 %v11052_v55 }
 0x2c4   : > { %6338 = vmatmul.mubr.f32.vlgmr.msra.gmra.mrb[2].mxu1 %v10167_v0  ;;  %6968 = vmatmul.mubr.f32.vlgmr.msra.gmra.mrb[4].mxu0 %v9189_v46 }
 0x2c5   : > { %7616 = vmatpush3.bf16.msra.mxu1 %v11190_v24  ;;  %8048 = vmatpush3.bf16.msra.mxu0 %v10286_v62  ;;  %v11207_v24 = vld [vmem:[#allocation73_spill] sm:$0xff] }
 0x2c6   : > { %7617 = vmatprep.subr.bf16.mxu1 %v11052_v55  ;;  %8049 = vmatprep.subr.bf16.mxu0 %v11052_v55 }
 0x2c7   : > { %6372 = vmatprep.mubr.msk.f32.mxu1 %vm8727_vm1, %v11075_v54  ;;  %7002 = vmatprep.mubr.msk.f32.mxu0 %vm8727_vm1, %v11075_v54 }
 0x2c9   : > { %7619 = vmatpush3.bf16.msra.mxu1 %v11191_v31  ;;  %8051 = vmatpush3.bf16.msra.mxu0 %v10298_v9  ;;  %v11208_v31 = vld [vmem:[#allocation30_spill] sm:$0xff] }
 0x2ca   : > { %7620 = vmatprep.subr.bf16.mxu1 %v11052_v55  ;;  %8052 = vmatprep.subr.bf16.mxu0 %v11052_v55 }
 0x2cd   : > { %7622 = vmatpush3.bf16.msra.mxu1 %v11192_v50  ;;  %8054 = vmatpush3.bf16.msra.mxu0 %v10310_v41  ;;  %v11209_v50 = vld [vmem:[#allocation75_spill] sm:$0xff] }
 0x2ce   : > { %7623 = vmatprep.subr.bf16.mxu1 %v11052_v55  ;;  %8055 = vmatprep.subr.bf16.mxu0 %v11052_v55 }
 0x2d1   : > { %7625 = vmatpush3.bf16.msra.mxu1 %v11193_v40  ;;  %8057 = vmatpush3.bf16.msra.mxu0 %v10318_v56  ;;  %v11210_v40 = vld [vmem:[#allocation32_spill] sm:$0xff] }
 0x2d2   : > { %7626 = vmatprep.subr.bf16.mxu1 %v11052_v55  ;;  %8058 = vmatprep.subr.bf16.mxu0 %v11052_v55 }
 0x2d5   : > { %7628 = vmatpush3.bf16.msra.mxu1 %v11194_v60  ;;  %8060 = vmatpush3.bf16.msra.mxu0 %v10326_v57  ;;  %v11211_v60 = vld [vmem:[#allocation34_spill] sm:$0xff] }
 0x2d6   : > { %7629 = vmatprep.subr.bf16.mxu1 %v11052_v55  ;;  %8061 = vmatprep.subr.bf16.mxu0 %v11052_v55 }
 0x2d9   : > { %7631 = vmatpush3.bf16.msra.mxu1 %v11195_v13  ;;  %8063 = vmatpush3.bf16.msra.mxu0 %v10334_v8  ;;  %v11212_v13 = vld [vmem:[#allocation37_spill] sm:$0xff] }
 0x2da   : > { %7632 = vmatprep.subr.bf16.mxu1 %v11052_v55  ;;  %8064 = vmatprep.subr.bf16.mxu0 %v11052_v55 }
 0x2dd   : > { %7634 = vmatpush3.bf16.msra.mxu1 %v11196_v44  ;;  %8066 = vmatpush3.bf16.msra.mxu0 %v10342_v32 }
 0x2de   : > { %7635 = vmatprep.subr.bf16.mxu1 %v11052_v55  ;;  %8067 = vmatprep.subr.bf16.mxu0 %v11052_v55 }
 0x2e1   : > { %7637 = vmatpush3.bf16.msra.mxu1 %v11197_v29  ;;  %8069 = vmatpush3.bf16.msra.mxu0 %v10350_v14  ;;  %v11215_v29 = vld [vmem:[#allocation61_spill] sm:$0xff] }
 0x2e2   : > { %7638 = vmatprep.subr.bf16.mxu1 %v11052_v55  ;;  %8070 = vmatprep.subr.bf16.mxu0 %v11052_v55 }
 0x2e4   : > { %6373 = vmatmul.mubr.f32.vlgmr.msra.gmra.mrb[2].mxu1 %v10171_v23  ;;  %7003 = vmatmul.mubr.f32.vlgmr.msra.gmra.mrb[4].mxu0 %v9220_v16 }
 0x2e5   : > { %7640 = vmatpush3.bf16.msra.mxu1 %v9074_v20  ;;  %8072 = vmatpush3.bf16.msra.mxu0 %v10101_v11 }
 0x2e6   : > { %7641 = vmatprep.subr.bf16.mxu1 %v11052_v55  ;;  %8073 = vmatprep.subr.bf16.mxu0 %v11052_v55 }
 0x2e7   : > { %6407 = vmatprep.mubr.msk.f32.mxu1 %vm8727_vm1, %v11075_v54  ;;  %7037 = vmatprep.mubr.msk.f32.mxu0 %vm8727_vm1, %v11075_v54 }
 0x2e9   : > { %7643 = vmatpush3.bf16.msra.mxu1 %v9154_v7  ;;  %8075 = vmatpush3.bf16.msra.mxu0 %v10110_v6 }
 0x2ea   : > { %7644 = vmatprep.subr.bf16.mxu1 %v11052_v55  ;;  %8076 = vmatprep.subr.bf16.mxu0 %v11052_v55 }
 0x2ed   : > { %7646 = vmatpush3.bf16.msra.mxu1 %v9166_v18  ;;  %8078 = vmatpush3.bf16.msra.mxu0 %v10120_v53 }
 0x2ee   : > { %7647 = vmatprep.subr.bf16.mxu1 %v11052_v55  ;;  %8079 = vmatprep.subr.bf16.mxu0 %v11052_v55 }
 0x2f1   : > { %7649 = vmatpush3.bf16.msra.mxu1 %v9176_v35  ;;  %8081 = vmatpush3.bf16.msra.mxu0 %v10128_v12 }
 0x2f2   : > { %7650 = vmatprep.subr.bf16.mxu1 %v11052_v55  ;;  %8082 = vmatprep.subr.bf16.mxu0 %v11052_v55 }
 0x2f5   : > { %7652 = vmatpush3.bf16.msra.mxu1 %v9205_v61  ;;  %8084 = vmatpush3.bf16.msra.mxu0 %v10136_v10 }
 0x2f6   : > { %7653 = vmatprep.subr.bf16.mxu1 %v11052_v55  ;;  %8085 = vmatprep.subr.bf16.mxu0 %v11052_v55 }
 0x2f9   : > { %7655 = vmatpush3.bf16.msra.mxu1 %v9226_v19  ;;  %8087 = vmatpush3.bf16.msra.mxu0 %v10148_v63 }
 0x2fa   : > { %7656 = vmatprep.subr.bf16.mxu1 %v11052_v55  ;;  %8088 = vmatprep.subr.bf16.mxu0 %v11052_v55 }
 0x2fd   : > { %7658 = vmatpush3.bf16.msra.mxu1 %v9247_v49  ;;  %8090 = vmatpush3.bf16.msra.mxu0 %v10159_v42 }
 0x2fe   : > { %7659 = vmatprep.subr.bf16.mxu1 %v11052_v55  ;;  %8091 = vmatprep.subr.bf16.mxu0 %v11052_v55 }
 0x301   : > { %7661 = vmatpush3.bf16.msra.mxu1 %v11198_v38  ;;  %8093 = vmatpush3.bf16.msra.mxu0 %v10178_v27 }
 0x302   : > { %7662 = vmatprep.subr.bf16.mxu1 %v11052_v55  ;;  %8094 = vmatprep.subr.bf16.mxu0 %v11052_v55 }
 0x304   : > { %6408 = vmatmul.mubr.f32.vlgmr.msra.gmra.mrb[2].mxu1 %v10181_v25  ;;  %7038 = vmatmul.mubr.f32.vlgmr.msra.gmra.mrb[4].mxu0 %v9241_v45 }
 0x305   : > { %7664 = vmatpush3.bf16.msra.mxu1 %v11201_v3  ;;  %8096 = vmatpush3.bf16.msra.mxu0 %v10396_v43  ;;  %v11219_v3 = vld [vmem:[#allocation46_spill] sm:$0xff] }
 0x306   : > { %7665 = vmatprep.subr.bf16.mxu1 %v11052_v55  ;;  %8097 = vmatprep.subr.bf16.mxu0 %v11052_v55 }
 0x307   : > { %6442 = vmatprep.mubr.msk.f32.mxu1 %vm8727_vm1, %v11075_v54  ;;  %7072 = vmatprep.mubr.msk.f32.mxu0 %vm8727_vm1, %v11075_v54 }
 0x309   : > { %7667 = vmatpush3.bf16.msra.mxu1 %v11202_v47  ;;  %8099 = vmatpush3.bf16.msra.mxu0 %v11203_v28  ;;  %v11220_v47 = vld [vmem:[#allocation51_spill] sm:$0xff] }
 0x30a   : > { %7668 = vmatprep.subr.bf16.mxu1 %v11052_v55  ;;  %8100 = vmatprep.subr.bf16.mxu0 %v11052_v55 }
 0x30d   : > { %7670 = vmatpush3.bf16.msra.mxu1 %v11204_v58  ;;  %8102 = vmatpush3.bf16.msra.mxu0 %v11205_v17  ;;  %v11221_v58 = vld [vmem:[#allocation64_spill] sm:$0xff] }
 0x30e   : > { %7671 = vmatprep.subr.bf16.mxu1 %v11052_v55  ;;  %8103 = vmatprep.subr.bf16.mxu0 %v11052_v55 }
 0x311   : > { %7673 = vmatpush3.bf16.msra.mxu1 %v11206_v51  ;;  %8105 = vmatpush3.bf16.msra.mxu0 %v11207_v24  ;;  %v11222_v51 = vld [vmem:[#allocation65_spill] sm:$0xff] }
 0x312   : > { %7674 = vmatprep.subr.bf16.mxu1 %v11052_v55  ;;  %8106 = vmatprep.subr.bf16.mxu0 %v11052_v55 }
 0x315   : > { %7676 = vmatpush3.bf16.msra.mxu1 %v11208_v31  ;;  %8108 = vmatpush3.bf16.msra.mxu0 %v11209_v50  ;;  %v11223_v31 = vld [vmem:[#allocation66_spill] sm:$0xff] }
 0x316   : > { %7677 = vmatprep.subr.bf16.mxu1 %v11052_v55  ;;  %8109 = vmatprep.subr.bf16.mxu0 %v11052_v55 }
 0x319   : > { %7679 = vmatpush3.bf16.msra.mxu1 %v11210_v40  ;;  %8111 = vmatpush3.bf16.msra.mxu0 %v10022_v34  ;;  %v11224_v40 = vld [vmem:[#allocation58_spill] sm:$0xff] }
 0x31a   : > { %7680 = vmatprep.subr.bf16.mxu1 %v11052_v55  ;;  %8112 = vmatprep.subr.bf16.mxu0 %v11052_v55 }
 0x31d   : > { %7682 = vmatpush3.bf16.msra.mxu1 %v11211_v60  ;;  %8114 = vmatpush3.bf16.msra.mxu0 %v10031_v39  ;;  %v11225_v60 = vld [vmem:[#allocation67_spill] sm:$0xff] }
 0x31e   : > { %7683 = vmatprep.subr.bf16.mxu1 %v11052_v55  ;;  %8115 = vmatprep.subr.bf16.mxu0 %v11052_v55 }
 0x321   : > { %7685 = vmatpush3.bf16.msra.mxu1 %v11212_v13  ;;  %8117 = vmatpush3.bf16.msra.mxu0 %v10038_v33  ;;  %v11226_v13 = vld [vmem:[#allocation68_spill] sm:$0xff] }
 0x322   : > { %7686 = vmatprep.subr.bf16.mxu1 %v11052_v55  ;;  %8118 = vmatprep.subr.bf16.mxu0 %v11052_v55 }
 0x324   : > { %6443 = vmatmul.mubr.f32.vlgmr.msra.gmra.mrb[2].mxu1 %v10167_v0  ;;  %7073 = vmatmul.mubr.f32.vlgmr.msra.gmra.mrb[4].mxu0 %v9189_v46 }
 0x325   : > { %7688 = vmatpush3.bf16.msra.mxu1 %v9074_v20  ;;  %8120 = vmatpush3.bf16.msra.mxu0 %v10101_v11  ;;  %v8296_v20 = vpack.c.bf16 %v10195_v26, %v9279_v37  ;;  %v11214_v37 = vld [vmem:[#allocation60_spill] sm:$0xff] }
 0x326   : > { %7689 = vmatprep.subr.bf16.mxu1 %v11052_v55  ;;  %8121 = vmatprep.subr.bf16.mxu0 %v11052_v55 }
 0x327   : > { %6477 = vmatprep.mubr.msk.f32.mxu1 %vm8727_vm1, %v11075_v54  ;;  %7107 = vmatprep.mubr.msk.f32.mxu0 %vm8727_vm1, %v11075_v54 }
 0x329   : > { %7691 = vmatpush3.bf16.msra.mxu1 %v9154_v7  ;;  %8123 = vmatpush3.bf16.msra.mxu0 %v10110_v6 }
 0x32a   : > { %7692 = vmatprep.subr.bf16.mxu1 %v11052_v55  ;;  %8124 = vmatprep.subr.bf16.mxu0 %v11052_v55 }
 0x32d   : > { %7694 = vmatpush3.bf16.msra.mxu1 %v9166_v18  ;;  %8126 = vmatpush3.bf16.msra.mxu0 %v10120_v53 }
 0x32e   : > { %7695 = vmatprep.subr.bf16.mxu1 %v11052_v55  ;;  %8127 = vmatprep.subr.bf16.mxu0 %v11052_v55 }
 0x331   : > { %7697 = vmatpush3.bf16.msra.mxu1 %v9176_v35  ;;  %8129 = vmatpush3.bf16.msra.mxu0 %v10128_v12 }
 0x332   : > { %7698 = vmatprep.subr.bf16.mxu1 %v11052_v55  ;;  %8130 = vmatprep.subr.bf16.mxu0 %v11052_v55 }
 0x335   : > { %7700 = vmatpush3.bf16.msra.mxu1 %v9205_v61  ;;  %8132 = vmatpush3.bf16.msra.mxu0 %v10136_v10  ;;  %v11213_v61 = vld [vmem:[#allocation59_spill] sm:$0xff] }
 0x336   : > { %7701 = vmatprep.subr.bf16.mxu1 %v11052_v55  ;;  %8133 = vmatprep.subr.bf16.mxu0 %v11052_v55 }
 0x339   : > { %7703 = vmatpush3.bf16.msra.mxu1 %v9226_v19  ;;  %8135 = vmatpush3.bf16.msra.mxu0 %v10148_v63 }
 0x33a   : > { %7704 = vmatprep.subr.bf16.mxu1 %v11052_v55  ;;  %8136 = vmatprep.subr.bf16.mxu0 %v11052_v55 }
 0x33d   : > { %7706 = vmatpush3.bf16.msra.mxu1 %v9247_v49  ;;  %8138 = vmatpush3.bf16.msra.mxu0 %v10159_v42 }
 0x33e   : > { %7707 = vmatprep.subr.bf16.mxu1 %v11052_v55  ;;  %8139 = vmatprep.subr.bf16.mxu0 %v11052_v55 }
 0x341   : > { %7709 = vmatpush3.bf16.msra.mxu1 %v11198_v38  ;;  %8141 = vmatpush3.bf16.msra.mxu0 %v10178_v27  ;;  %v11216_v38 = vld [vmem:[#allocation55_spill] sm:$0xff] }
 0x342   : > { %7854 = vmatprep.subr.bf16.mxu1 %v11052_v55  ;;  %8295 = vmatprep.subr.bf16.mxu0 %v11052_v55 }
 0x344   : > { %6478 = vmatmul.mubr.f32.vlgmr.msra.gmra.mrb[2].mxu1 %v10167_v0  ;;  %7108 = vmatmul.mubr.f32.vlgmr.msra.gmra.mrb[4].mxu0 %v9189_v46 }
 0x345   : > { %7856 = vmatpush3.bf16.msra.mxu1 %v9321_v30  ;;  %8297 = vmatpush3.bf16.msra.mxu0 %v8296_v20  ;;  %v11227_v20 = vld [vmem:[#allocation70_spill] sm:$0xff] }
 0x346   : > { %7857 = vmatprep.subr.bf16.mxu1 %v11052_v55  ;;  %6722 = vmatprep.mubr.msk.f32.mxu1 %vm8727_vm1, %v11075_v54 }
 0x347   : > { %8298 = vmatprep.subr.bf16.mxu0 %v11052_v55  ;;  %7351 = vmatprep.mubr.msk.f32.mxu0 %vm8727_vm1, %v11075_v54 }
 0x349   : > { %7859 = vmatpush3.bf16.msra.mxu1 %v9678_v2 }
 0x34a   : > { %7860 = vmatprep.subr.bf16.mxu1 %v11052_v55 }
 0x34d   : > { %7862 = vmatpush3.bf16.msra.mxu1 %v9688_v21 }
 0x34e   : > { %7863 = vmatprep.subr.bf16.mxu1 %v11052_v55 }
 0x351   : > { %7865 = vmatpush3.bf16.msra.mxu1 %v9696_v22 }
 0x352   : > { %7866 = vmatprep.subr.bf16.mxu1 %v11052_v55 }
 0x355   : > { %7868 = vmatpush3.bf16.msra.mxu1 %v9704_v59 }
 0x356   : > { %7869 = vmatprep.subr.bf16.mxu1 %v11052_v55 }
 0x357   : > { %v2587_v7 = vpop.f32.mrb[2].mxu0 }
 0x358   : > { %v10495_v18 = vand.u32 4294901760, %v2587_v7  ;;  %v6689_v35 = vpop.f32.mrb[3].mxu0 }
 0x359   : > { %7871 = vmatpush3.bf16.msra.mxu1 %v11213_v61  ;;  %v11229_v35 = vld [vmem:[#allocation74_spill] sm:$0xff] }
 0x35a   : > { %v10499_v19 = vsub.f32 %v2587_v7, %v10495_v18  ;;  %7872 = vmatprep.subr.bf16.mxu1 %v11052_v55  ;;  %v11228_v7 = vld [vmem:[#allocation72_spill] sm:$0xff] }
 0x35c   : > { %v10503_v49 = vand.u32 4294901760, %v10499_v19 }
 0x35d   : > { %7874 = vmatpush3.bf16.msra.mxu1 %v11214_v37 }
 0x35e   : > { %7875 = vmatprep.subr.bf16.mxu1 %v11052_v55  ;;  %v2675_v26 = vsub.f32 %v10499_v19, %v10503_v49 }
 0x360   : > { %v10509_v44 = vand.u32 4294901760, %v2675_v26  ;;  %v11230_v26 = vld [vmem:[#allocation76_spill] sm:$0xff] }
 0x361   : > { %7877 = vmatpush3.bf16.msra.mxu1 %v11215_v29 }
 0x362   : > { %7878 = vmatprep.subr.bf16.mxu1 %v11052_v55 }
 0x364   : > { %6723 = vmatmul.mubr.f32.vlgmr.msra.gmra.mrb[4].mxu1 %v10509_v44 }
 0x365   : > { %7880 = vmatpush3.bf16.msra.mxu1 %v11216_v38  ;;  %6757 = vmatprep.mubr.msk.f32.mxu1 %vm8727_vm1, %v11075_v54  ;;  %v11231_v38 = vld [vmem:[#allocation77_spill] sm:$0xff] }
 0x366   : > { %7881 = vmatprep.subr.bf16.mxu1 %v11052_v55 }
 0x369   : > { %7883 = vmatpush3.bf16.msra.mxu1 %v11217_v1  ;;  %v11232_v1 = vld [vmem:[#allocation78_spill] sm:$0xff] }
 0x36a   : > { %7884 = vmatprep.subr.bf16.mxu1 %v11052_v55 }
 0x36d   : > { %7886 = vmatpush3.bf16.msra.mxu1 %v11218_v48  ;;  %v11233_v48 = vld [vmem:[#allocation42_spill] sm:$0xff] }
 0x36e   : > { %7887 = vmatprep.subr.bf16.mxu1 %v11052_v55 }
 0x371   : > { %7889 = vmatpush3.bf16.msra.mxu1 %v11219_v3  ;;  %v11234_v3 = vld [vmem:[#allocation44_spill] sm:$0xff] }
 0x372   : > { %7890 = vmatprep.subr.bf16.mxu1 %v11052_v55 }
 0x375   : > { %7892 = vmatpush3.bf16.msra.mxu1 %v11220_v47  ;;  %v11235_v47 = vld [vmem:[#allocation47_spill] sm:$0xff] }
 0x376   : > { %7893 = vmatprep.subr.bf16.mxu1 %v11052_v55 }
 0x379   : > { %7895 = vmatpush3.bf16.msra.mxu1 %v11221_v58  ;;  %v11236_v58 = vld [vmem:[#allocation49_spill] sm:$0xff] }
 0x37a   : > { %7896 = vmatprep.subr.bf16.mxu1 %v11052_v55 }
 0x37d   : > { %7898 = vmatpush3.bf16.msra.mxu1 %v11222_v51  ;;  %v11237_v51 = vld [vmem:[#allocation53_spill] sm:$0xff] }
 0x37e   : > { %7899 = vmatprep.subr.bf16.mxu1 %v11052_v55 }
 0x381   : > { %7901 = vmatpush3.bf16.msra.mxu1 %v11223_v31  ;;  %v11238_v31 = vld [vmem:[#allocation54_spill] sm:$0xff] }
 0x382   : > { %7902 = vmatprep.subr.bf16.mxu1 %v11052_v55 }
 0x384   : > { %6758 = vmatmul.mubr.f32.vlgmr.msra.gmra.mrb[4].mxu1 %v10495_v18 }
 0x385   : > { %7904 = vmatpush3.bf16.msra.mxu1 %v11224_v40  ;;  %6792 = vmatprep.mubr.msk.f32.mxu1 %vm8727_vm1, %v11075_v54  ;;  %v11239_v40 = vld [vmem:[#allocation56_spill] sm:$0xff] }
 0x386   : > { %7905 = vmatprep.subr.bf16.mxu1 %v11052_v55 }
 0x389   : > { %7907 = vmatpush3.bf16.msra.mxu1 %v11225_v60 }
 0x38a   : > { %7908 = vmatprep.subr.bf16.mxu1 %v11052_v55 }
 0x38d   : > { %7910 = vmatpush3.bf16.msra.mxu1 %v11226_v13 }
 0x38e   : > { %7911 = vmatprep.subr.bf16.mxu1 %v11052_v55 }
 0x391   : > { %7913 = vmatpush3.bf16.msra.mxu1 %v11227_v20 }
 0x392   : > { %7914 = vmatprep.subr.bf16.mxu1 %v11052_v55 }
 0x395   : > { %7916 = vmatpush3.bf16.msra.mxu1 %v11228_v7 }
 0x396   : > { %7917 = vmatprep.subr.bf16.mxu1 %v11052_v55 }
 0x399   : > { %7919 = vmatpush3.bf16.msra.mxu1 %v11229_v35 }
 0x39a   : > { %7920 = vmatprep.subr.bf16.mxu1 %v11052_v55 }
 0x39d   : > { %7922 = vmatpush3.bf16.msra.mxu1 %v11230_v26 }
 0x39e   : > { %7923 = vmatprep.subr.bf16.mxu1 %v11052_v55 }
 0x3a1   : > { %7925 = vmatpush3.bf16.msra.mxu1 %v11231_v38 }
 0x3a2   : > { %7926 = vmatprep.subr.bf16.mxu1 %v11052_v55 }
 0x3a4   : > { %6793 = vmatmul.mubr.f32.vlgmr.msra.gmra.mrb[4].mxu1 %v10499_v19 }
 0x3a5   : > { %7928 = vmatpush3.bf16.msra.mxu1 %v9321_v30  ;;  %6827 = vmatprep.mubr.msk.f32.mxu1 %vm8727_vm1, %v11075_v54 }
 0x3a6   : > { %7929 = vmatprep.subr.bf16.mxu1 %v11052_v55 }
 0x3a9   : > { %7931 = vmatpush3.bf16.msra.mxu1 %v9678_v2 }
 0x3aa   : > { %7932 = vmatprep.subr.bf16.mxu1 %v11052_v55 }
 0x3ad   : > { %7934 = vmatpush3.bf16.msra.mxu1 %v9688_v21 }
 0x3ae   : > { %7935 = vmatprep.subr.bf16.mxu1 %v11052_v55 }
 0x3b1   : > { %7937 = vmatpush3.bf16.msra.mxu1 %v9696_v22 }
 0x3b2   : > { %7938 = vmatprep.subr.bf16.mxu1 %v11052_v55 }
 0x3b5   : > { %7940 = vmatpush3.bf16.msra.mxu1 %v9704_v59 }
 0x3b6   : > { %7941 = vmatprep.subr.bf16.mxu1 %v11052_v55 }
 0x3b9   : > { %7943 = vmatpush3.bf16.msra.mxu1 %v11213_v61 }
 0x3ba   : > { %7944 = vmatprep.subr.bf16.mxu1 %v11052_v55 }
 0x3bd   : > { %7946 = vmatpush3.bf16.msra.mxu1 %v11214_v37 }
 0x3be   : > { %7947 = vmatprep.subr.bf16.mxu1 %v11052_v55 }
 0x3c1   : > { %7949 = vmatpush3.bf16.msra.mxu1 %v11215_v29 }
 0x3c2   : > { %7950 = vmatprep.subr.bf16.mxu1 %v11052_v55 }
 0x3c4   : > { %6828 = vmatmul.mubr.f32.vlgmr.msra.gmra.mrb[4].mxu1 %v10503_v49 }
 0x3c5   : > { %7952 = vmatpush3.bf16.msra.mxu1 %v11232_v1  ;;  %6862 = vmatprep.mubr.msk.f32.mxu1 %vm8727_vm1, %v11075_v54  ;;  %v11240_v1 = vld [vmem:[#allocation79_spill] sm:$0xff] }
 0x3c6   : > { %7953 = vmatprep.subr.bf16.mxu1 %v11052_v55 }
 0x3c9   : > { %7955 = vmatpush3.bf16.msra.mxu1 %v11233_v48  ;;  %v11241_v48 = vld [vmem:[#allocation23_spill] sm:$0xff] }
 0x3ca   : > { %7956 = vmatprep.subr.bf16.mxu1 %v11052_v55 }
 0x3cd   : > { %7958 = vmatpush3.bf16.msra.mxu1 %v11234_v3  ;;  %v11242_v3 = vld [vmem:[#allocation27_spill] sm:$0xff] }
 0x3ce   : > { %7959 = vmatprep.subr.bf16.mxu1 %v11052_v55 }
 0x3d1   : > { %7961 = vmatpush3.bf16.msra.mxu1 %v11235_v47 }
 0x3d2   : > { %7962 = vmatprep.subr.bf16.mxu1 %v11052_v55 }
 0x3d5   : > { %7964 = vmatpush3.bf16.msra.mxu1 %v11236_v58 }
 0x3d6   : > { %7965 = vmatprep.subr.bf16.mxu1 %v11052_v55 }
 0x3d9   : > { %7967 = vmatpush3.bf16.msra.mxu1 %v11237_v51 }
 0x3da   : > { %7968 = vmatprep.subr.bf16.mxu1 %v11052_v55 }
 0x3dd   : > { %7970 = vmatpush3.bf16.msra.mxu1 %v11238_v31 }
 0x3de   : > { %7971 = vmatprep.subr.bf16.mxu1 %v11052_v55 }
 0x3e1   : > { %7973 = vmatpush3.bf16.msra.mxu1 %v11239_v40 }
 0x3e2   : > { %7974 = vmatprep.subr.bf16.mxu1 %v11052_v55 }
 0x3e4   : > { %6863 = vmatmul.mubr.f32.vlgmr.msra.gmra.mrb[4].mxu1 %v10495_v18 }
 0x3e5   : > { %7976 = vmatpush3.bf16.msra.mxu1 %v9321_v30  ;;  %6897 = vmatprep.mubr.msk.f32.mxu1 %vm8727_vm1, %v11075_v54 }
 0x3e6   : > { %7977 = vmatprep.subr.bf16.mxu1 %v11052_v55 }
 0x3e9   : > { %7979 = vmatpush3.bf16.msra.mxu1 %v9678_v2 }
 0x3ea   : > { %7980 = vmatprep.subr.bf16.mxu1 %v11052_v55 }
 0x3ed   : > { %7982 = vmatpush3.bf16.msra.mxu1 %v9688_v21 }
 0x3ee   : > { %7983 = vmatprep.subr.bf16.mxu1 %v11052_v55 }
 0x3f1   : > { %7985 = vmatpush3.bf16.msra.mxu1 %v9696_v22 }
 0x3f2   : > { %7986 = vmatprep.subr.bf16.mxu1 %v11052_v55 }
 0x3f5   : > { %7988 = vmatpush3.bf16.msra.mxu1 %v9704_v59 }
 0x3f6   : > { %7989 = vmatprep.subr.bf16.mxu1 %v11052_v55 }
 0x3f9   : > { %7991 = vmatpush3.bf16.msra.mxu1 %v11213_v61 }
 0x3fa   : > { %7992 = vmatprep.subr.bf16.mxu1 %v11052_v55 }
 0x3fd   : > { %7994 = vmatpush3.bf16.msra.mxu1 %v11214_v37 }
 0x3fe   : > { %7995 = vmatprep.subr.bf16.mxu1 %v11052_v55 }
 0x401   : > { %7997 = vmatpush3.bf16.msra.mxu1 %v11215_v29 }
 0x402   : > { %8142 = vmatprep.subr.bf16.mxu1 %v11052_v55 }
 0x404   : > { %6898 = vmatmul.mubr.f32.vlgmr.msra.gmra.mrb[4].mxu1 %v10495_v18 }
 0x405   : > { %8144 = vmatpush3.bf16.msra.mxu1 %v10101_v11  ;;  %7142 = vmatprep.mubr.msk.f32.mxu1 %vm8727_vm1, %v11075_v54 }
 0x406   : > { %8145 = vmatprep.subr.bf16.mxu1 %v11052_v55 }
 0x409   : > { %8147 = vmatpush3.bf16.msra.mxu1 %v10110_v6 }
 0x40a   : > { %8148 = vmatprep.subr.bf16.mxu1 %v11052_v55 }
 0x40d   : > { %8150 = vmatpush3.bf16.msra.mxu1 %v10120_v53 }
 0x40e   : > { %8151 = vmatprep.subr.bf16.mxu1 %v11052_v55 }
 0x411   : > { %8153 = vmatpush3.bf16.msra.mxu1 %v10128_v12 }
 0x412   : > { %8154 = vmatprep.subr.bf16.mxu1 %v11052_v55 }
 0x415   : > { %8156 = vmatpush3.bf16.msra.mxu1 %v10136_v10 }
 0x416   : > { %8157 = vmatprep.subr.bf16.mxu1 %v11052_v55 }
 0x417   : > { %v10621_v30 = vpop.f32.mrb[2].mxu1  ;;  %v3980_v2 = vpop.f32.mrb[4].mxu0 }
 0x418   : > { %v4641_v21 = vand.u32 4294901760, %v10621_v30  ;;  %v6479_v22 = vpop.f32.mrb[3].mxu1  ;;  %v10624_v59 = vand.u32 4294901760, %v3980_v2  ;;  %v7109_v61 = vpop.f32.mrb[5].mxu0 }
 0x419   : > { %8159 = vmatpush3.bf16.msra.mxu1 %v10148_v63 }
 0x41a   : > { %v10630_v37 = vsub.f32 %v10621_v30, %v4641_v21  ;;  %v10633_v29 = vsub.f32 %v3980_v2, %v10624_v59  ;;  %8160 = vmatprep.subr.bf16.mxu1 %v11052_v55 }
 0x41c   : > { %v4733_v60 = vand.u32 4294901760, %v10630_v37  ;;  %v10638_v13 = vand.u32 4294901760, %v10633_v29 }
 0x41d   : > { %8162 = vmatpush3.bf16.msra.mxu1 %v10159_v42 }
 0x41e   : > { %v4734_v20 = vsub.f32 %v10630_v37, %v4733_v60  ;;  %8163 = vmatprep.subr.bf16.mxu1 %v11052_v55  ;;  %v4068_v7 = vsub.f32 %v10633_v29, %v10638_v13 }
 0x420   : > { %v4735_v35 = vand.u32 4294901760, %v4734_v20  ;;  %v10647_v26 = vand.u32 4294901760, %v4068_v7 }
 0x421   : > { %8165 = vmatpush3.bf16.msra.mxu1 %v10178_v27 }
 0x422   : > { %8166 = vmatprep.subr.bf16.mxu1 %v11052_v55  ;;  %v8299_v38 = vpack.c.bf16 %v10509_v44, %v4735_v35 }
 0x424   : > { %7143 = vmatmul.mubr.f32.vlgmr.msra.gmra.mrb[6].mxu1 %v10647_v26  ;;  %8300 = vmatpush3.bf16.msra.mxu0 %v8299_v38 }
 0x425   : > { %8168 = vmatpush3.bf16.msra.mxu1 %v11240_v1  ;;  %7177 = vmatprep.mubr.msk.f32.mxu1 %vm8727_vm1, %v11075_v54 }
 0x426   : > { %8169 = vmatprep.subr.bf16.mxu1 %v11052_v55  ;;  %8301 = vmatprep.subr.bf16.mxu0 %v11052_v55 }
 0x429   : > { %8171 = vmatpush3.bf16.msra.mxu1 %v11241_v48 }
 0x42a   : > { %8172 = vmatprep.subr.bf16.mxu1 %v11052_v55 }
 0x42d   : > { %8174 = vmatpush3.bf16.msra.mxu1 %v11242_v3 }
 0x42e   : > { %8175 = vmatprep.subr.bf16.mxu1 %v11052_v55 }
 0x431   : > { %8177 = vmatpush3.bf16.msra.mxu1 %v10244_v36 }
 0x432   : > { %8178 = vmatprep.subr.bf16.mxu1 %v11052_v55 }
 0x435   : > { %8180 = vmatpush3.bf16.msra.mxu1 %v10250_v4  ;;  %v10760_v4 = vpack.c.bf16 %v10495_v18, %v4641_v21 }
 0x436   : > { %8181 = vmatprep.subr.bf16.mxu1 %v11052_v55 }
 0x439   : > { %8183 = vmatpush3.bf16.msra.mxu1 %v10262_v52 }
 0x43a   : > { %8184 = vmatprep.subr.bf16.mxu1 %v11052_v55 }
 0x43d   : > { %8186 = vmatpush3.bf16.msra.mxu1 %v10274_v15 }
 0x43e   : > { %8187 = vmatprep.subr.bf16.mxu1 %v11052_v55 }
 0x441   : > { %8189 = vmatpush3.bf16.msra.mxu1 %v10280_v5 }
 0x442   : > { %8190 = vmatprep.subr.bf16.mxu1 %v11052_v55 }
 0x444   : > { %7178 = vmatmul.mubr.f32.vlgmr.msra.gmra.mrb[6].mxu1 %v10624_v59 }
 0x445   : > { %8192 = vmatpush3.bf16.msra.mxu1 %v10286_v62  ;;  %7212 = vmatprep.mubr.msk.f32.mxu1 %vm8727_vm1, %v11075_v54 }
 0x446   : > { %8193 = vmatprep.subr.bf16.mxu1 %v11052_v55 }
 0x449   : > { %8195 = vmatpush3.bf16.msra.mxu1 %v10298_v9 }
 0x44a   : > { %8196 = vmatprep.subr.bf16.mxu1 %v11052_v55 }
 0x44d   : > { %8198 = vmatpush3.bf16.msra.mxu1 %v10310_v41 }
 0x44e   : > { %8199 = vmatprep.subr.bf16.mxu1 %v11052_v55 }
 0x451   : > { %8201 = vmatpush3.bf16.msra.mxu1 %v10318_v56 }
 0x452   : > { %8202 = vmatprep.subr.bf16.mxu1 %v11052_v55 }
 0x455   : > { %8204 = vmatpush3.bf16.msra.mxu1 %v10326_v57 }
 0x456   : > { %8205 = vmatprep.subr.bf16.mxu1 %v11052_v55 }
 0x459   : > { %8207 = vmatpush3.bf16.msra.mxu1 %v10334_v8 }
 0x45a   : > { %8208 = vmatprep.subr.bf16.mxu1 %v11052_v55 }
 0x45d   : > { %8210 = vmatpush3.bf16.msra.mxu1 %v10342_v32 }
 0x45e   : > { %8211 = vmatprep.subr.bf16.mxu1 %v11052_v55 }
 0x461   : > { %8213 = vmatpush3.bf16.msra.mxu1 %v10350_v14 }
 0x462   : > { %8214 = vmatprep.subr.bf16.mxu1 %v11052_v55 }
 0x464   : > { %7213 = vmatmul.mubr.f32.vlgmr.msra.gmra.mrb[6].mxu1 %v10633_v29 }
 0x465   : > { %8216 = vmatpush3.bf16.msra.mxu1 %v10101_v11  ;;  %7247 = vmatprep.mubr.msk.f32.mxu1 %vm8727_vm1, %v11075_v54 }
 0x466   : > { %8217 = vmatprep.subr.bf16.mxu1 %v11052_v55 }
 0x469   : > { %8219 = vmatpush3.bf16.msra.mxu1 %v10110_v6 }
 0x46a   : > { %8220 = vmatprep.subr.bf16.mxu1 %v11052_v55 }
 0x46d   : > { %8222 = vmatpush3.bf16.msra.mxu1 %v10120_v53 }
 0x46e   : > { %8223 = vmatprep.subr.bf16.mxu1 %v11052_v55 }
 0x471   : > { %8225 = vmatpush3.bf16.msra.mxu1 %v10128_v12 }
 0x472   : > { %8226 = vmatprep.subr.bf16.mxu1 %v11052_v55 }
 0x475   : > { %8228 = vmatpush3.bf16.msra.mxu1 %v10136_v10 }
 0x476   : > { %8229 = vmatprep.subr.bf16.mxu1 %v11052_v55 }
 0x479   : > { %8231 = vmatpush3.bf16.msra.mxu1 %v10148_v63 }
 0x47a   : > { %8232 = vmatprep.subr.bf16.mxu1 %v11052_v55 }
 0x47d   : > { %8234 = vmatpush3.bf16.msra.mxu1 %v10159_v42 }
 0x47e   : > { %8235 = vmatprep.subr.bf16.mxu1 %v11052_v55 }
 0x481   : > { %8237 = vmatpush3.bf16.msra.mxu1 %v10178_v27 }
 0x482   : > { %8238 = vmatprep.subr.bf16.mxu1 %v11052_v55 }
 0x484   : > { %7248 = vmatmul.mubr.f32.vlgmr.msra.gmra.mrb[6].mxu1 %v10638_v13 }
 0x485   : > { %8240 = vmatpush3.bf16.msra.mxu1 %v10396_v43  ;;  %7282 = vmatprep.mubr.msk.f32.mxu1 %vm8727_vm1, %v11075_v54 }
 0x486   : > { %8241 = vmatprep.subr.bf16.mxu1 %v11052_v55 }
 0x489   : > { %8243 = vmatpush3.bf16.msra.mxu1 %v11203_v28  ;;  %v8305_v28 = vpack.c.bf16 %v10171_v23, %v9220_v16  ;;  %v8323_v16 = vpack.c.bf16 %v10181_v25, %v9241_v45  ;;  %v8326_v23 = vpack.c.bf16 %v10503_v49, %v4733_v60 }
 0x48a   : > { %8244 = vmatprep.subr.bf16.mxu1 %v11052_v55 }
 0x48d   : > { %8246 = vmatpush3.bf16.msra.mxu1 %v11205_v17  ;;  %v8308_v17 = vpack.c.bf16 %v10499_v19, %v10630_v37 }
 0x48e   : > { %8247 = vmatprep.subr.bf16.mxu1 %v11052_v55 }
 0x491   : > { %8249 = vmatpush3.bf16.msra.mxu1 %v11207_v24 }
 0x492   : > { %8250 = vmatprep.subr.bf16.mxu1 %v11052_v55 }
 0x495   : > { %8252 = vmatpush3.bf16.msra.mxu1 %v11209_v50 }
 0x496   : > { %8253 = vmatprep.subr.bf16.mxu1 %v11052_v55 }
 0x499   : > { %8255 = vmatpush3.bf16.msra.mxu1 %v10022_v34 }
 0x49a   : > { %8256 = vmatprep.subr.bf16.mxu1 %v11052_v55 }
 0x49d   : > { %8258 = vmatpush3.bf16.msra.mxu1 %v10031_v39 }
 0x49e   : > { %8259 = vmatprep.subr.bf16.mxu1 %v11052_v55 }
 0x4a1   : > { %8261 = vmatpush3.bf16.msra.mxu1 %v10038_v33 }
 0x4a2   : > { %8262 = vmatprep.subr.bf16.mxu1 %v11052_v55 }
 0x4a4   : > { %7283 = vmatmul.mubr.f32.vlgmr.msra.gmra.mrb[6].mxu1 %v10624_v59 }
 0x4a5   : > { %8264 = vmatpush3.bf16.msra.mxu1 %v10101_v11  ;;  %7317 = vmatprep.mubr.msk.f32.mxu1 %vm8727_vm1, %v11075_v54  ;;  %v10750_v11 = vpack.c.bf16 %v10167_v0, %v9189_v46  ;;  %v8728_v0 = vmov 0  }
 0x4a6   : > { %8265 = vmatprep.subr.bf16.mxu1 %v11052_v55  ;;  %8499 = vset.pattern.permute.xlu0 %v8728_v0 }
 0x4a9   : > { %8267 = vmatpush3.bf16.msra.mxu1 %v10110_v6 }
 0x4aa   : > { %8268 = vmatprep.subr.bf16.mxu1 %v11052_v55 }
 0x4ad   : > { %8270 = vmatpush3.bf16.msra.mxu1 %v10120_v53 }
 0x4ae   : > { %8271 = vmatprep.subr.bf16.mxu1 %v11052_v55 }
 0x4b1   : > { %8273 = vmatpush3.bf16.msra.mxu1 %v10128_v12 }
 0x4b2   : > { %8274 = vmatprep.subr.bf16.mxu1 %v11052_v55 }
 0x4b5   : > { %8276 = vmatpush3.bf16.msra.mxu1 %v10136_v10 }
 0x4b6   : > { %8277 = vmatprep.subr.bf16.mxu1 %v11052_v55 }
 0x4b9   : > { %8279 = vmatpush3.bf16.msra.mxu1 %v10148_v63 }
 0x4ba   : > { %8280 = vmatprep.subr.bf16.mxu1 %v11052_v55 }
 0x4bd   : > { %8282 = vmatpush3.bf16.msra.mxu1 %v10159_v42  ;;  %v420_v42 = vld [vmem:[%s10883_s5] sm:$0xff] }
 0x4be   : > { %8283 = vmatprep.subr.bf16.mxu1 %v11052_v55  ;;  %4627 = vperm.xlu0 %8499, %v420_v42  }
 0x4c1   : > { %8285 = vmatpush3.bf16.msra.mxu1 %v10178_v27  ;;  %v419_v27 = vld [vmem:[%s10882_s4] sm:$0xff] }
 0x4c2   : > { %8286 = vmatprep.subr.bf16.mxu1 %v11052_v55  ;;  %v4632_v36 = vsel %vm4630_vm9, %v419_v27, 0 }
 0x4c3   : > { %v4706_v52 = vand.u32 4294901760, %v4632_v36 }
 0x4c4   : > { %7318 = vmatmul.mubr.f32.vlgmr.msra.gmra.mrb[6].mxu1 %v10624_v59 }
 0x4c5   : > { %8288 = vmatpush3.bf16.msra.mxu1 %v10750_v11  ;;  %7334 = vmatprep.mubr.msk.f32.mxu1 %vm8727_vm1, %v11075_v54  ;;  %v4707_v15 = vsub.f32 %v4632_v36, %v4706_v52 }
 0x4c6   : > { %8289 = vmatprep.subr.bf16.mxu1 %v11052_v55 }
 0x4c7   : > { %v4708_v5 = vand.u32 4294901760, %v4707_v15 }
 0x4c9   : > { %8291 = vmatpush3.bf16.msra.mxu1 %v10760_v4  ;;  %v4709_v62 = vsub.f32 %v4707_v15, %v4708_v5 }
 0x4ca   : > { %8292 = vmatprep.subr.bf16.mxu1 %v11052_v55 }
 0x4cb   : > { %v4710_v41 = vand.u32 4294901760, %v4709_v62 }
 0x4d7   : > { %v3228_v46 = vpop.f32.mrb[4].mxu1 }
 0x4d8   : > { %v4647_v53 = vand.u32 4294901760, %v3228_v46  ;;  %v6899_v33 = vpop.f32.mrb[5].mxu1 }
 0x4da   : > { %v10765_v34 = vpack.c.bf16 %v10624_v59, %v4647_v53  ;;  %v10767_v39 = vsub.f32 %v3228_v46, %v4647_v53 }
 0x4dc   : > { %v4747_v6 = vand.u32 4294901760, %v10767_v39  ;;  %8294 = vmatpush3.bf16.msra.mxu1 %v10765_v34  ;;  %v8311_v24 = vpack.c.bf16 %v10633_v29, %v10767_v39 }
 0x4dd   : > { %7332 = vmatprep.subr.mxu1 %v11075_v54 }
 0x4de   : > { %v4748_v12 = vsub.f32 %v10767_v39, %v4747_v6  ;;  %v8329_v50 = vpack.c.bf16 %v10638_v13, %v4747_v6 }
 0x4e0   : > { %v4749_v10 = vand.u32 4294901760, %v4748_v12 }
 0x4e2   : > { %v8302_v63 = vpack.c.bf16 %v10647_v26, %v4749_v10 }
 0x4e4   : > { %8303 = vmatpush3.bf16.msra.mxu0 %v8302_v63 }
 0x4e5   : > { %7349 = vmatprep.subr.mxu0 %v11075_v54 }
 0x53d   : > { %v4628_v18 = vpop.permute.xlu0 %4627 }
 0x597   : > { %v4621_v9 = vpop.f32.mrb[6].mxu1 }
 0x598   : > { %v4653_v56 = vand.u32 4294901760, %v4621_v9  ;;  %v7319_v57 = vpop.f32.mrb[7].mxu1 }
 0x59a   : > { %v4760_v8 = vsub.f32 %v4621_v9, %v4653_v56  ;;  %7333 = vmatpush3.msra.mxu1 %v4653_v56 }
 0x59b   : > { %7335 = vmatmul.mubr.f32.vlgmr.msra.gmra.mrb[8].mxu1 %v4710_v41 }
 0x59c   : > { %v4761_v32 = vand.u32 4294901760, %v4760_v8 }
 0x59e   : > { %v4762_v14 = vsub.f32 %v4760_v8, %v4761_v32 }
 0x5a0   : > { %v4763_v43 = vand.u32 4294901760, %v4762_v14 }
 0x5a2   : > { %7350 = vmatpush3.msra.mxu0 %v4763_v43 }
 0x5a3   : > { %8304 = vmatprep.subr.bf16.mxu0 %v11052_v55  ;;  %7352 = vmatmul.mubr.f32.vlgmr.msra.gmra.mrb[6].mxu0 %v4706_v52 }
 0x5a4   : > { %8306 = vmatpush3.bf16.msra.mxu0 %v8305_v28  ;;  %7368 = vmatprep.mubr.msk.f32.mxu0 %vm8727_vm1, %v11075_v54 }
 0x5a5   : > { %8307 = vmatprep.subr.bf16.mxu0 %v11052_v55 }
 0x5a8   : > { %8309 = vmatpush3.bf16.msra.mxu0 %v8308_v17 }
 0x5a9   : > { %8310 = vmatprep.subr.bf16.mxu0 %v11052_v55 }
 0x5ac   : > { %8312 = vmatpush3.bf16.msra.mxu0 %v8311_v24 }
 0x5ad   : > { %7366 = vmatprep.subr.mxu0 %v11075_v54 }
 0x5b0   : > { %7367 = vmatpush3.msra.mxu0 %v4760_v8 }
 0x5b1   : > { %8313 = vmatprep.subr.bf16.mxu0 %v11052_v55  ;;  %7369 = vmatmul.mubr.f32.vlgmr.msra.gmra.mrb[6].mxu0 %v4707_v15 }
 0x5b2   : > { %8315 = vmatpush3.bf16.msra.mxu0 %v10750_v11  ;;  %7385 = vmatprep.mubr.msk.f32.mxu0 %vm8727_vm1, %v11075_v54 }
 0x5b3   : > { %8316 = vmatprep.subr.bf16.mxu0 %v11052_v55 }
 0x5b6   : > { %8318 = vmatpush3.bf16.msra.mxu0 %v10760_v4 }
 0x5b7   : > { %8319 = vmatprep.subr.bf16.mxu0 %v11052_v55 }
 0x5ba   : > { %8321 = vmatpush3.bf16.msra.mxu0 %v10765_v34 }
 0x5bb   : > { %7383 = vmatprep.subr.mxu0 %v11075_v54 }
 0x5be   : > { %7384 = vmatpush3.msra.mxu0 %v4653_v56 }
 0x5bf   : > { %8322 = vmatprep.subr.bf16.mxu0 %v11052_v55  ;;  %7386 = vmatmul.mubr.f32.vlgmr.msra.gmra.mrb[6].mxu0 %v4708_v5 }
 0x5c0   : > { %8324 = vmatpush3.bf16.msra.mxu0 %v8323_v16  ;;  %7402 = vmatprep.mubr.msk.f32.mxu0 %vm8727_vm1, %v11075_v54 }
 0x5c1   : > { %8325 = vmatprep.subr.bf16.mxu0 %v11052_v55 }
 0x5c4   : > { %8327 = vmatpush3.bf16.msra.mxu0 %v8326_v23 }
 0x5c5   : > { %8328 = vmatprep.subr.bf16.mxu0 %v11052_v55 }
 0x5c8   : > { %8330 = vmatpush3.bf16.msra.mxu0 %v8329_v50 }
 0x5c9   : > { %7400 = vmatprep.subr.mxu0 %v11075_v54 }
 0x5cc   : > { %7401 = vmatpush3.msra.mxu0 %v4761_v32 }
 0x5cd   : > { %8331 = vmatprep.subr.bf16.mxu0 %v11052_v55  ;;  %7403 = vmatmul.mubr.f32.vlgmr.msra.gmra.mrb[6].mxu0 %v4706_v52 }
 0x5ce   : > { %8333 = vmatpush3.bf16.msra.mxu0 %v10750_v11  ;;  %7419 = vmatprep.mubr.msk.f32.mxu0 %vm8727_vm1, %v11075_v54 }
 0x5cf   : > { %8334 = vmatprep.subr.bf16.mxu0 %v11052_v55 }
 0x5d2   : > { %8336 = vmatpush3.bf16.msra.mxu0 %v10760_v4 }
 0x5d3   : > { %8337 = vmatprep.subr.bf16.mxu0 %v11052_v55 }
 0x5d6   : > { %8339 = vmatpush3.bf16.msra.mxu0 %v10765_v34 }
 0x5d7   : > { %7417 = vmatprep.subr.mxu0 %v11075_v54 }
 0x5da   : > { %7418 = vmatpush3.msra.mxu0 %v4653_v56 }
 0x5db   : > { %7420 = vmatmul.mubr.f32.vlgmr.msra.gmra.mrb[6].mxu0 %v4706_v52 }
 0x66e   : > { %v4712_v45 = vpop.f32.mrb[8].mxu1 }
 0x66f   : > { %v7336_v25 = vpop.f32.mrb[9].mxu1  ;;  %v4713_v19 = vadd.f32 %v4712_v45, %v4628_v18 }
 0x6ae   : > { %v5154_v49 = vpop.f32.mrb[6].mxu0 }
 0x6af   : > { %v8342_v44 = vadd.f32 %v5154_v49, %v4713_v19  ;;  %v7421_v47 = vpop.f32.mrb[7].mxu0 }
 0x6b1   : > { %v5158_v55 = vmax.f32 %v8342_v44, 0.0 }
 0x6b3   : > { %5159 = vst [vmem:[%s415_s21] sm:$0xff] %v5158_v55 }
 0x6b4   : > { %8633 = shalt.err (!%p8630_p5)
}
 0x6b5   : > { %s8634_s29 = scalar_lea.hbm %s10829_s19, 128  ;;  %s8638_s7 = scalar_lea.hbm %s10884_s6, 256 }
 0x6b6   : > { %p8635_p1 = scmp.ne.s32.totalorder %s10829_s19, %s8634_s29  ;;  %p8639_p12 = scmp.lt.u32.totalorder %s10829_s19, %s10884_s6 }
 0x6b7   : > { %p8640_p2 = scmp.lt.u32.totalorder %s8638_s7, %s8634_s29  ;;  %p8642_p0 = scmp.lt.u32.totalorder %s8634_s29, %s10829_s19 }
 0x6b8   : > { %p8636_p6 = pnand %p8635_p1, %p11243_p4 }
 0x6b9   : > { %p8641_p8 = por %p8640_p2, %p8639_p12 }
 0x6ba   : > { %p8637_p9 = pneg %p8636_p6 }
 0x6bb   : > { %p8643_p10 = por %p8642_p0, %p8641_p8 }
 0x6bd   : > { %p8644_p13 = pnand %p8643_p10, %p8637_p9 }
 0x6bf   : > { %8647 = shalt.err (!%p8644_p13)
}
 0x6c0   : > { %8417 = dma.vmem_to_hbm [thread:$0]  (%p11243_p4), %s10831_s13, 128, %s10829_s19, %s5161_s12  }
 0x6c1 PF: > { %s11244_s17 = sld [smem:[#allocation16_spill]]  ;;  %s11245_s8 = sld [smem:[#allocation22_spill]] }
 0x6c2   : > { %s11246_s15 = sld [smem:[#allocation19_spill]] }
 0x6c7   : > { %s5187_s26 = sand.u32 1, %s11244_s17   ;;  %p11247_p7 = scmp.ne.s32.totalorder %s11245_s8, 0 }
 0x6c8   : > { %p11248_p11 = scmp.ge.s32.totalorder %s11246_s15, 2  ;;  %s5188_s23 = scalar_lea.sflag [#allocation5], %s5187_s26 }
 0x6ca   : > { %p8433_p3 = pnand %p11248_p11, %p11247_p7 }
 0x6cc   : > { %8685 = dma.done.wait (!%p8433_p3), %s5188_s23, 128  }
 0x6cd   : > { %8687 = vsyncadd (!%p8433_p3), %s5188_s23, 4294967168  ;;  %s28_s26 = sadd.s32 1, %s11246_s15   ;;  %s11249_s14 = sld [smem:[#allocation17_spill]] }
 0x6ce   : > { %p25_p5 = scmp.ge.s32.totalorder %s28_s26, 4   ;;  %s11250_s23 = sld [smem:[#allocation21_spill]] }
 0x6cf   : > { %s11251_s24 = sld [smem:[#allocation18_spill]]  ;;  %s11252_s25 = sld [smem:[#allocation20_spill]] }
 0x6d0   : > { %s11253_s21 = smov %s8694_s22  ;;  %27 = sbr.rel (!%p25_p5) target bundleno = 12 (0xc), region = 147 }
 0x6d3   : > { %s11254_s22 = smov %s11249_s14 }
 0x6d7   :  { %5193 = vsyncpa [#allocation4], 1 }
 0x6d8   :  { %5195 = vsyncpa [#allocation4 + $0x1], 1 }
 0x6d9   :  { %5196 = vsyncpa [#allocation7], 1 }
 0x6da   :  { %5198 = vsyncpa [#allocation7 + $0x1], 1 }
 0x6db   :  { %5199 = vsyncpa [#allocation10], 1 }
 0x6dc   :  { %5201 = vsyncpa [#allocation10 + $0x1], 1 }
 0x6dd   :  { %5202 = vsyncpa [#allocation5], 1 }
 0x6de   :  { %5204 = vsyncpa [#allocation5 + $0x1], 1 }

</bundles_post_ra>
